<compile_context>
chip_gen: v7x
topology: tpu7x:2x2x1
jax: 0.10.0
libtpu: 0.0.40
codegen_flags: <defaults>
</compile_context>

<pallas_src>
import jax
import jax.numpy as jnp
import numpy as np
from jax import lax
from jax.experimental import pallas as pl
from jax.experimental.pallas import tpu as pltpu

BT = 4                  # batch elements per grid step (lane-stacked)
LANES = 64 * BT         # transposed-chain activation lane width (256)
F_PAD = 32              # input feature dim 27 padded to 32 (clean DMA)

# Set to jnp.bfloat16 for ~2x MXU throughput (weights + matmul inputs bf16,
# f32 accumulation).  Default f32 preserves the PyTorch module's numerics.
MATMUL_DTYPE = jnp.float32

# Chain plans: (kind, n_blocks, in_width, out_width_padded)
#   "id": identity-shortcut blocks (in==out) -> fori_loop, sc = activation
#   "tr": real-shortcut transition block     -> straight-line, 3 matmuls
T_PLAN = (  # residual_expand (10) + reduce_layers (34), transposed layout
    ("id", 10, 64, 64),
    ("tr", 1, 64, 32),
    ("id", 10, 32, 32),
    ("tr", 1, 32, 16),
    ("id", 10, 16, 16),
    ("tr", 1, 16, 8),
    ("id", 10, 8, 8),
    ("tr", 1, 8, 8),    # true 8 -> 1, out padded to 8 (rows 1..7 stay zero)
)
F_PLAN = (  # final_reduce (34), row layout
    ("tr", 1, 64, 32),
    ("id", 10, 32, 32),
    ("tr", 1, 32, 16),
    ("id", 10, 16, 16),
    ("tr", 1, 16, 8),
    ("id", 10, 8, 8),
    ("tr", 1, 8, 8),    # true 8 -> 3, out padded to 8 (cols 3..7 stay zero)
)


def _n_arrays(plan):
    return sum(4 if kind == "id" else 6 for kind, *_ in plan)


N_WEIGHTS = 4 + _n_arrays(T_PLAN) + _n_arrays(F_PLAN)


# ------------------------------ fused kernel --------------------------------

def _dot(a, b):
    return jnp.dot(a.astype(MATMUL_DTYPE), b.astype(MATMUL_DTYPE),
                   preferred_element_type=jnp.float32)


def _fused_kernel(*refs):
    x_ref = refs[0]
    wrefs = refs[1:1 + N_WEIGHTS]
    o_ref = refs[1 + N_WEIGHTS]
    a_scr = refs[2 + N_WEIGHTS]          # (64, LANES) VMEM scratch
    r_scr = refs[3 + N_WEIGHTS]          # (8, 64)    VMEM scratch
    it = iter(wrefs)

    # ---- expand: Linear(27,64)+ReLU, permute(0,2,1), Linear(60,64)+ReLU ----
    we1 = next(it)[...]; be1 = next(it)[...]
    we2t = next(it)[...]; be2c = next(it)[...]
    for t in range(BT):                                   # tiny static unroll
        g = jnp.maximum(_dot(x_ref[t], we1) + be1, 0.0)   # (60, 64)
        at = jnp.maximum(_dot(we2t, g) + be2c, 0.0)       # (64, 64) transposed
        a_scr[:, 64 * t:64 * (t + 1)] = at                # lane-stack elements

    # ---- residual_expand + reduce_layers (44 blocks), transposed layout ----
    a = a_scr[...]                                        # (64, LANES)
    for kind, count, _w_in, _w_out in T_PLAN:
        if kind == "id":
            w1_r = next(it); b1_r = next(it); w2_r = next(it); b2_r = next(it)

            def body(i, a, w1_r=w1_r, b1_r=b1_r, w2_r=w2_r, b2_r=b2_r):
                h = jnp.maximum(_dot(w1_r[i], a) + b1_r[i], 0.0)
                out = _dot(w2_r[i], h) + b2_r[i]
                return jnp.maximum(out + a, 0.0)          # identity shortcut

            a = lax.fori_loop(0, count, body, a)
        else:
            w1 = next(it)[...]; b1 = next(it)[...]
            w2 = next(it)[...]; b2 = next(it)[...]
            ws = next(it)[...]; bs = next(it)[...]
            h = jnp.maximum(_dot(w1, a) + b1, 0.0)
            out = _dot(w2, h) + b2
            sc = _dot(ws, a) + bs                         # real shortcut
            a = jnp.maximum(out + sc, 0.0)                # (w_out, LANES)

    # ---- pivot: row 0 lane-blocks -> rows (== view(batch, 64)) --------------
    # Only row 0 of `a` is meaningful (reduce chain ends at 1 feature; padded
    # rows are exactly zero by construction).
    a_scr[0:8, :] = a                                     # a is (8, LANES)
    r_scr[...] = jnp.zeros_like(r_scr)
    for t in range(BT):
        r_scr[t:t + 1, :] = a_scr[0:1, 64 * t:64 * (t + 1)]
    r = r_scr[...]                                        # (8, 64); rows BT..7
                                                          # are zero / unused

    # ---- final_reduce (34 blocks), row layout, all BT elements at once ------
    for kind, count, _w_in, _w_out in F_PLAN:
        if kind == "id":
            w1_r = next(it); b1_r = next(it); w2_r = next(it); b2_r = next(it)

            def body(i, r, w1_r=w1_r, b1_r=b1_r, w2_r=w2_r, b2_r=b2_r):
                h = jnp.maximum(_dot(r, w1_r[i]) + b1_r[i], 0.0)
                out = _dot(h, w2_r[i]) + b2_r[i]
                return jnp.maximum(out + r, 0.0)          # identity shortcut

            r = lax.fori_loop(0, count, body, r)
        else:
            w1 = next(it)[...]; b1 = next(it)[...]
            w2 = next(it)[...]; b2 = next(it)[...]
            ws = next(it)[...]; bs = next(it)[...]
            h = jnp.maximum(_dot(r, w1) + b1, 0.0)
            out = _dot(h, w2) + b2
            sc = _dot(r, ws) + bs
            r = jnp.maximum(out + sc, 0.0)                # (8, w_out)

    assert next(it, None) is None                         # trace-time sanity
    # NOTE: rows BT..7 of r carry harmless per-row garbage (bias broadcast);
    # rows never mix in row layout and only rows 0..BT-1 / cols 0..2 are read.
    o_ref[0] = r[0:BT, 0:3].astype(o_ref.dtype)           # (BT, 3)


# ------------------------------ wrapper --------------------------------------

def _const_spec(shape):
    nd = len(shape)

    def idx(b):
        return (0,) * nd

    return pl.BlockSpec(shape, idx)


def _plan_flops(plan, cols):
    f = 0
    for kind, count, w_in, w_out in plan:
        per = 2 * (w_in * w_out + w_out * w_out) * cols
        if kind == "tr":
            per += 2 * w_in * w_out * cols
        f += count * per
    return f


@jax.jit
def mymodel_forward(weights, x):
    B, S, F = x.shape                                     # (B, 60, 27)
    Bp = ((B + BT - 1) // BT) * BT                        # pad batch to BT
    x_p = jnp.pad(x, ((0, Bp - B), (0, 0), (0, F_PAD - F)))
    n_steps = Bp // BT                                    # keep even for v7x

    flops = n_steps * (BT * (2 * S * F_PAD * 64 + 2 * 64 * S * 64)
                       + _plan_flops(T_PLAN, LANES) + _plan_flops(F_PLAN, 8))
    bytes_accessed = (x_p.size * 4 + Bp * 3 * 4
                      + sum(int(w.size) * w.dtype.itemsize for w in weights))

    out = pl.pallas_call(
        _fused_kernel,
        out_shape=jax.ShapeDtypeStruct((n_steps, BT, 3), x.dtype),
        grid_spec=pltpu.PrefetchScalarGridSpec(
            num_scalar_prefetch=0,
            grid=(n_steps,),
            in_specs=[pl.BlockSpec((BT, S, F_PAD), lambda b: (b, 0, 0))]
                     + [_const_spec(tuple(w.shape)) for w in weights],
            out_specs=pl.BlockSpec((1, BT, 3), lambda b: (b, 0, 0)),
            scratch_shapes=[pltpu.VMEM((64, LANES), jnp.float32),
                            pltpu.VMEM((8, 64), jnp.float32)],
        ),
        compiler_params=pltpu.CompilerParams(
            dimension_semantics=("parallel",),
            vmem_limit_bytes=32 * 1024 * 1024,
        ),
        cost_estimate=pl.CostEstimate(
            flops=int(flops), transcendentals=0,
            bytes_accessed=int(bytes_accessed)),
    )(x_p, *weights)
    return out.reshape(Bp, 3)[:B].reshape(B, 3, 1)


# --------------------------- parameter init ----------------------------------

def _init_linear(key, fan_in, fan_out):
    # PyTorch nn.Linear default: U(-1/sqrt(fan_in), 1/sqrt(fan_in)).
    kw, kb = jax.random.split(key)
    bound = 1.0 / float(fan_in) ** 0.5
    w = jax.random.uniform(kw, (fan_in, fan_out), jnp.float32, -bound, bound)
    b = jax.random.uniform(kb, (fan_out,), jnp.float32, -bound, bound)
    return w, b


def _init_resblock(key, fin, fout):
    k1, k2, k3 = jax.random.split(key, 3)
    w1, b1 = _init_linear(k1, fin, fout)
    w2, b2 = _init_linear(k2, fout, fout)
    p = {"w1": w1, "b1": b1, "w2": w2, "b2": b2}
    if fin != fout:
        ws, bs = _init_linear(k3, fin, fout)
        p["ws"], p["bs"] = ws, bs
    return p


def _reduce_dims(last_out):
    dims = [(64, 32)] + [(32, 32)] * 10
    dims += [(32, 16)] + [(16, 16)] * 10
    dims += [(16, 8)] + [(8, 8)] * 10
    dims += [(8, last_out)]
    return dims


def init_params(key):
    keys = jax.random.split(key, 4)
    params = {}
    ke = jax.random.split(keys[0], 2)
    params["expand_fc1"] = _init_linear(ke[0], 27, 64)
    params["expand_fc2"] = _init_linear(ke[1], 60, 64)
    kr = jax.random.split(keys[1], 10)
    params["residual_expand"] = [_init_resblock(kr[i], 64, 64) for i in range(10)]
    dims = _reduce_dims(1)
    kd = jax.random.split(keys[2], len(dims))
    params["reduce_layers"] = [_init_resblock(kd[i], fi, fo)
                               for i, (fi, fo) in enumerate(dims)]
    dims = _reduce_dims(3)
    kf = jax.random.split(keys[3], len(dims))
    params["final_reduce"] = [_init_resblock(kf[i], fi, fo)
                              for i, (fi, fo) in enumerate(dims)]
    return params


# --------------------------- parameter packing --------------------------------

def _prep_w(w, w_in, w_out, transposed):
    fin, fout = w.shape
    wp = jnp.zeros((w_in, w_out), jnp.float32).at[:fin, :fout].set(w)
    if transposed:
        wp = wp.T
    return wp.astype(MATMUL_DTYPE)


def _prep_b(b, w_out, transposed):
    bp = jnp.zeros((w_out,), jnp.float32).at[:b.shape[0]].set(b)
    return bp.reshape(w_out, 1) if transposed else bp.reshape(1, w_out)


def _pack_chain(blocks, plan, transposed):
    arrays, idx = [], 0
    for kind, count, w_in, w_out in plan:
        seg = blocks[idx:idx + count]
        idx += count
        if kind == "id":
            arrays.append(jnp.stack([_prep_w(p["w1"], w_in, w_out, transposed)
                                     for p in seg]))
            arrays.append(jnp.stack([_prep_b(p["b1"], w_out, transposed)
                                     for p in seg]))
            arrays.append(jnp.stack([_prep_w(p["w2"], w_out, w_out, transposed)
                                     for p in seg]))
            arrays.append(jnp.stack([_prep_b(p["b2"], w_out, transposed)
                                     for p in seg]))
        else:
            (p,) = seg
            arrays += [_prep_w(p["w1"], w_in, w_out, transposed),
                       _prep_b(p["b1"], w_out, transposed),
                       _prep_w(p["w2"], w_out, w_out, transposed),
                       _prep_b(p["b2"], w_out, transposed),
                       _prep_w(p["ws"], w_in, w_out, transposed),
                       _prep_b(p["bs"], w_out, transposed)]
    assert idx == len(blocks)
    return arrays


def pack_params(params):
    arrays = []
    w, b = params["expand_fc1"]                           # (27, 64), (64,)
    we1 = jnp.zeros((F_PAD, 64), jnp.float32).at[:w.shape[0], :].set(w)
    arrays += [we1.astype(MATMUL_DTYPE), b.reshape(1, 64).astype(jnp.float32)]
    w, b = params["expand_fc2"]                           # (60, 64), (64,)
    arrays += [jnp.transpose(w).astype(MATMUL_DTYPE),
               b.reshape(64, 1).astype(jnp.float32)]

    t_blocks = list(params["residual_expand"]) + list(params["reduce_layers"])
    arrays += _pack_chain(t_blocks, T_PLAN, transposed=True)
    arrays += _pack_chain(list(params["final_reduce"]), F_PLAN, transposed=False)
    assert len(arrays) == N_WEIGHTS, (len(arrays), N_WEIGHTS)
    return arrays


# --------------------------- pure-JAX reference --------------------------------

def _ref_block(p, x):
    hp = jax.lax.Precision.HIGHEST
    h = jnp.maximum(jnp.dot(x, p["w1"], precision=hp) + p["b1"], 0.0)
    out = jnp.dot(h, p["w2"], precision=hp) + p["b2"]
    sc = jnp.dot(x, p["ws"], precision=hp) + p["bs"] if "ws" in p else x
    return jnp.maximum(out + sc, 0.0)


def mymodel_reference(params, x):
    hp = jax.lax.Precision.HIGHEST
    B, S, F = x.shape
    w, b = params["expand_fc1"]
    h = jnp.maximum(jnp.dot(x.reshape(B * S, F), w, precision=hp) + b, 0.0)
    h = h.reshape(B, S, 64).transpose(0, 2, 1).reshape(B * 64, S)
    w, b = params["expand_fc2"]
    h = jnp.maximum(jnp.dot(h, w, precision=hp) + b, 0.0)
    for p in params["residual_expand"]:
        h = _ref_block(p, h)
    for p in params["reduce_layers"]:
        h = _ref_block(p, h)
    h = h.reshape(B, 64)
    for p in params["final_reduce"]:
        h = _ref_block(p, h)
    return h.reshape(B, 3, 1)


# ------------------------------- main -----------------------------------------

if __name__ == "__main__":
    key = jax.random.PRNGKey(0)
    k_params, k_x = jax.random.split(key)
    params = init_params(k_params)
    weights = pack_params(params)

    batch = 6            # exercises batch padding (6 -> 8, grid of 2 steps)
    x = jax.random.normal(k_x, (batch, 60, 27), dtype=jnp.float32)

    out = jax.block_until_ready(mymodel_forward(weights, x))
    assert out.shape == (batch, 3, 1), out.shape

    ref = jax.block_until_ready(mymodel_reference(params, x))
    np.testing.assert_allclose(np.asarray(out), np.asarray(ref),
                               rtol=2e-2, atol=2e-3)

    print("KERNEL_OK")
</pallas_src>

<mosaic_0001>
module attributes {stable_mosaic.version = 11 : i64} {
  func.func @_fused_kernel(%arg0: i32, %arg1: memref<4x60x32xf32, #tpu.memory_space<vmem>>, %arg2: memref<32x64xf32, #tpu.memory_space<vmem>>, %arg3: memref<1x64xf32, #tpu.memory_space<vmem>>, %arg4: memref<64x60xf32, #tpu.memory_space<vmem>>, %arg5: memref<64x1xf32, #tpu.memory_space<vmem>>, %arg6: memref<10x64x64xf32, #tpu.memory_space<vmem>>, %arg7: memref<10x64x1xf32, #tpu.memory_space<vmem>>, %arg8: memref<10x64x64xf32, #tpu.memory_space<vmem>>, %arg9: memref<10x64x1xf32, #tpu.memory_space<vmem>>, %arg10: memref<32x64xf32, #tpu.memory_space<vmem>>, %arg11: memref<32x1xf32, #tpu.memory_space<vmem>>, %arg12: memref<32x32xf32, #tpu.memory_space<vmem>>, %arg13: memref<32x1xf32, #tpu.memory_space<vmem>>, %arg14: memref<32x64xf32, #tpu.memory_space<vmem>>, %arg15: memref<32x1xf32, #tpu.memory_space<vmem>>, %arg16: memref<10x32x32xf32, #tpu.memory_space<vmem>>, %arg17: memref<10x32x1xf32, #tpu.memory_space<vmem>>, %arg18: memref<10x32x32xf32, #tpu.memory_space<vmem>>, %arg19: memref<10x32x1xf32, #tpu.memory_space<vmem>>, %arg20: memref<16x32xf32, #tpu.memory_space<vmem>>, %arg21: memref<16x1xf32, #tpu.memory_space<vmem>>, %arg22: memref<16x16xf32, #tpu.memory_space<vmem>>, %arg23: memref<16x1xf32, #tpu.memory_space<vmem>>, %arg24: memref<16x32xf32, #tpu.memory_space<vmem>>, %arg25: memref<16x1xf32, #tpu.memory_space<vmem>>, %arg26: memref<10x16x16xf32, #tpu.memory_space<vmem>>, %arg27: memref<10x16x1xf32, #tpu.memory_space<vmem>>, %arg28: memref<10x16x16xf32, #tpu.memory_space<vmem>>, %arg29: memref<10x16x1xf32, #tpu.memory_space<vmem>>, %arg30: memref<8x16xf32, #tpu.memory_space<vmem>>, %arg31: memref<8x1xf32, #tpu.memory_space<vmem>>, %arg32: memref<8x8xf32, #tpu.memory_space<vmem>>, %arg33: memref<8x1xf32, #tpu.memory_space<vmem>>, %arg34: memref<8x16xf32, #tpu.memory_space<vmem>>, %arg35: memref<8x1xf32, #tpu.memory_space<vmem>>, %arg36: memref<10x8x8xf32, #tpu.memory_space<vmem>>, %arg37: memref<10x8x1xf32, #tpu.memory_space<vmem>>, %arg38: memref<10x8x8xf32, #tpu.memory_space<vmem>>, %arg39: memref<10x8x1xf32, #tpu.memory_space<vmem>>, %arg40: memref<8x8xf32, #tpu.memory_space<vmem>>, %arg41: memref<8x1xf32, #tpu.memory_space<vmem>>, %arg42: memref<8x8xf32, #tpu.memory_space<vmem>>, %arg43: memref<8x1xf32, #tpu.memory_space<vmem>>, %arg44: memref<8x8xf32, #tpu.memory_space<vmem>>, %arg45: memref<8x1xf32, #tpu.memory_space<vmem>>, %arg46: memref<64x32xf32, #tpu.memory_space<vmem>>, %arg47: memref<1x32xf32, #tpu.memory_space<vmem>>, %arg48: memref<32x32xf32, #tpu.memory_space<vmem>>, %arg49: memref<1x32xf32, #tpu.memory_space<vmem>>, %arg50: memref<64x32xf32, #tpu.memory_space<vmem>>, %arg51: memref<1x32xf32, #tpu.memory_space<vmem>>, %arg52: memref<10x32x32xf32, #tpu.memory_space<vmem>>, %arg53: memref<10x1x32xf32, #tpu.memory_space<vmem>>, %arg54: memref<10x32x32xf32, #tpu.memory_space<vmem>>, %arg55: memref<10x1x32xf32, #tpu.memory_space<vmem>>, %arg56: memref<32x16xf32, #tpu.memory_space<vmem>>, %arg57: memref<1x16xf32, #tpu.memory_space<vmem>>, %arg58: memref<16x16xf32, #tpu.memory_space<vmem>>, %arg59: memref<1x16xf32, #tpu.memory_space<vmem>>, %arg60: memref<32x16xf32, #tpu.memory_space<vmem>>, %arg61: memref<1x16xf32, #tpu.memory_space<vmem>>, %arg62: memref<10x16x16xf32, #tpu.memory_space<vmem>>, %arg63: memref<10x1x16xf32, #tpu.memory_space<vmem>>, %arg64: memref<10x16x16xf32, #tpu.memory_space<vmem>>, %arg65: memref<10x1x16xf32, #tpu.memory_space<vmem>>, %arg66: memref<16x8xf32, #tpu.memory_space<vmem>>, %arg67: memref<1x8xf32, #tpu.memory_space<vmem>>, %arg68: memref<8x8xf32, #tpu.memory_space<vmem>>, %arg69: memref<1x8xf32, #tpu.memory_space<vmem>>, %arg70: memref<16x8xf32, #tpu.memory_space<vmem>>, %arg71: memref<1x8xf32, #tpu.memory_space<vmem>>, %arg72: memref<10x8x8xf32, #tpu.memory_space<vmem>>, %arg73: memref<10x1x8xf32, #tpu.memory_space<vmem>>, %arg74: memref<10x8x8xf32, #tpu.memory_space<vmem>>, %arg75: memref<10x1x8xf32, #tpu.memory_space<vmem>>, %arg76: memref<8x8xf32, #tpu.memory_space<vmem>>, %arg77: memref<1x8xf32, #tpu.memory_space<vmem>>, %arg78: memref<8x8xf32, #tpu.memory_space<vmem>>, %arg79: memref<1x8xf32, #tpu.memory_space<vmem>>, %arg80: memref<8x8xf32, #tpu.memory_space<vmem>>, %arg81: memref<1x8xf32, #tpu.memory_space<vmem>>, %arg82: memref<1x4x3xf32, #tpu.memory_space<vmem>>, %arg83: memref<64x256xf32, #tpu.memory_space<vmem>>, %arg84: memref<8x64xf32, #tpu.memory_space<vmem>>) attributes {dimension_semantics = [#tpu.dimension_semantics<parallel>], iteration_bounds = array<i64: 2>, scalar_prefetch = 0 : i64, scratch_operands = 2 : i64, tpu.core_type = #tpu.core_type<tc>, window_params = [{transform_indices = @transform_0, window_bounds = array<i64: 4, 60, 32>}, {pipeline_mode = #tpu.pipeline_mode<synchronous>, transform_indices = @transform_1, window_bounds = array<i64: 32, 64>}, {pipeline_mode = #tpu.pipeline_mode<synchronous>, transform_indices = @transform_2, window_bounds = array<i64: 1, 64>}, {pipeline_mode = #tpu.pipeline_mode<synchronous>, transform_indices = @transform_3, window_bounds = array<i64: 64, 60>}, {pipeline_mode = #tpu.pipeline_mode<synchronous>, transform_indices = @transform_4, window_bounds = array<i64: 64, 1>}, {pipeline_mode = #tpu.pipeline_mode<synchronous>, transform_indices = @transform_5, window_bounds = array<i64: 10, 64, 64>}, {pipeline_mode = #tpu.pipeline_mode<synchronous>, transform_indices = @transform_6, window_bounds = array<i64: 10, 64, 1>}, {pipeline_mode = #tpu.pipeline_mode<synchronous>, transform_indices = @transform_7, window_bounds = array<i64: 10, 64, 64>}, {pipeline_mode = #tpu.pipeline_mode<synchronous>, transform_indices = @transform_8, window_bounds = array<i64: 10, 64, 1>}, {pipeline_mode = #tpu.pipeline_mode<synchronous>, transform_indices = @transform_9, window_bounds = array<i64: 32, 64>}, {pipeline_mode = #tpu.pipeline_mode<synchronous>, transform_indices = @transform_10, window_bounds = array<i64: 32, 1>}, {pipeline_mode = #tpu.pipeline_mode<synchronous>, transform_indices = @transform_11, window_bounds = array<i64: 32, 32>}, {pipeline_mode = #tpu.pipeline_mode<synchronous>, transform_indices = @transform_12, window_bounds = array<i64: 32, 1>}, {pipeline_mode = #tpu.pipeline_mode<synchronous>, transform_indices = @transform_13, window_bounds = array<i64: 32, 64>}, {pipeline_mode = #tpu.pipeline_mode<synchronous>, transform_indices = @transform_14, window_bounds = array<i64: 32, 1>}, {pipeline_mode = #tpu.pipeline_mode<synchronous>, transform_indices = @transform_15, window_bounds = array<i64: 10, 32, 32>}, {pipeline_mode = #tpu.pipeline_mode<synchronous>, transform_indices = @transform_16, window_bounds = array<i64: 10, 32, 1>}, {pipeline_mode = #tpu.pipeline_mode<synchronous>, transform_indices = @transform_17, window_bounds = array<i64: 10, 32, 32>}, {pipeline_mode = #tpu.pipeline_mode<synchronous>, transform_indices = @transform_18, window_bounds = array<i64: 10, 32, 1>}, {pipeline_mode = #tpu.pipeline_mode<synchronous>, transform_indices = @transform_19, window_bounds = array<i64: 16, 32>}, {pipeline_mode = #tpu.pipeline_mode<synchronous>, transform_indices = @transform_20, window_bounds = array<i64: 16, 1>}, {pipeline_mode = #tpu.pipeline_mode<synchronous>, transform_indices = @transform_21, window_bounds = array<i64: 16, 16>}, {pipeline_mode = #tpu.pipeline_mode<synchronous>, transform_indices = @transform_22, window_bounds = array<i64: 16, 1>}, {pipeline_mode = #tpu.pipeline_mode<synchronous>, transform_indices = @transform_23, window_bounds = array<i64: 16, 32>}, {pipeline_mode = #tpu.pipeline_mode<synchronous>, transform_indices = @transform_24, window_bounds = array<i64: 16, 1>}, {pipeline_mode = #tpu.pipeline_mode<synchronous>, transform_indices = @transform_25, window_bounds = array<i64: 10, 16, 16>}, {pipeline_mode = #tpu.pipeline_mode<synchronous>, transform_indices = @transform_26, window_bounds = array<i64: 10, 16, 1>}, {pipeline_mode = #tpu.pipeline_mode<synchronous>, transform_indices = @transform_27, window_bounds = array<i64: 10, 16, 16>}, {pipeline_mode = #tpu.pipeline_mode<synchronous>, transform_indices = @transform_28, window_bounds = array<i64: 10, 16, 1>}, {pipeline_mode = #tpu.pipeline_mode<synchronous>, transform_indices = @transform_29, window_bounds = array<i64: 8, 16>}, {pipeline_mode = #tpu.pipeline_mode<synchronous>, transform_indices = @transform_30, window_bounds = array<i64: 8, 1>}, {pipeline_mode = #tpu.pipeline_mode<synchronous>, transform_indices = @transform_31, window_bounds = array<i64: 8, 8>}, {pipeline_mode = #tpu.pipeline_mode<synchronous>, transform_indices = @transform_32, window_bounds = array<i64: 8, 1>}, {pipeline_mode = #tpu.pipeline_mode<synchronous>, transform_indices = @transform_33, window_bounds = array<i64: 8, 16>}, {pipeline_mode = #tpu.pipeline_mode<synchronous>, transform_indices = @transform_34, window_bounds = array<i64: 8, 1>}, {pipeline_mode = #tpu.pipeline_mode<synchronous>, transform_indices = @transform_35, window_bounds = array<i64: 10, 8, 8>}, {pipeline_mode = #tpu.pipeline_mode<synchronous>, transform_indices = @transform_36, window_bounds = array<i64: 10, 8, 1>}, {pipeline_mode = #tpu.pipeline_mode<synchronous>, transform_indices = @transform_37, window_bounds = array<i64: 10, 8, 8>}, {pipeline_mode = #tpu.pipeline_mode<synchronous>, transform_indices = @transform_38, window_bounds = array<i64: 10, 8, 1>}, {pipeline_mode = #tpu.pipeline_mode<synchronous>, transform_indices = @transform_39, window_bounds = array<i64: 8, 8>}, {pipeline_mode = #tpu.pipeline_mode<synchronous>, transform_indices = @transform_40, window_bounds = array<i64: 8, 1>}, {pipeline_mode = #tpu.pipeline_mode<synchronous>, transform_indices = @transform_41, window_bounds = array<i64: 8, 8>}, {pipeline_mode = #tpu.pipeline_mode<synchronous>, transform_indices = @transform_42, window_bounds = array<i64: 8, 1>}, {pipeline_mode = #tpu.pipeline_mode<synchronous>, transform_indices = @transform_43, window_bounds = array<i64: 8, 8>}, {pipeline_mode = #tpu.pipeline_mode<synchronous>, transform_indices = @transform_44, window_bounds = array<i64: 8, 1>}, {pipeline_mode = #tpu.pipeline_mode<synchronous>, transform_indices = @transform_45, window_bounds = array<i64: 64, 32>}, {pipeline_mode = #tpu.pipeline_mode<synchronous>, transform_indices = @transform_46, window_bounds = array<i64: 1, 32>}, {pipeline_mode = #tpu.pipeline_mode<synchronous>, transform_indices = @transform_47, window_bounds = array<i64: 32, 32>}, {pipeline_mode = #tpu.pipeline_mode<synchronous>, transform_indices = @transform_48, window_bounds = array<i64: 1, 32>}, {pipeline_mode = #tpu.pipeline_mode<synchronous>, transform_indices = @transform_49, window_bounds = array<i64: 64, 32>}, {pipeline_mode = #tpu.pipeline_mode<synchronous>, transform_indices = @transform_50, window_bounds = array<i64: 1, 32>}, {pipeline_mode = #tpu.pipeline_mode<synchronous>, transform_indices = @transform_51, window_bounds = array<i64: 10, 32, 32>}, {pipeline_mode = #tpu.pipeline_mode<synchronous>, transform_indices = @transform_52, window_bounds = array<i64: 10, 1, 32>}, {pipeline_mode = #tpu.pipeline_mode<synchronous>, transform_indices = @transform_53, window_bounds = array<i64: 10, 32, 32>}, {pipeline_mode = #tpu.pipeline_mode<synchronous>, transform_indices = @transform_54, window_bounds = array<i64: 10, 1, 32>}, {pipeline_mode = #tpu.pipeline_mode<synchronous>, transform_indices = @transform_55, window_bounds = array<i64: 32, 16>}, {pipeline_mode = #tpu.pipeline_mode<synchronous>, transform_indices = @transform_56, window_bounds = array<i64: 1, 16>}, {pipeline_mode = #tpu.pipeline_mode<synchronous>, transform_indices = @transform_57, window_bounds = array<i64: 16, 16>}, {pipeline_mode = #tpu.pipeline_mode<synchronous>, transform_indices = @transform_58, window_bounds = array<i64: 1, 16>}, {pipeline_mode = #tpu.pipeline_mode<synchronous>, transform_indices = @transform_59, window_bounds = array<i64: 32, 16>}, {pipeline_mode = #tpu.pipeline_mode<synchronous>, transform_indices = @transform_60, window_bounds = array<i64: 1, 16>}, {pipeline_mode = #tpu.pipeline_mode<synchronous>, transform_indices = @transform_61, window_bounds = array<i64: 10, 16, 16>}, {pipeline_mode = #tpu.pipeline_mode<synchronous>, transform_indices = @transform_62, window_bounds = array<i64: 10, 1, 16>}, {pipeline_mode = #tpu.pipeline_mode<synchronous>, transform_indices = @transform_63, window_bounds = array<i64: 10, 16, 16>}, {pipeline_mode = #tpu.pipeline_mode<synchronous>, transform_indices = @transform_64, window_bounds = array<i64: 10, 1, 16>}, {pipeline_mode = #tpu.pipeline_mode<synchronous>, transform_indices = @transform_65, window_bounds = array<i64: 16, 8>}, {pipeline_mode = #tpu.pipeline_mode<synchronous>, transform_indices = @transform_66, window_bounds = array<i64: 1, 8>}, {pipeline_mode = #tpu.pipeline_mode<synchronous>, transform_indices = @transform_67, window_bounds = array<i64: 8, 8>}, {pipeline_mode = #tpu.pipeline_mode<synchronous>, transform_indices = @transform_68, window_bounds = array<i64: 1, 8>}, {pipeline_mode = #tpu.pipeline_mode<synchronous>, transform_indices = @transform_69, window_bounds = array<i64: 16, 8>}, {pipeline_mode = #tpu.pipeline_mode<synchronous>, transform_indices = @transform_70, window_bounds = array<i64: 1, 8>}, {pipeline_mode = #tpu.pipeline_mode<synchronous>, transform_indices = @transform_71, window_bounds = array<i64: 10, 8, 8>}, {pipeline_mode = #tpu.pipeline_mode<synchronous>, transform_indices = @transform_72, window_bounds = array<i64: 10, 1, 8>}, {pipeline_mode = #tpu.pipeline_mode<synchronous>, transform_indices = @transform_73, window_bounds = array<i64: 10, 8, 8>}, {pipeline_mode = #tpu.pipeline_mode<synchronous>, transform_indices = @transform_74, window_bounds = array<i64: 10, 1, 8>}, {pipeline_mode = #tpu.pipeline_mode<synchronous>, transform_indices = @transform_75, window_bounds = array<i64: 8, 8>}, {pipeline_mode = #tpu.pipeline_mode<synchronous>, transform_indices = @transform_76, window_bounds = array<i64: 1, 8>}, {pipeline_mode = #tpu.pipeline_mode<synchronous>, transform_indices = @transform_77, window_bounds = array<i64: 8, 8>}, {pipeline_mode = #tpu.pipeline_mode<synchronous>, transform_indices = @transform_78, window_bounds = array<i64: 1, 8>}, {pipeline_mode = #tpu.pipeline_mode<synchronous>, transform_indices = @transform_79, window_bounds = array<i64: 8, 8>}, {pipeline_mode = #tpu.pipeline_mode<synchronous>, transform_indices = @transform_80, window_bounds = array<i64: 1, 8>}, {transform_indices = @transform_81, window_bounds = array<i64: 1, 4, 3>}]} {
    %c0 = arith.constant 0 : index
    %c0_0 = arith.constant 0 : index
    %0 = vector.load %arg2[%c0, %c0_0] : memref<32x64xf32, #tpu.memory_space<vmem>>, vector<32x64xf32>
    %c0_1 = arith.constant 0 : index
    %c0_2 = arith.constant 0 : index
    %1 = vector.load %arg3[%c0_1, %c0_2] : memref<1x64xf32, #tpu.memory_space<vmem>>, vector<1x64xf32>
    %c0_3 = arith.constant 0 : index
    %c0_4 = arith.constant 0 : index
    %2 = vector.load %arg4[%c0_3, %c0_4] : memref<64x60xf32, #tpu.memory_space<vmem>>, vector<64x60xf32>
    %c0_5 = arith.constant 0 : index
    %c0_6 = arith.constant 0 : index
    %3 = vector.load %arg5[%c0_5, %c0_6] : memref<64x1xf32, #tpu.memory_space<vmem>>, vector<64x1xf32>
    %c0_7 = arith.constant 0 : index
    %c0_8 = arith.constant 0 : index
    %c0_9 = arith.constant 0 : index
    %4 = vector.load %arg1[%c0_7, %c0_8, %c0_9] : memref<4x60x32xf32, #tpu.memory_space<vmem>>, vector<1x60x32xf32>
    %5 = vector.shape_cast %4 : vector<1x60x32xf32> to vector<60x32xf32>
    %cst = arith.constant dense<0.000000e+00> : vector<60x64xf32>
    %6 = tpu.matmul %5, %0, %cst {dimension_numbers = #tpu.dot_dimension_numbers<[1], [0], [0], [1], [0, 0, 1, 1], [], []>} : vector<60x32xf32>, vector<32x64xf32>, vector<60x64xf32> -> vector<60x64xf32>
    %7 = vector.broadcast %1 : vector<1x64xf32> to vector<60x64xf32>
    %8 = arith.addf %6, %7 : vector<60x64xf32>
    %cst_10 = arith.constant 0.000000e+00 : f32
    %9 = vector.broadcast %cst_10 : f32 to vector<60x64xf32>
    %10 = arith.maximumf %8, %9 : vector<60x64xf32>
    %cst_11 = arith.constant dense<0.000000e+00> : vector<64x64xf32>
    %11 = tpu.matmul %2, %10, %cst_11 {dimension_numbers = #tpu.dot_dimension_numbers<[1], [0], [0], [1], [0, 0, 1, 1], [], []>} : vector<64x60xf32>, vector<60x64xf32>, vector<64x64xf32> -> vector<64x64xf32>
    %12 = vector.broadcast %3 : vector<64x1xf32> to vector<64x64xf32>
    %13 = arith.addf %11, %12 : vector<64x64xf32>
    %cst_12 = arith.constant 0.000000e+00 : f32
    %14 = vector.broadcast %cst_12 : f32 to vector<64x64xf32>
    %15 = arith.maximumf %13, %14 : vector<64x64xf32>
    %c0_13 = arith.constant 0 : index
    %c0_14 = arith.constant 0 : index
    %16 = vector.load %arg83[%c0_13, %c0_14] : memref<64x256xf32, #tpu.memory_space<vmem>>, vector<64x64xf32>
    tpu.vector_store %arg83[%c0_13, %c0_14], %15 {strides = array<i32>} : memref<64x256xf32, #tpu.memory_space<vmem>>, vector<64x64xf32>,
    %c1 = arith.constant 1 : index
    %c0_15 = arith.constant 0 : index
    %c0_16 = arith.constant 0 : index
    %17 = vector.load %arg1[%c1, %c0_15, %c0_16] : memref<4x60x32xf32, #tpu.memory_space<vmem>>, vector<1x60x32xf32>
    %18 = vector.shape_cast %17 : vector<1x60x32xf32> to vector<60x32xf32>
    %cst_17 = arith.constant dense<0.000000e+00> : vector<60x64xf32>
    %19 = tpu.matmul %18, %0, %cst_17 {dimension_numbers = #tpu.dot_dimension_numbers<[1], [0], [0], [1], [0, 0, 1, 1], [], []>} : vector<60x32xf32>, vector<32x64xf32>, vector<60x64xf32> -> vector<60x64xf32>
    %20 = vector.broadcast %1 : vector<1x64xf32> to vector<60x64xf32>
    %21 = arith.addf %19, %20 : vector<60x64xf32>
    %cst_18 = arith.constant 0.000000e+00 : f32
    %22 = vector.broadcast %cst_18 : f32 to vector<60x64xf32>
    %23 = arith.maximumf %21, %22 : vector<60x64xf32>
    %cst_19 = arith.constant dense<0.000000e+00> : vector<64x64xf32>
    %24 = tpu.matmul %2, %23, %cst_19 {dimension_numbers = #tpu.dot_dimension_numbers<[1], [0], [0], [1], [0, 0, 1, 1], [], []>} : vector<64x60xf32>, vector<60x64xf32>, vector<64x64xf32> -> vector<64x64xf32>
    %25 = vector.broadcast %3 : vector<64x1xf32> to vector<64x64xf32>
    %26 = arith.addf %24, %25 : vector<64x64xf32>
    %cst_20 = arith.constant 0.000000e+00 : f32
    %27 = vector.broadcast %cst_20 : f32 to vector<64x64xf32>
    %28 = arith.maximumf %26, %27 : vector<64x64xf32>
    %c0_21 = arith.constant 0 : index
    %c64 = arith.constant 64 : index
    %29 = vector.load %arg83[%c0_21, %c64] : memref<64x256xf32, #tpu.memory_space<vmem>>, vector<64x64xf32>
    tpu.vector_store %arg83[%c0_21, %c64], %28 {strides = array<i32>} : memref<64x256xf32, #tpu.memory_space<vmem>>, vector<64x64xf32>,
    %c2 = arith.constant 2 : index
    %c0_22 = arith.constant 0 : index
    %c0_23 = arith.constant 0 : index
    %30 = vector.load %arg1[%c2, %c0_22, %c0_23] : memref<4x60x32xf32, #tpu.memory_space<vmem>>, vector<1x60x32xf32>
    %31 = vector.shape_cast %30 : vector<1x60x32xf32> to vector<60x32xf32>
    %cst_24 = arith.constant dense<0.000000e+00> : vector<60x64xf32>
    %32 = tpu.matmul %31, %0, %cst_24 {dimension_numbers = #tpu.dot_dimension_numbers<[1], [0], [0], [1], [0, 0, 1, 1], [], []>} : vector<60x32xf32>, vector<32x64xf32>, vector<60x64xf32> -> vector<60x64xf32>
    %33 = vector.broadcast %1 : vector<1x64xf32> to vector<60x64xf32>
    %34 = arith.addf %32, %33 : vector<60x64xf32>
    %cst_25 = arith.constant 0.000000e+00 : f32
    %35 = vector.broadcast %cst_25 : f32 to vector<60x64xf32>
    %36 = arith.maximumf %34, %35 : vector<60x64xf32>
    %cst_26 = arith.constant dense<0.000000e+00> : vector<64x64xf32>
    %37 = tpu.matmul %2, %36, %cst_26 {dimension_numbers = #tpu.dot_dimension_numbers<[1], [0], [0], [1], [0, 0, 1, 1], [], []>} : vector<64x60xf32>, vector<60x64xf32>, vector<64x64xf32> -> vector<64x64xf32>
    %38 = vector.broadcast %3 : vector<64x1xf32> to vector<64x64xf32>
    %39 = arith.addf %37, %38 : vector<64x64xf32>
    %cst_27 = arith.constant 0.000000e+00 : f32
    %40 = vector.broadcast %cst_27 : f32 to vector<64x64xf32>
    %41 = arith.maximumf %39, %40 : vector<64x64xf32>
    %c0_28 = arith.constant 0 : index
    %c128 = arith.constant 128 : index
    %42 = vector.load %arg83[%c0_28, %c128] : memref<64x256xf32, #tpu.memory_space<vmem>>, vector<64x64xf32>
    tpu.vector_store %arg83[%c0_28, %c128], %41 {strides = array<i32>} : memref<64x256xf32, #tpu.memory_space<vmem>>, vector<64x64xf32>,
    %c3 = arith.constant 3 : index
    %c0_29 = arith.constant 0 : index
    %c0_30 = arith.constant 0 : index
    %43 = vector.load %arg1[%c3, %c0_29, %c0_30] : memref<4x60x32xf32, #tpu.memory_space<vmem>>, vector<1x60x32xf32>
    %44 = vector.shape_cast %43 : vector<1x60x32xf32> to vector<60x32xf32>
    %cst_31 = arith.constant dense<0.000000e+00> : vector<60x64xf32>
    %45 = tpu.matmul %44, %0, %cst_31 {dimension_numbers = #tpu.dot_dimension_numbers<[1], [0], [0], [1], [0, 0, 1, 1], [], []>} : vector<60x32xf32>, vector<32x64xf32>, vector<60x64xf32> -> vector<60x64xf32>
    %46 = vector.broadcast %1 : vector<1x64xf32> to vector<60x64xf32>
    %47 = arith.addf %45, %46 : vector<60x64xf32>
    %cst_32 = arith.constant 0.000000e+00 : f32
    %48 = vector.broadcast %cst_32 : f32 to vector<60x64xf32>
    %49 = arith.maximumf %47, %48 : vector<60x64xf32>
    %cst_33 = arith.constant dense<0.000000e+00> : vector<64x64xf32>
    %50 = tpu.matmul %2, %49, %cst_33 {dimension_numbers = #tpu.dot_dimension_numbers<[1], [0], [0], [1], [0, 0, 1, 1], [], []>} : vector<64x60xf32>, vector<60x64xf32>, vector<64x64xf32> -> vector<64x64xf32>
    %51 = vector.broadcast %3 : vector<64x1xf32> to vector<64x64xf32>
    %52 = arith.addf %50, %51 : vector<64x64xf32>
    %cst_34 = arith.constant 0.000000e+00 : f32
    %53 = vector.broadcast %cst_34 : f32 to vector<64x64xf32>
    %54 = arith.maximumf %52, %53 : vector<64x64xf32>
    %c0_35 = arith.constant 0 : index
    %c192 = arith.constant 192 : index
    %55 = vector.load %arg83[%c0_35, %c192] : memref<64x256xf32, #tpu.memory_space<vmem>>, vector<64x64xf32>
    tpu.vector_store %arg83[%c0_35, %c192], %54 {strides = array<i32>} : memref<64x256xf32, #tpu.memory_space<vmem>>, vector<64x64xf32>,
    %c0_36 = arith.constant 0 : index
    %c0_37 = arith.constant 0 : index
    %56 = vector.load %arg83[%c0_36, %c0_37] : memref<64x256xf32, #tpu.memory_space<vmem>>, vector<64x256xf32>
    %c0_i32 = arith.constant 0 : i32
    %c10_i32 = arith.constant 10 : i32
    %57 = arith.addi %c0_i32, %c10_i32 : i32
    %c1_i32 = arith.constant 1 : i32
    %58 = scf.for %arg85 = %c0_i32 to %57 step %c1_i32 iter_args(%arg86 = %56) -> (vector<64x256xf32>)  : i32 {
      %247 = arith.index_cast %arg85 : i32 to index
      %c0_225 = arith.constant 0 : index
      %c0_226 = arith.constant 0 : index
      %248 = vector.load %arg6[%247, %c0_225, %c0_226] : memref<10x64x64xf32, #tpu.memory_space<vmem>>, vector<1x64x64xf32>
      %249 = vector.shape_cast %248 : vector<1x64x64xf32> to vector<64x64xf32>
      %cst_227 = arith.constant dense<0.000000e+00> : vector<64x256xf32>
      %250 = tpu.matmul %249, %arg86, %cst_227 {dimension_numbers = #tpu.dot_dimension_numbers<[1], [0], [0], [1], [0, 0, 1, 1], [], []>} : vector<64x64xf32>, vector<64x256xf32>, vector<64x256xf32> -> vector<64x256xf32>
      %251 = arith.index_cast %arg85 : i32 to index
      %c0_228 = arith.constant 0 : index
      %c0_229 = arith.constant 0 : index
      %252 = vector.load %arg7[%251, %c0_228, %c0_229] : memref<10x64x1xf32, #tpu.memory_space<vmem>>, vector<1x64x1xf32>
      %253 = vector.shape_cast %252 : vector<1x64x1xf32> to vector<64x1xf32>
      %254 = vector.broadcast %253 : vector<64x1xf32> to vector<64x256xf32>
      %255 = arith.addf %250, %254 : vector<64x256xf32>
      %cst_230 = arith.constant 0.000000e+00 : f32
      %256 = vector.broadcast %cst_230 : f32 to vector<64x256xf32>
      %257 = arith.maximumf %255, %256 : vector<64x256xf32>
      %258 = arith.index_cast %arg85 : i32 to index
      %c0_231 = arith.constant 0 : index
      %c0_232 = arith.constant 0 : index
      %259 = vector.load %arg8[%258, %c0_231, %c0_232] : memref<10x64x64xf32, #tpu.memory_space<vmem>>, vector<1x64x64xf32>
      %260 = vector.shape_cast %259 : vector<1x64x64xf32> to vector<64x64xf32>
      %cst_233 = arith.constant dense<0.000000e+00> : vector<64x256xf32>
      %261 = tpu.matmul %260, %257, %cst_233 {dimension_numbers = #tpu.dot_dimension_numbers<[1], [0], [0], [1], [0, 0, 1, 1], [], []>} : vector<64x64xf32>, vector<64x256xf32>, vector<64x256xf32> -> vector<64x256xf32>
      %262 = arith.index_cast %arg85 : i32 to index
      %c0_234 = arith.constant 0 : index
      %c0_235 = arith.constant 0 : index
      %263 = vector.load %arg9[%262, %c0_234, %c0_235] : memref<10x64x1xf32, #tpu.memory_space<vmem>>, vector<1x64x1xf32>
      %264 = vector.shape_cast %263 : vector<1x64x1xf32> to vector<64x1xf32>
      %265 = vector.broadcast %264 : vector<64x1xf32> to vector<64x256xf32>
      %266 = arith.addf %261, %265 : vector<64x256xf32>
      %267 = arith.addf %266, %arg86 : vector<64x256xf32>
      %cst_236 = arith.constant 0.000000e+00 : f32
      %268 = vector.broadcast %cst_236 : f32 to vector<64x256xf32>
      %269 = arith.maximumf %267, %268 : vector<64x256xf32>
      scf.yield %269 : vector<64x256xf32>
    }
    %c10_i32_38 = arith.constant 10 : i32
    %c0_39 = arith.constant 0 : index
    %c0_40 = arith.constant 0 : index
    %59 = vector.load %arg10[%c0_39, %c0_40] : memref<32x64xf32, #tpu.memory_space<vmem>>, vector<32x64xf32>
    %c0_41 = arith.constant 0 : index
    %c0_42 = arith.constant 0 : index
    %60 = vector.load %arg11[%c0_41, %c0_42] : memref<32x1xf32, #tpu.memory_space<vmem>>, vector<32x1xf32>
    %c0_43 = arith.constant 0 : index
    %c0_44 = arith.constant 0 : index
    %61 = vector.load %arg12[%c0_43, %c0_44] : memref<32x32xf32, #tpu.memory_space<vmem>>, vector<32x32xf32>
    %c0_45 = arith.constant 0 : index
    %c0_46 = arith.constant 0 : index
    %62 = vector.load %arg13[%c0_45, %c0_46] : memref<32x1xf32, #tpu.memory_space<vmem>>, vector<32x1xf32>
    %c0_47 = arith.constant 0 : index
    %c0_48 = arith.constant 0 : index
    %63 = vector.load %arg14[%c0_47, %c0_48] : memref<32x64xf32, #tpu.memory_space<vmem>>, vector<32x64xf32>
    %c0_49 = arith.constant 0 : index
    %c0_50 = arith.constant 0 : index
    %64 = vector.load %arg15[%c0_49, %c0_50] : memref<32x1xf32, #tpu.memory_space<vmem>>, vector<32x1xf32>
    %cst_51 = arith.constant dense<0.000000e+00> : vector<32x256xf32>
    %65 = tpu.matmul %59, %58, %cst_51 {dimension_numbers = #tpu.dot_dimension_numbers<[1], [0], [0], [1], [0, 0, 1, 1], [], []>} : vector<32x64xf32>, vector<64x256xf32>, vector<32x256xf32> -> vector<32x256xf32>
    %66 = vector.broadcast %60 : vector<32x1xf32> to vector<32x256xf32>
    %67 = arith.addf %65, %66 : vector<32x256xf32>
    %cst_52 = arith.constant 0.000000e+00 : f32
    %68 = vector.broadcast %cst_52 : f32 to vector<32x256xf32>
    %69 = arith.maximumf %67, %68 : vector<32x256xf32>
    %cst_53 = arith.constant dense<0.000000e+00> : vector<32x256xf32>
    %70 = tpu.matmul %61, %69, %cst_53 {dimension_numbers = #tpu.dot_dimension_numbers<[1], [0], [0], [1], [0, 0, 1, 1], [], []>} : vector<32x32xf32>, vector<32x256xf32>, vector<32x256xf32> -> vector<32x256xf32>
    %71 = vector.broadcast %62 : vector<32x1xf32> to vector<32x256xf32>
    %72 = arith.addf %70, %71 : vector<32x256xf32>
    %cst_54 = arith.constant dense<0.000000e+00> : vector<32x256xf32>
    %73 = tpu.matmul %63, %58, %cst_54 {dimension_numbers = #tpu.dot_dimension_numbers<[1], [0], [0], [1], [0, 0, 1, 1], [], []>} : vector<32x64xf32>, vector<64x256xf32>, vector<32x256xf32> -> vector<32x256xf32>
    %74 = vector.broadcast %64 : vector<32x1xf32> to vector<32x256xf32>
    %75 = arith.addf %73, %74 : vector<32x256xf32>
    %76 = arith.addf %72, %75 : vector<32x256xf32>
    %cst_55 = arith.constant 0.000000e+00 : f32
    %77 = vector.broadcast %cst_55 : f32 to vector<32x256xf32>
    %78 = arith.maximumf %76, %77 : vector<32x256xf32>
    %c0_i32_56 = arith.constant 0 : i32
    %c10_i32_57 = arith.constant 10 : i32
    %79 = arith.addi %c0_i32_56, %c10_i32_57 : i32
    %c1_i32_58 = arith.constant 1 : i32
    %80 = scf.for %arg85 = %c0_i32_56 to %79 step %c1_i32_58 iter_args(%arg86 = %78) -> (vector<32x256xf32>)  : i32 {
      %247 = arith.index_cast %arg85 : i32 to index
      %c0_225 = arith.constant 0 : index
      %c0_226 = arith.constant 0 : index
      %248 = vector.load %arg16[%247, %c0_225, %c0_226] : memref<10x32x32xf32, #tpu.memory_space<vmem>>, vector<1x32x32xf32>
      %249 = vector.shape_cast %248 : vector<1x32x32xf32> to vector<32x32xf32>
      %cst_227 = arith.constant dense<0.000000e+00> : vector<32x256xf32>
      %250 = tpu.matmul %249, %arg86, %cst_227 {dimension_numbers = #tpu.dot_dimension_numbers<[1], [0], [0], [1], [0, 0, 1, 1], [], []>} : vector<32x32xf32>, vector<32x256xf32>, vector<32x256xf32> -> vector<32x256xf32>
      %251 = arith.index_cast %arg85 : i32 to index
      %c0_228 = arith.constant 0 : index
      %c0_229 = arith.constant 0 : index
      %252 = vector.load %arg17[%251, %c0_228, %c0_229] : memref<10x32x1xf32, #tpu.memory_space<vmem>>, vector<1x32x1xf32>
      %253 = vector.shape_cast %252 : vector<1x32x1xf32> to vector<32x1xf32>
      %254 = vector.broadcast %253 : vector<32x1xf32> to vector<32x256xf32>
      %255 = arith.addf %250, %254 : vector<32x256xf32>
      %cst_230 = arith.constant 0.000000e+00 : f32
      %256 = vector.broadcast %cst_230 : f32 to vector<32x256xf32>
      %257 = arith.maximumf %255, %256 : vector<32x256xf32>
      %258 = arith.index_cast %arg85 : i32 to index
      %c0_231 = arith.constant 0 : index
      %c0_232 = arith.constant 0 : index
      %259 = vector.load %arg18[%258, %c0_231, %c0_232] : memref<10x32x32xf32, #tpu.memory_space<vmem>>, vector<1x32x32xf32>
      %260 = vector.shape_cast %259 : vector<1x32x32xf32> to vector<32x32xf32>
      %cst_233 = arith.constant dense<0.000000e+00> : vector<32x256xf32>
      %261 = tpu.matmul %260, %257, %cst_233 {dimension_numbers = #tpu.dot_dimension_numbers<[1], [0], [0], [1], [0, 0, 1, 1], [], []>} : vector<32x32xf32>, vector<32x256xf32>, vector<32x256xf32> -> vector<32x256xf32>
      %262 = arith.index_cast %arg85 : i32 to index
      %c0_234 = arith.constant 0 : index
      %c0_235 = arith.constant 0 : index
      %263 = vector.load %arg19[%262, %c0_234, %c0_235] : memref<10x32x1xf32, #tpu.memory_space<vmem>>, vector<1x32x1xf32>
      %264 = vector.shape_cast %263 : vector<1x32x1xf32> to vector<32x1xf32>
      %265 = vector.broadcast %264 : vector<32x1xf32> to vector<32x256xf32>
      %266 = arith.addf %261, %265 : vector<32x256xf32>
      %267 = arith.addf %266, %arg86 : vector<32x256xf32>
      %cst_236 = arith.constant 0.000000e+00 : f32
      %268 = vector.broadcast %cst_236 : f32 to vector<32x256xf32>
      %269 = arith.maximumf %267, %268 : vector<32x256xf32>
      scf.yield %269 : vector<32x256xf32>
    }
    %c10_i32_59 = arith.constant 10 : i32
    %c0_60 = arith.constant 0 : index
    %c0_61 = arith.constant 0 : index
    %81 = vector.load %arg20[%c0_60, %c0_61] : memref<16x32xf32, #tpu.memory_space<vmem>>, vector<16x32xf32>
    %c0_62 = arith.constant 0 : index
    %c0_63 = arith.constant 0 : index
    %82 = vector.load %arg21[%c0_62, %c0_63] : memref<16x1xf32, #tpu.memory_space<vmem>>, vector<16x1xf32>
    %c0_64 = arith.constant 0 : index
    %c0_65 = arith.constant 0 : index
    %83 = vector.load %arg22[%c0_64, %c0_65] : memref<16x16xf32, #tpu.memory_space<vmem>>, vector<16x16xf32>
    %c0_66 = arith.constant 0 : index
    %c0_67 = arith.constant 0 : index
    %84 = vector.load %arg23[%c0_66, %c0_67] : memref<16x1xf32, #tpu.memory_space<vmem>>, vector<16x1xf32>
    %c0_68 = arith.constant 0 : index
    %c0_69 = arith.constant 0 : index
    %85 = vector.load %arg24[%c0_68, %c0_69] : memref<16x32xf32, #tpu.memory_space<vmem>>, vector<16x32xf32>
    %c0_70 = arith.constant 0 : index
    %c0_71 = arith.constant 0 : index
    %86 = vector.load %arg25[%c0_70, %c0_71] : memref<16x1xf32, #tpu.memory_space<vmem>>, vector<16x1xf32>
    %cst_72 = arith.constant dense<0.000000e+00> : vector<16x256xf32>
    %87 = tpu.matmul %81, %80, %cst_72 {dimension_numbers = #tpu.dot_dimension_numbers<[1], [0], [0], [1], [0, 0, 1, 1], [], []>} : vector<16x32xf32>, vector<32x256xf32>, vector<16x256xf32> -> vector<16x256xf32>
    %88 = vector.broadcast %82 : vector<16x1xf32> to vector<16x256xf32>
    %89 = arith.addf %87, %88 : vector<16x256xf32>
    %cst_73 = arith.constant 0.000000e+00 : f32
    %90 = vector.broadcast %cst_73 : f32 to vector<16x256xf32>
    %91 = arith.maximumf %89, %90 : vector<16x256xf32>
    %cst_74 = arith.constant dense<0.000000e+00> : vector<16x256xf32>
    %92 = tpu.matmul %83, %91, %cst_74 {dimension_numbers = #tpu.dot_dimension_numbers<[1], [0], [0], [1], [0, 0, 1, 1], [], []>} : vector<16x16xf32>, vector<16x256xf32>, vector<16x256xf32> -> vector<16x256xf32>
    %93 = vector.broadcast %84 : vector<16x1xf32> to vector<16x256xf32>
    %94 = arith.addf %92, %93 : vector<16x256xf32>
    %cst_75 = arith.constant dense<0.000000e+00> : vector<16x256xf32>
    %95 = tpu.matmul %85, %80, %cst_75 {dimension_numbers = #tpu.dot_dimension_numbers<[1], [0], [0], [1], [0, 0, 1, 1], [], []>} : vector<16x32xf32>, vector<32x256xf32>, vector<16x256xf32> -> vector<16x256xf32>
    %96 = vector.broadcast %86 : vector<16x1xf32> to vector<16x256xf32>
    %97 = arith.addf %95, %96 : vector<16x256xf32>
    %98 = arith.addf %94, %97 : vector<16x256xf32>
    %cst_76 = arith.constant 0.000000e+00 : f32
    %99 = vector.broadcast %cst_76 : f32 to vector<16x256xf32>
    %100 = arith.maximumf %98, %99 : vector<16x256xf32>
    %c0_i32_77 = arith.constant 0 : i32
    %c10_i32_78 = arith.constant 10 : i32
    %101 = arith.addi %c0_i32_77, %c10_i32_78 : i32
    %c1_i32_79 = arith.constant 1 : i32
    %102 = scf.for %arg85 = %c0_i32_77 to %101 step %c1_i32_79 iter_args(%arg86 = %100) -> (vector<16x256xf32>)  : i32 {
      %247 = arith.index_cast %arg85 : i32 to index
      %c0_225 = arith.constant 0 : index
      %c0_226 = arith.constant 0 : index
      %248 = vector.load %arg26[%247, %c0_225, %c0_226] : memref<10x16x16xf32, #tpu.memory_space<vmem>>, vector<1x16x16xf32>
      %249 = vector.shape_cast %248 : vector<1x16x16xf32> to vector<16x16xf32>
      %cst_227 = arith.constant dense<0.000000e+00> : vector<16x256xf32>
      %250 = tpu.matmul %249, %arg86, %cst_227 {dimension_numbers = #tpu.dot_dimension_numbers<[1], [0], [0], [1], [0, 0, 1, 1], [], []>} : vector<16x16xf32>, vector<16x256xf32>, vector<16x256xf32> -> vector<16x256xf32>
      %251 = arith.index_cast %arg85 : i32 to index
      %c0_228 = arith.constant 0 : index
      %c0_229 = arith.constant 0 : index
      %252 = vector.load %arg27[%251, %c0_228, %c0_229] : memref<10x16x1xf32, #tpu.memory_space<vmem>>, vector<1x16x1xf32>
      %253 = vector.shape_cast %252 : vector<1x16x1xf32> to vector<16x1xf32>
      %254 = vector.broadcast %253 : vector<16x1xf32> to vector<16x256xf32>
      %255 = arith.addf %250, %254 : vector<16x256xf32>
      %cst_230 = arith.constant 0.000000e+00 : f32
      %256 = vector.broadcast %cst_230 : f32 to vector<16x256xf32>
      %257 = arith.maximumf %255, %256 : vector<16x256xf32>
      %258 = arith.index_cast %arg85 : i32 to index
      %c0_231 = arith.constant 0 : index
      %c0_232 = arith.constant 0 : index
      %259 = vector.load %arg28[%258, %c0_231, %c0_232] : memref<10x16x16xf32, #tpu.memory_space<vmem>>, vector<1x16x16xf32>
      %260 = vector.shape_cast %259 : vector<1x16x16xf32> to vector<16x16xf32>
      %cst_233 = arith.constant dense<0.000000e+00> : vector<16x256xf32>
      %261 = tpu.matmul %260, %257, %cst_233 {dimension_numbers = #tpu.dot_dimension_numbers<[1], [0], [0], [1], [0, 0, 1, 1], [], []>} : vector<16x16xf32>, vector<16x256xf32>, vector<16x256xf32> -> vector<16x256xf32>
      %262 = arith.index_cast %arg85 : i32 to index
      %c0_234 = arith.constant 0 : index
      %c0_235 = arith.constant 0 : index
      %263 = vector.load %arg29[%262, %c0_234, %c0_235] : memref<10x16x1xf32, #tpu.memory_space<vmem>>, vector<1x16x1xf32>
      %264 = vector.shape_cast %263 : vector<1x16x1xf32> to vector<16x1xf32>
      %265 = vector.broadcast %264 : vector<16x1xf32> to vector<16x256xf32>
      %266 = arith.addf %261, %265 : vector<16x256xf32>
      %267 = arith.addf %266, %arg86 : vector<16x256xf32>
      %cst_236 = arith.constant 0.000000e+00 : f32
      %268 = vector.broadcast %cst_236 : f32 to vector<16x256xf32>
      %269 = arith.maximumf %267, %268 : vector<16x256xf32>
      scf.yield %269 : vector<16x256xf32>
    }
    %c10_i32_80 = arith.constant 10 : i32
    %c0_81 = arith.constant 0 : index
    %c0_82 = arith.constant 0 : index
    %103 = vector.load %arg30[%c0_81, %c0_82] : memref<8x16xf32, #tpu.memory_space<vmem>>, vector<8x16xf32>
    %c0_83 = arith.constant 0 : index
    %c0_84 = arith.constant 0 : index
    %104 = vector.load %arg31[%c0_83, %c0_84] : memref<8x1xf32, #tpu.memory_space<vmem>>, vector<8x1xf32>
    %c0_85 = arith.constant 0 : index
    %c0_86 = arith.constant 0 : index
    %105 = vector.load %arg32[%c0_85, %c0_86] : memref<8x8xf32, #tpu.memory_space<vmem>>, vector<8x8xf32>
    %c0_87 = arith.constant 0 : index
    %c0_88 = arith.constant 0 : index
    %106 = vector.load %arg33[%c0_87, %c0_88] : memref<8x1xf32, #tpu.memory_space<vmem>>, vector<8x1xf32>
    %c0_89 = arith.constant 0 : index
    %c0_90 = arith.constant 0 : index
    %107 = vector.load %arg34[%c0_89, %c0_90] : memref<8x16xf32, #tpu.memory_space<vmem>>, vector<8x16xf32>
    %c0_91 = arith.constant 0 : index
    %c0_92 = arith.constant 0 : index
    %108 = vector.load %arg35[%c0_91, %c0_92] : memref<8x1xf32, #tpu.memory_space<vmem>>, vector<8x1xf32>
    %cst_93 = arith.constant dense<0.000000e+00> : vector<8x256xf32>
    %109 = tpu.matmul %103, %102, %cst_93 {dimension_numbers = #tpu.dot_dimension_numbers<[1], [0], [0], [1], [0, 0, 1, 1], [], []>} : vector<8x16xf32>, vector<16x256xf32>, vector<8x256xf32> -> vector<8x256xf32>
    %110 = vector.broadcast %104 : vector<8x1xf32> to vector<8x256xf32>
    %111 = arith.addf %109, %110 : vector<8x256xf32>
    %cst_94 = arith.constant 0.000000e+00 : f32
    %112 = vector.broadcast %cst_94 : f32 to vector<8x256xf32>
    %113 = arith.maximumf %111, %112 : vector<8x256xf32>
    %cst_95 = arith.constant dense<0.000000e+00> : vector<8x256xf32>
    %114 = tpu.matmul %105, %113, %cst_95 {dimension_numbers = #tpu.dot_dimension_numbers<[1], [0], [0], [1], [0, 0, 1, 1], [], []>} : vector<8x8xf32>, vector<8x256xf32>, vector<8x256xf32> -> vector<8x256xf32>
    %115 = vector.broadcast %106 : vector<8x1xf32> to vector<8x256xf32>
    %116 = arith.addf %114, %115 : vector<8x256xf32>
    %cst_96 = arith.constant dense<0.000000e+00> : vector<8x256xf32>
    %117 = tpu.matmul %107, %102, %cst_96 {dimension_numbers = #tpu.dot_dimension_numbers<[1], [0], [0], [1], [0, 0, 1, 1], [], []>} : vector<8x16xf32>, vector<16x256xf32>, vector<8x256xf32> -> vector<8x256xf32>
    %118 = vector.broadcast %108 : vector<8x1xf32> to vector<8x256xf32>
    %119 = arith.addf %117, %118 : vector<8x256xf32>
    %120 = arith.addf %116, %119 : vector<8x256xf32>
    %cst_97 = arith.constant 0.000000e+00 : f32
    %121 = vector.broadcast %cst_97 : f32 to vector<8x256xf32>
    %122 = arith.maximumf %120, %121 : vector<8x256xf32>
    %c0_i32_98 = arith.constant 0 : i32
    %c10_i32_99 = arith.constant 10 : i32
    %123 = arith.addi %c0_i32_98, %c10_i32_99 : i32
    %c1_i32_100 = arith.constant 1 : i32
    %124 = scf.for %arg85 = %c0_i32_98 to %123 step %c1_i32_100 iter_args(%arg86 = %122) -> (vector<8x256xf32>)  : i32 {
      %247 = arith.index_cast %arg85 : i32 to index
      %c0_225 = arith.constant 0 : index
      %c0_226 = arith.constant 0 : index
      %248 = vector.load %arg36[%247, %c0_225, %c0_226] : memref<10x8x8xf32, #tpu.memory_space<vmem>>, vector<1x8x8xf32>
      %249 = vector.shape_cast %248 : vector<1x8x8xf32> to vector<8x8xf32>
      %cst_227 = arith.constant dense<0.000000e+00> : vector<8x256xf32>
      %250 = tpu.matmul %249, %arg86, %cst_227 {dimension_numbers = #tpu.dot_dimension_numbers<[1], [0], [0], [1], [0, 0, 1, 1], [], []>} : vector<8x8xf32>, vector<8x256xf32>, vector<8x256xf32> -> vector<8x256xf32>
      %251 = arith.index_cast %arg85 : i32 to index
      %c0_228 = arith.constant 0 : index
      %c0_229 = arith.constant 0 : index
      %252 = vector.load %arg37[%251, %c0_228, %c0_229] : memref<10x8x1xf32, #tpu.memory_space<vmem>>, vector<1x8x1xf32>
      %253 = vector.shape_cast %252 : vector<1x8x1xf32> to vector<8x1xf32>
      %254 = vector.broadcast %253 : vector<8x1xf32> to vector<8x256xf32>
      %255 = arith.addf %250, %254 : vector<8x256xf32>
      %cst_230 = arith.constant 0.000000e+00 : f32
      %256 = vector.broadcast %cst_230 : f32 to vector<8x256xf32>
      %257 = arith.maximumf %255, %256 : vector<8x256xf32>
      %258 = arith.index_cast %arg85 : i32 to index
      %c0_231 = arith.constant 0 : index
      %c0_232 = arith.constant 0 : index
      %259 = vector.load %arg38[%258, %c0_231, %c0_232] : memref<10x8x8xf32, #tpu.memory_space<vmem>>, vector<1x8x8xf32>
      %260 = vector.shape_cast %259 : vector<1x8x8xf32> to vector<8x8xf32>
      %cst_233 = arith.constant dense<0.000000e+00> : vector<8x256xf32>
      %261 = tpu.matmul %260, %257, %cst_233 {dimension_numbers = #tpu.dot_dimension_numbers<[1], [0], [0], [1], [0, 0, 1, 1], [], []>} : vector<8x8xf32>, vector<8x256xf32>, vector<8x256xf32> -> vector<8x256xf32>
      %262 = arith.index_cast %arg85 : i32 to index
      %c0_234 = arith.constant 0 : index
      %c0_235 = arith.constant 0 : index
      %263 = vector.load %arg39[%262, %c0_234, %c0_235] : memref<10x8x1xf32, #tpu.memory_space<vmem>>, vector<1x8x1xf32>
      %264 = vector.shape_cast %263 : vector<1x8x1xf32> to vector<8x1xf32>
      %265 = vector.broadcast %264 : vector<8x1xf32> to vector<8x256xf32>
      %266 = arith.addf %261, %265 : vector<8x256xf32>
      %267 = arith.addf %266, %arg86 : vector<8x256xf32>
      %cst_236 = arith.constant 0.000000e+00 : f32
      %268 = vector.broadcast %cst_236 : f32 to vector<8x256xf32>
      %269 = arith.maximumf %267, %268 : vector<8x256xf32>
      scf.yield %269 : vector<8x256xf32>
    }
    %c10_i32_101 = arith.constant 10 : i32
    %c0_102 = arith.constant 0 : index
    %c0_103 = arith.constant 0 : index
    %125 = vector.load %arg40[%c0_102, %c0_103] : memref<8x8xf32, #tpu.memory_space<vmem>>, vector<8x8xf32>
    %c0_104 = arith.constant 0 : index
    %c0_105 = arith.constant 0 : index
    %126 = vector.load %arg41[%c0_104, %c0_105] : memref<8x1xf32, #tpu.memory_space<vmem>>, vector<8x1xf32>
    %c0_106 = arith.constant 0 : index
    %c0_107 = arith.constant 0 : index
    %127 = vector.load %arg42[%c0_106, %c0_107] : memref<8x8xf32, #tpu.memory_space<vmem>>, vector<8x8xf32>
    %c0_108 = arith.constant 0 : index
    %c0_109 = arith.constant 0 : index
    %128 = vector.load %arg43[%c0_108, %c0_109] : memref<8x1xf32, #tpu.memory_space<vmem>>, vector<8x1xf32>
    %c0_110 = arith.constant 0 : index
    %c0_111 = arith.constant 0 : index
    %129 = vector.load %arg44[%c0_110, %c0_111] : memref<8x8xf32, #tpu.memory_space<vmem>>, vector<8x8xf32>
    %c0_112 = arith.constant 0 : index
    %c0_113 = arith.constant 0 : index
    %130 = vector.load %arg45[%c0_112, %c0_113] : memref<8x1xf32, #tpu.memory_space<vmem>>, vector<8x1xf32>
    %cst_114 = arith.constant dense<0.000000e+00> : vector<8x256xf32>
    %131 = tpu.matmul %125, %124, %cst_114 {dimension_numbers = #tpu.dot_dimension_numbers<[1], [0], [0], [1], [0, 0, 1, 1], [], []>} : vector<8x8xf32>, vector<8x256xf32>, vector<8x256xf32> -> vector<8x256xf32>
    %132 = vector.broadcast %126 : vector<8x1xf32> to vector<8x256xf32>
    %133 = arith.addf %131, %132 : vector<8x256xf32>
    %cst_115 = arith.constant 0.000000e+00 : f32
    %134 = vector.broadcast %cst_115 : f32 to vector<8x256xf32>
    %135 = arith.maximumf %133, %134 : vector<8x256xf32>
    %cst_116 = arith.constant dense<0.000000e+00> : vector<8x256xf32>
    %136 = tpu.matmul %127, %135, %cst_116 {dimension_numbers = #tpu.dot_dimension_numbers<[1], [0], [0], [1], [0, 0, 1, 1], [], []>} : vector<8x8xf32>, vector<8x256xf32>, vector<8x256xf32> -> vector<8x256xf32>
    %137 = vector.broadcast %128 : vector<8x1xf32> to vector<8x256xf32>
    %138 = arith.addf %136, %137 : vector<8x256xf32>
    %cst_117 = arith.constant dense<0.000000e+00> : vector<8x256xf32>
    %139 = tpu.matmul %129, %124, %cst_117 {dimension_numbers = #tpu.dot_dimension_numbers<[1], [0], [0], [1], [0, 0, 1, 1], [], []>} : vector<8x8xf32>, vector<8x256xf32>, vector<8x256xf32> -> vector<8x256xf32>
    %140 = vector.broadcast %130 : vector<8x1xf32> to vector<8x256xf32>
    %141 = arith.addf %139, %140 : vector<8x256xf32>
    %142 = arith.addf %138, %141 : vector<8x256xf32>
    %cst_118 = arith.constant 0.000000e+00 : f32
    %143 = vector.broadcast %cst_118 : f32 to vector<8x256xf32>
    %144 = arith.maximumf %142, %143 : vector<8x256xf32>
    %c0_119 = arith.constant 0 : index
    %c0_120 = arith.constant 0 : index
    %145 = vector.load %arg83[%c0_119, %c0_120] : memref<64x256xf32, #tpu.memory_space<vmem>>, vector<8x256xf32>
    tpu.vector_store %arg83[%c0_119, %c0_120], %144 {strides = array<i32>} : memref<64x256xf32, #tpu.memory_space<vmem>>, vector<8x256xf32>,
    %cst_121 = arith.constant 0.000000e+00 : f32
    %146 = vector.broadcast %cst_121 : f32 to vector<8x64xf32>
    %c0_122 = arith.constant 0 : index
    %c0_123 = arith.constant 0 : index
    %147 = vector.load %arg84[%c0_122, %c0_123] : memref<8x64xf32, #tpu.memory_space<vmem>>, vector<8x64xf32>
    tpu.vector_store %arg84[%c0_122, %c0_123], %146 {strides = array<i32>} : memref<8x64xf32, #tpu.memory_space<vmem>>, vector<8x64xf32>,
    %c0_124 = arith.constant 0 : index
    %c0_125 = arith.constant 0 : index
    %148 = vector.load %arg83[%c0_124, %c0_125] : memref<64x256xf32, #tpu.memory_space<vmem>>, vector<1x64xf32>
    %c0_126 = arith.constant 0 : index
    %c0_127 = arith.constant 0 : index
    %149 = vector.load %arg84[%c0_126, %c0_127] : memref<8x64xf32, #tpu.memory_space<vmem>>, vector<1x64xf32>
    tpu.vector_store %arg84[%c0_126, %c0_127], %148 {strides = array<i32>} : memref<8x64xf32, #tpu.memory_space<vmem>>, vector<1x64xf32>,
    %c0_128 = arith.constant 0 : index
    %c64_129 = arith.constant 64 : index
    %150 = vector.load %arg83[%c0_128, %c64_129] : memref<64x256xf32, #tpu.memory_space<vmem>>, vector<1x64xf32>
    %c1_130 = arith.constant 1 : index
    %c0_131 = arith.constant 0 : index
    %151 = vector.load %arg84[%c1_130, %c0_131] : memref<8x64xf32, #tpu.memory_space<vmem>>, vector<1x64xf32>
    tpu.vector_store %arg84[%c1_130, %c0_131], %150 {strides = array<i32>} : memref<8x64xf32, #tpu.memory_space<vmem>>, vector<1x64xf32>,
    %c0_132 = arith.constant 0 : index
    %c128_133 = arith.constant 128 : index
    %152 = vector.load %arg83[%c0_132, %c128_133] : memref<64x256xf32, #tpu.memory_space<vmem>>, vector<1x64xf32>
    %c2_134 = arith.constant 2 : index
    %c0_135 = arith.constant 0 : index
    %153 = vector.load %arg84[%c2_134, %c0_135] : memref<8x64xf32, #tpu.memory_space<vmem>>, vector<1x64xf32>
    tpu.vector_store %arg84[%c2_134, %c0_135], %152 {strides = array<i32>} : memref<8x64xf32, #tpu.memory_space<vmem>>, vector<1x64xf32>,
    %c0_136 = arith.constant 0 : index
    %c192_137 = arith.constant 192 : index
    %154 = vector.load %arg83[%c0_136, %c192_137] : memref<64x256xf32, #tpu.memory_space<vmem>>, vector<1x64xf32>
    %c3_138 = arith.constant 3 : index
    %c0_139 = arith.constant 0 : index
    %155 = vector.load %arg84[%c3_138, %c0_139] : memref<8x64xf32, #tpu.memory_space<vmem>>, vector<1x64xf32>
    tpu.vector_store %arg84[%c3_138, %c0_139], %154 {strides = array<i32>} : memref<8x64xf32, #tpu.memory_space<vmem>>, vector<1x64xf32>,
    %c0_140 = arith.constant 0 : index
    %c0_141 = arith.constant 0 : index
    %156 = vector.load %arg84[%c0_140, %c0_141] : memref<8x64xf32, #tpu.memory_space<vmem>>, vector<8x64xf32>
    %c0_142 = arith.constant 0 : index
    %c0_143 = arith.constant 0 : index
    %157 = vector.load %arg46[%c0_142, %c0_143] : memref<64x32xf32, #tpu.memory_space<vmem>>, vector<64x32xf32>
    %c0_144 = arith.constant 0 : index
    %c0_145 = arith.constant 0 : index
    %158 = vector.load %arg47[%c0_144, %c0_145] : memref<1x32xf32, #tpu.memory_space<vmem>>, vector<1x32xf32>
    %c0_146 = arith.constant 0 : index
    %c0_147 = arith.constant 0 : index
    %159 = vector.load %arg48[%c0_146, %c0_147] : memref<32x32xf32, #tpu.memory_space<vmem>>, vector<32x32xf32>
    %c0_148 = arith.constant 0 : index
    %c0_149 = arith.constant 0 : index
    %160 = vector.load %arg49[%c0_148, %c0_149] : memref<1x32xf32, #tpu.memory_space<vmem>>, vector<1x32xf32>
    %c0_150 = arith.constant 0 : index
    %c0_151 = arith.constant 0 : index
    %161 = vector.load %arg50[%c0_150, %c0_151] : memref<64x32xf32, #tpu.memory_space<vmem>>, vector<64x32xf32>
    %c0_152 = arith.constant 0 : index
    %c0_153 = arith.constant 0 : index
    %162 = vector.load %arg51[%c0_152, %c0_153] : memref<1x32xf32, #tpu.memory_space<vmem>>, vector<1x32xf32>
    %cst_154 = arith.constant dense<0.000000e+00> : vector<8x32xf32>
    %163 = tpu.matmul %156, %157, %cst_154 {dimension_numbers = #tpu.dot_dimension_numbers<[1], [0], [0], [1], [0, 0, 1, 1], [], []>} : vector<8x64xf32>, vector<64x32xf32>, vector<8x32xf32> -> vector<8x32xf32>
    %164 = vector.broadcast %158 : vector<1x32xf32> to vector<8x32xf32>
    %165 = arith.addf %163, %164 : vector<8x32xf32>
    %cst_155 = arith.constant 0.000000e+00 : f32
    %166 = vector.broadcast %cst_155 : f32 to vector<8x32xf32>
    %167 = arith.maximumf %165, %166 : vector<8x32xf32>
    %cst_156 = arith.constant dense<0.000000e+00> : vector<8x32xf32>
    %168 = tpu.matmul %167, %159, %cst_156 {dimension_numbers = #tpu.dot_dimension_numbers<[1], [0], [0], [1], [0, 0, 1, 1], [], []>} : vector<8x32xf32>, vector<32x32xf32>, vector<8x32xf32> -> vector<8x32xf32>
    %169 = vector.broadcast %160 : vector<1x32xf32> to vector<8x32xf32>
    %170 = arith.addf %168, %169 : vector<8x32xf32>
    %cst_157 = arith.constant dense<0.000000e+00> : vector<8x32xf32>
    %171 = tpu.matmul %156, %161, %cst_157 {dimension_numbers = #tpu.dot_dimension_numbers<[1], [0], [0], [1], [0, 0, 1, 1], [], []>} : vector<8x64xf32>, vector<64x32xf32>, vector<8x32xf32> -> vector<8x32xf32>
    %172 = vector.broadcast %162 : vector<1x32xf32> to vector<8x32xf32>
    %173 = arith.addf %171, %172 : vector<8x32xf32>
    %174 = arith.addf %170, %173 : vector<8x32xf32>
    %cst_158 = arith.constant 0.000000e+00 : f32
    %175 = vector.broadcast %cst_158 : f32 to vector<8x32xf32>
    %176 = arith.maximumf %174, %175 : vector<8x32xf32>
    %c0_i32_159 = arith.constant 0 : i32
    %c10_i32_160 = arith.constant 10 : i32
    %177 = arith.addi %c0_i32_159, %c10_i32_160 : i32
    %c1_i32_161 = arith.constant 1 : i32
    %178 = scf.for %arg85 = %c0_i32_159 to %177 step %c1_i32_161 iter_args(%arg86 = %176) -> (vector<8x32xf32>)  : i32 {
      %247 = arith.index_cast %arg85 : i32 to index
      %c0_225 = arith.constant 0 : index
      %c0_226 = arith.constant 0 : index
      %248 = vector.load %arg52[%247, %c0_225, %c0_226] : memref<10x32x32xf32, #tpu.memory_space<vmem>>, vector<1x32x32xf32>
      %249 = vector.shape_cast %248 : vector<1x32x32xf32> to vector<32x32xf32>
      %cst_227 = arith.constant dense<0.000000e+00> : vector<8x32xf32>
      %250 = tpu.matmul %arg86, %249, %cst_227 {dimension_numbers = #tpu.dot_dimension_numbers<[1], [0], [0], [1], [0, 0, 1, 1], [], []>} : vector<8x32xf32>, vector<32x32xf32>, vector<8x32xf32> -> vector<8x32xf32>
      %251 = arith.index_cast %arg85 : i32 to index
      %c0_228 = arith.constant 0 : index
      %c0_229 = arith.constant 0 : index
      %252 = vector.load %arg53[%251, %c0_228, %c0_229] : memref<10x1x32xf32, #tpu.memory_space<vmem>>, vector<1x1x32xf32>
      %253 = vector.shape_cast %252 : vector<1x1x32xf32> to vector<1x32xf32>
      %254 = vector.broadcast %253 : vector<1x32xf32> to vector<8x32xf32>
      %255 = arith.addf %250, %254 : vector<8x32xf32>
      %cst_230 = arith.constant 0.000000e+00 : f32
      %256 = vector.broadcast %cst_230 : f32 to vector<8x32xf32>
      %257 = arith.maximumf %255, %256 : vector<8x32xf32>
      %258 = arith.index_cast %arg85 : i32 to index
      %c0_231 = arith.constant 0 : index
      %c0_232 = arith.constant 0 : index
      %259 = vector.load %arg54[%258, %c0_231, %c0_232] : memref<10x32x32xf32, #tpu.memory_space<vmem>>, vector<1x32x32xf32>
      %260 = vector.shape_cast %259 : vector<1x32x32xf32> to vector<32x32xf32>
      %cst_233 = arith.constant dense<0.000000e+00> : vector<8x32xf32>
      %261 = tpu.matmul %257, %260, %cst_233 {dimension_numbers = #tpu.dot_dimension_numbers<[1], [0], [0], [1], [0, 0, 1, 1], [], []>} : vector<8x32xf32>, vector<32x32xf32>, vector<8x32xf32> -> vector<8x32xf32>
      %262 = arith.index_cast %arg85 : i32 to index
      %c0_234 = arith.constant 0 : index
      %c0_235 = arith.constant 0 : index
      %263 = vector.load %arg55[%262, %c0_234, %c0_235] : memref<10x1x32xf32, #tpu.memory_space<vmem>>, vector<1x1x32xf32>
      %264 = vector.shape_cast %263 : vector<1x1x32xf32> to vector<1x32xf32>
      %265 = vector.broadcast %264 : vector<1x32xf32> to vector<8x32xf32>
      %266 = arith.addf %261, %265 : vector<8x32xf32>
      %267 = arith.addf %266, %arg86 : vector<8x32xf32>
      %cst_236 = arith.constant 0.000000e+00 : f32
      %268 = vector.broadcast %cst_236 : f32 to vector<8x32xf32>
      %269 = arith.maximumf %267, %268 : vector<8x32xf32>
      scf.yield %269 : vector<8x32xf32>
    }
    %c10_i32_162 = arith.constant 10 : i32
    %c0_163 = arith.constant 0 : index
    %c0_164 = arith.constant 0 : index
    %179 = vector.load %arg56[%c0_163, %c0_164] : memref<32x16xf32, #tpu.memory_space<vmem>>, vector<32x16xf32>
    %c0_165 = arith.constant 0 : index
    %c0_166 = arith.constant 0 : index
    %180 = vector.load %arg57[%c0_165, %c0_166] : memref<1x16xf32, #tpu.memory_space<vmem>>, vector<1x16xf32>
    %c0_167 = arith.constant 0 : index
    %c0_168 = arith.constant 0 : index
    %181 = vector.load %arg58[%c0_167, %c0_168] : memref<16x16xf32, #tpu.memory_space<vmem>>, vector<16x16xf32>
    %c0_169 = arith.constant 0 : index
    %c0_170 = arith.constant 0 : index
    %182 = vector.load %arg59[%c0_169, %c0_170] : memref<1x16xf32, #tpu.memory_space<vmem>>, vector<1x16xf32>
    %c0_171 = arith.constant 0 : index
    %c0_172 = arith.constant 0 : index
    %183 = vector.load %arg60[%c0_171, %c0_172] : memref<32x16xf32, #tpu.memory_space<vmem>>, vector<32x16xf32>
    %c0_173 = arith.constant 0 : index
    %c0_174 = arith.constant 0 : index
    %184 = vector.load %arg61[%c0_173, %c0_174] : memref<1x16xf32, #tpu.memory_space<vmem>>, vector<1x16xf32>
    %cst_175 = arith.constant dense<0.000000e+00> : vector<8x16xf32>
    %185 = tpu.matmul %178, %179, %cst_175 {dimension_numbers = #tpu.dot_dimension_numbers<[1], [0], [0], [1], [0, 0, 1, 1], [], []>} : vector<8x32xf32>, vector<32x16xf32>, vector<8x16xf32> -> vector<8x16xf32>
    %186 = vector.broadcast %180 : vector<1x16xf32> to vector<8x16xf32>
    %187 = arith.addf %185, %186 : vector<8x16xf32>
    %cst_176 = arith.constant 0.000000e+00 : f32
    %188 = vector.broadcast %cst_176 : f32 to vector<8x16xf32>
    %189 = arith.maximumf %187, %188 : vector<8x16xf32>
    %cst_177 = arith.constant dense<0.000000e+00> : vector<8x16xf32>
    %190 = tpu.matmul %189, %181, %cst_177 {dimension_numbers = #tpu.dot_dimension_numbers<[1], [0], [0], [1], [0, 0, 1, 1], [], []>} : vector<8x16xf32>, vector<16x16xf32>, vector<8x16xf32> -> vector<8x16xf32>
    %191 = vector.broadcast %182 : vector<1x16xf32> to vector<8x16xf32>
    %192 = arith.addf %190, %191 : vector<8x16xf32>
    %cst_178 = arith.constant dense<0.000000e+00> : vector<8x16xf32>
    %193 = tpu.matmul %178, %183, %cst_178 {dimension_numbers = #tpu.dot_dimension_numbers<[1], [0], [0], [1], [0, 0, 1, 1], [], []>} : vector<8x32xf32>, vector<32x16xf32>, vector<8x16xf32> -> vector<8x16xf32>
    %194 = vector.broadcast %184 : vector<1x16xf32> to vector<8x16xf32>
    %195 = arith.addf %193, %194 : vector<8x16xf32>
    %196 = arith.addf %192, %195 : vector<8x16xf32>
    %cst_179 = arith.constant 0.000000e+00 : f32
    %197 = vector.broadcast %cst_179 : f32 to vector<8x16xf32>
    %198 = arith.maximumf %196, %197 : vector<8x16xf32>
    %c0_i32_180 = arith.constant 0 : i32
    %c10_i32_181 = arith.constant 10 : i32
    %199 = arith.addi %c0_i32_180, %c10_i32_181 : i32
    %c1_i32_182 = arith.constant 1 : i32
    %200 = scf.for %arg85 = %c0_i32_180 to %199 step %c1_i32_182 iter_args(%arg86 = %198) -> (vector<8x16xf32>)  : i32 {
      %247 = arith.index_cast %arg85 : i32 to index
      %c0_225 = arith.constant 0 : index
      %c0_226 = arith.constant 0 : index
      %248 = vector.load %arg62[%247, %c0_225, %c0_226] : memref<10x16x16xf32, #tpu.memory_space<vmem>>, vector<1x16x16xf32>
      %249 = vector.shape_cast %248 : vector<1x16x16xf32> to vector<16x16xf32>
      %cst_227 = arith.constant dense<0.000000e+00> : vector<8x16xf32>
      %250 = tpu.matmul %arg86, %249, %cst_227 {dimension_numbers = #tpu.dot_dimension_numbers<[1], [0], [0], [1], [0, 0, 1, 1], [], []>} : vector<8x16xf32>, vector<16x16xf32>, vector<8x16xf32> -> vector<8x16xf32>
      %251 = arith.index_cast %arg85 : i32 to index
      %c0_228 = arith.constant 0 : index
      %c0_229 = arith.constant 0 : index
      %252 = vector.load %arg63[%251, %c0_228, %c0_229] : memref<10x1x16xf32, #tpu.memory_space<vmem>>, vector<1x1x16xf32>
      %253 = vector.shape_cast %252 : vector<1x1x16xf32> to vector<1x16xf32>
      %254 = vector.broadcast %253 : vector<1x16xf32> to vector<8x16xf32>
      %255 = arith.addf %250, %254 : vector<8x16xf32>
      %cst_230 = arith.constant 0.000000e+00 : f32
      %256 = vector.broadcast %cst_230 : f32 to vector<8x16xf32>
      %257 = arith.maximumf %255, %256 : vector<8x16xf32>
      %258 = arith.index_cast %arg85 : i32 to index
      %c0_231 = arith.constant 0 : index
      %c0_232 = arith.constant 0 : index
      %259 = vector.load %arg64[%258, %c0_231, %c0_232] : memref<10x16x16xf32, #tpu.memory_space<vmem>>, vector<1x16x16xf32>
      %260 = vector.shape_cast %259 : vector<1x16x16xf32> to vector<16x16xf32>
      %cst_233 = arith.constant dense<0.000000e+00> : vector<8x16xf32>
      %261 = tpu.matmul %257, %260, %cst_233 {dimension_numbers = #tpu.dot_dimension_numbers<[1], [0], [0], [1], [0, 0, 1, 1], [], []>} : vector<8x16xf32>, vector<16x16xf32>, vector<8x16xf32> -> vector<8x16xf32>
      %262 = arith.index_cast %arg85 : i32 to index
      %c0_234 = arith.constant 0 : index
      %c0_235 = arith.constant 0 : index
      %263 = vector.load %arg65[%262, %c0_234, %c0_235] : memref<10x1x16xf32, #tpu.memory_space<vmem>>, vector<1x1x16xf32>
      %264 = vector.shape_cast %263 : vector<1x1x16xf32> to vector<1x16xf32>
      %265 = vector.broadcast %264 : vector<1x16xf32> to vector<8x16xf32>
      %266 = arith.addf %261, %265 : vector<8x16xf32>
      %267 = arith.addf %266, %arg86 : vector<8x16xf32>
      %cst_236 = arith.constant 0.000000e+00 : f32
      %268 = vector.broadcast %cst_236 : f32 to vector<8x16xf32>
      %269 = arith.maximumf %267, %268 : vector<8x16xf32>
      scf.yield %269 : vector<8x16xf32>
    }
    %c10_i32_183 = arith.constant 10 : i32
    %c0_184 = arith.constant 0 : index
    %c0_185 = arith.constant 0 : index
    %201 = vector.load %arg66[%c0_184, %c0_185] : memref<16x8xf32, #tpu.memory_space<vmem>>, vector<16x8xf32>
    %c0_186 = arith.constant 0 : index
    %c0_187 = arith.constant 0 : index
    %202 = vector.load %arg67[%c0_186, %c0_187] : memref<1x8xf32, #tpu.memory_space<vmem>>, vector<1x8xf32>
    %c0_188 = arith.constant 0 : index
    %c0_189 = arith.constant 0 : index
    %203 = vector.load %arg68[%c0_188, %c0_189] : memref<8x8xf32, #tpu.memory_space<vmem>>, vector<8x8xf32>
    %c0_190 = arith.constant 0 : index
    %c0_191 = arith.constant 0 : index
    %204 = vector.load %arg69[%c0_190, %c0_191] : memref<1x8xf32, #tpu.memory_space<vmem>>, vector<1x8xf32>
    %c0_192 = arith.constant 0 : index
    %c0_193 = arith.constant 0 : index
    %205 = vector.load %arg70[%c0_192, %c0_193] : memref<16x8xf32, #tpu.memory_space<vmem>>, vector<16x8xf32>
    %c0_194 = arith.constant 0 : index
    %c0_195 = arith.constant 0 : index
    %206 = vector.load %arg71[%c0_194, %c0_195] : memref<1x8xf32, #tpu.memory_space<vmem>>, vector<1x8xf32>
    %cst_196 = arith.constant dense<0.000000e+00> : vector<8x8xf32>
    %207 = tpu.matmul %200, %201, %cst_196 {dimension_numbers = #tpu.dot_dimension_numbers<[1], [0], [0], [1], [0, 0, 1, 1], [], []>} : vector<8x16xf32>, vector<16x8xf32>, vector<8x8xf32> -> vector<8x8xf32>
    %208 = vector.broadcast %202 : vector<1x8xf32> to vector<8x8xf32>
    %209 = arith.addf %207, %208 : vector<8x8xf32>
    %cst_197 = arith.constant 0.000000e+00 : f32
    %210 = vector.broadcast %cst_197 : f32 to vector<8x8xf32>
    %211 = arith.maximumf %209, %210 : vector<8x8xf32>
    %cst_198 = arith.constant dense<0.000000e+00> : vector<8x8xf32>
    %212 = tpu.matmul %211, %203, %cst_198 {dimension_numbers = #tpu.dot_dimension_numbers<[1], [0], [0], [1], [0, 0, 1, 1], [], []>} : vector<8x8xf32>, vector<8x8xf32>, vector<8x8xf32> -> vector<8x8xf32>
    %213 = vector.broadcast %204 : vector<1x8xf32> to vector<8x8xf32>
    %214 = arith.addf %212, %213 : vector<8x8xf32>
    %cst_199 = arith.constant dense<0.000000e+00> : vector<8x8xf32>
    %215 = tpu.matmul %200, %205, %cst_199 {dimension_numbers = #tpu.dot_dimension_numbers<[1], [0], [0], [1], [0, 0, 1, 1], [], []>} : vector<8x16xf32>, vector<16x8xf32>, vector<8x8xf32> -> vector<8x8xf32>
    %216 = vector.broadcast %206 : vector<1x8xf32> to vector<8x8xf32>
    %217 = arith.addf %215, %216 : vector<8x8xf32>
    %218 = arith.addf %214, %217 : vector<8x8xf32>
    %cst_200 = arith.constant 0.000000e+00 : f32
    %219 = vector.broadcast %cst_200 : f32 to vector<8x8xf32>
    %220 = arith.maximumf %218, %219 : vector<8x8xf32>
    %c0_i32_201 = arith.constant 0 : i32
    %c10_i32_202 = arith.constant 10 : i32
    %221 = arith.addi %c0_i32_201, %c10_i32_202 : i32
    %c1_i32_203 = arith.constant 1 : i32
    %222 = scf.for %arg85 = %c0_i32_201 to %221 step %c1_i32_203 iter_args(%arg86 = %220) -> (vector<8x8xf32>)  : i32 {
      %247 = arith.index_cast %arg85 : i32 to index
      %c0_225 = arith.constant 0 : index
      %c0_226 = arith.constant 0 : index
      %248 = vector.load %arg72[%247, %c0_225, %c0_226] : memref<10x8x8xf32, #tpu.memory_space<vmem>>, vector<1x8x8xf32>
      %249 = vector.shape_cast %248 : vector<1x8x8xf32> to vector<8x8xf32>
      %cst_227 = arith.constant dense<0.000000e+00> : vector<8x8xf32>
      %250 = tpu.matmul %arg86, %249, %cst_227 {dimension_numbers = #tpu.dot_dimension_numbers<[1], [0], [0], [1], [0, 0, 1, 1], [], []>} : vector<8x8xf32>, vector<8x8xf32>, vector<8x8xf32> -> vector<8x8xf32>
      %251 = arith.index_cast %arg85 : i32 to index
      %c0_228 = arith.constant 0 : index
      %c0_229 = arith.constant 0 : index
      %252 = vector.load %arg73[%251, %c0_228, %c0_229] : memref<10x1x8xf32, #tpu.memory_space<vmem>>, vector<1x1x8xf32>
      %253 = vector.shape_cast %252 : vector<1x1x8xf32> to vector<1x8xf32>
      %254 = vector.broadcast %253 : vector<1x8xf32> to vector<8x8xf32>
      %255 = arith.addf %250, %254 : vector<8x8xf32>
      %cst_230 = arith.constant 0.000000e+00 : f32
      %256 = vector.broadcast %cst_230 : f32 to vector<8x8xf32>
      %257 = arith.maximumf %255, %256 : vector<8x8xf32>
      %258 = arith.index_cast %arg85 : i32 to index
      %c0_231 = arith.constant 0 : index
      %c0_232 = arith.constant 0 : index
      %259 = vector.load %arg74[%258, %c0_231, %c0_232] : memref<10x8x8xf32, #tpu.memory_space<vmem>>, vector<1x8x8xf32>
      %260 = vector.shape_cast %259 : vector<1x8x8xf32> to vector<8x8xf32>
      %cst_233 = arith.constant dense<0.000000e+00> : vector<8x8xf32>
      %261 = tpu.matmul %257, %260, %cst_233 {dimension_numbers = #tpu.dot_dimension_numbers<[1], [0], [0], [1], [0, 0, 1, 1], [], []>} : vector<8x8xf32>, vector<8x8xf32>, vector<8x8xf32> -> vector<8x8xf32>
      %262 = arith.index_cast %arg85 : i32 to index
      %c0_234 = arith.constant 0 : index
      %c0_235 = arith.constant 0 : index
      %263 = vector.load %arg75[%262, %c0_234, %c0_235] : memref<10x1x8xf32, #tpu.memory_space<vmem>>, vector<1x1x8xf32>
      %264 = vector.shape_cast %263 : vector<1x1x8xf32> to vector<1x8xf32>
      %265 = vector.broadcast %264 : vector<1x8xf32> to vector<8x8xf32>
      %266 = arith.addf %261, %265 : vector<8x8xf32>
      %267 = arith.addf %266, %arg86 : vector<8x8xf32>
      %cst_236 = arith.constant 0.000000e+00 : f32
      %268 = vector.broadcast %cst_236 : f32 to vector<8x8xf32>
      %269 = arith.maximumf %267, %268 : vector<8x8xf32>
      scf.yield %269 : vector<8x8xf32>
    }
    %c10_i32_204 = arith.constant 10 : i32
    %c0_205 = arith.constant 0 : index
    %c0_206 = arith.constant 0 : index
    %223 = vector.load %arg76[%c0_205, %c0_206] : memref<8x8xf32, #tpu.memory_space<vmem>>, vector<8x8xf32>
    %c0_207 = arith.constant 0 : index
    %c0_208 = arith.constant 0 : index
    %224 = vector.load %arg77[%c0_207, %c0_208] : memref<1x8xf32, #tpu.memory_space<vmem>>, vector<1x8xf32>
    %c0_209 = arith.constant 0 : index
    %c0_210 = arith.constant 0 : index
    %225 = vector.load %arg78[%c0_209, %c0_210] : memref<8x8xf32, #tpu.memory_space<vmem>>, vector<8x8xf32>
    %c0_211 = arith.constant 0 : index
    %c0_212 = arith.constant 0 : index
    %226 = vector.load %arg79[%c0_211, %c0_212] : memref<1x8xf32, #tpu.memory_space<vmem>>, vector<1x8xf32>
    %c0_213 = arith.constant 0 : index
    %c0_214 = arith.constant 0 : index
    %227 = vector.load %arg80[%c0_213, %c0_214] : memref<8x8xf32, #tpu.memory_space<vmem>>, vector<8x8xf32>
    %c0_215 = arith.constant 0 : index
    %c0_216 = arith.constant 0 : index
    %228 = vector.load %arg81[%c0_215, %c0_216] : memref<1x8xf32, #tpu.memory_space<vmem>>, vector<1x8xf32>
    %cst_217 = arith.constant dense<0.000000e+00> : vector<8x8xf32>
    %229 = tpu.matmul %222, %223, %cst_217 {dimension_numbers = #tpu.dot_dimension_numbers<[1], [0], [0], [1], [0, 0, 1, 1], [], []>} : vector<8x8xf32>, vector<8x8xf32>, vector<8x8xf32> -> vector<8x8xf32>
    %230 = vector.broadcast %224 : vector<1x8xf32> to vector<8x8xf32>
    %231 = arith.addf %229, %230 : vector<8x8xf32>
    %cst_218 = arith.constant 0.000000e+00 : f32
    %232 = vector.broadcast %cst_218 : f32 to vector<8x8xf32>
    %233 = arith.maximumf %231, %232 : vector<8x8xf32>
    %cst_219 = arith.constant dense<0.000000e+00> : vector<8x8xf32>
    %234 = tpu.matmul %233, %225, %cst_219 {dimension_numbers = #tpu.dot_dimension_numbers<[1], [0], [0], [1], [0, 0, 1, 1], [], []>} : vector<8x8xf32>, vector<8x8xf32>, vector<8x8xf32> -> vector<8x8xf32>
    %235 = vector.broadcast %226 : vector<1x8xf32> to vector<8x8xf32>
    %236 = arith.addf %234, %235 : vector<8x8xf32>
    %cst_220 = arith.constant dense<0.000000e+00> : vector<8x8xf32>
    %237 = tpu.matmul %222, %227, %cst_220 {dimension_numbers = #tpu.dot_dimension_numbers<[1], [0], [0], [1], [0, 0, 1, 1], [], []>} : vector<8x8xf32>, vector<8x8xf32>, vector<8x8xf32> -> vector<8x8xf32>
    %238 = vector.broadcast %228 : vector<1x8xf32> to vector<8x8xf32>
    %239 = arith.addf %237, %238 : vector<8x8xf32>
    %240 = arith.addf %236, %239 : vector<8x8xf32>
    %cst_221 = arith.constant 0.000000e+00 : f32
    %241 = vector.broadcast %cst_221 : f32 to vector<8x8xf32>
    %242 = arith.maximumf %240, %241 : vector<8x8xf32>
    %243 = vector.extract_strided_slice %242 {offsets = [0, 0], sizes = [4, 3], strides = [1, 1]} : vector<8x8xf32> to vector<4x3xf32>
    %c0_222 = arith.constant 0 : index
    %c0_223 = arith.constant 0 : index
    %c0_224 = arith.constant 0 : index
    %244 = vector.load %arg82[%c0_222, %c0_223, %c0_224] : memref<1x4x3xf32, #tpu.memory_space<vmem>>, vector<1x4x3xf32>
    %245 = vector.shape_cast %244 : vector<1x4x3xf32> to vector<4x3xf32>
    %246 = vector.shape_cast %243 : vector<4x3xf32> to vector<1x4x3xf32>
    tpu.vector_store %arg82[%c0_222, %c0_223, %c0_224], %246 {strides = array<i32>} : memref<1x4x3xf32, #tpu.memory_space<vmem>>, vector<1x4x3xf32>,
    return
  }
  func.func @transform_0(%arg0: i32) -> (i32, i32, i32) {
    %c0_i32 = arith.constant 0 : i32
    %c0_i32_0 = arith.constant 0 : i32
    %c0_i32_1 = arith.constant 0 : i32
    return %arg0, %c0_i32, %c0_i32_0 : i32, i32, i32
  }
  func.func @transform_1(%arg0: i32) -> (i32, i32) {
    %c0_i32 = arith.constant 0 : i32
    %c0_i32_0 = arith.constant 0 : i32
    %c0_i32_1 = arith.constant 0 : i32
    return %c0_i32, %c0_i32_0 : i32, i32
  }
  func.func @transform_2(%arg0: i32) -> (i32, i32) {
    %c0_i32 = arith.constant 0 : i32
    %c0_i32_0 = arith.constant 0 : i32
    %c0_i32_1 = arith.constant 0 : i32
    return %c0_i32, %c0_i32_0 : i32, i32
  }
  func.func @transform_3(%arg0: i32) -> (i32, i32) {
    %c0_i32 = arith.constant 0 : i32
    %c0_i32_0 = arith.constant 0 : i32
    %c0_i32_1 = arith.constant 0 : i32
    return %c0_i32, %c0_i32_0 : i32, i32
  }
  func.func @transform_4(%arg0: i32) -> (i32, i32) {
    %c0_i32 = arith.constant 0 : i32
    %c0_i32_0 = arith.constant 0 : i32
    %c0_i32_1 = arith.constant 0 : i32
    return %c0_i32, %c0_i32_0 : i32, i32
  }
  func.func @transform_5(%arg0: i32) -> (i32, i32, i32) {
    %c0_i32 = arith.constant 0 : i32
    %c0_i32_0 = arith.constant 0 : i32
    %c0_i32_1 = arith.constant 0 : i32
    %c0_i32_2 = arith.constant 0 : i32
    return %c0_i32, %c0_i32_0, %c0_i32_1 : i32, i32, i32
  }
  func.func @transform_6(%arg0: i32) -> (i32, i32, i32) {
    %c0_i32 = arith.constant 0 : i32
    %c0_i32_0 = arith.constant 0 : i32
    %c0_i32_1 = arith.constant 0 : i32
    %c0_i32_2 = arith.constant 0 : i32
    return %c0_i32, %c0_i32_0, %c0_i32_1 : i32, i32, i32
  }
  func.func @transform_7(%arg0: i32) -> (i32, i32, i32) {
    %c0_i32 = arith.constant 0 : i32
    %c0_i32_0 = arith.constant 0 : i32
    %c0_i32_1 = arith.constant 0 : i32
    %c0_i32_2 = arith.constant 0 : i32
    return %c0_i32, %c0_i32_0, %c0_i32_1 : i32, i32, i32
  }
  func.func @transform_8(%arg0: i32) -> (i32, i32, i32) {
    %c0_i32 = arith.constant 0 : i32
    %c0_i32_0 = arith.constant 0 : i32
    %c0_i32_1 = arith.constant 0 : i32
    %c0_i32_2 = arith.constant 0 : i32
    return %c0_i32, %c0_i32_0, %c0_i32_1 : i32, i32, i32
  }
  func.func @transform_9(%arg0: i32) -> (i32, i32) {
    %c0_i32 = arith.constant 0 : i32
    %c0_i32_0 = arith.constant 0 : i32
    %c0_i32_1 = arith.constant 0 : i32
    return %c0_i32, %c0_i32_0 : i32, i32
  }
  func.func @transform_10(%arg0: i32) -> (i32, i32) {
    %c0_i32 = arith.constant 0 : i32
    %c0_i32_0 = arith.constant 0 : i32
    %c0_i32_1 = arith.constant 0 : i32
    return %c0_i32, %c0_i32_0 : i32, i32
  }
  func.func @transform_11(%arg0: i32) -> (i32, i32) {
    %c0_i32 = arith.constant 0 : i32
    %c0_i32_0 = arith.constant 0 : i32
    %c0_i32_1 = arith.constant 0 : i32
    return %c0_i32, %c0_i32_0 : i32, i32
  }
  func.func @transform_12(%arg0: i32) -> (i32, i32) {
    %c0_i32 = arith.constant 0 : i32
    %c0_i32_0 = arith.constant 0 : i32
    %c0_i32_1 = arith.constant 0 : i32
    return %c0_i32, %c0_i32_0 : i32, i32
  }
  func.func @transform_13(%arg0: i32) -> (i32, i32) {
    %c0_i32 = arith.constant 0 : i32
    %c0_i32_0 = arith.constant 0 : i32
    %c0_i32_1 = arith.constant 0 : i32
    return %c0_i32, %c0_i32_0 : i32, i32
  }
  func.func @transform_14(%arg0: i32) -> (i32, i32) {
    %c0_i32 = arith.constant 0 : i32
    %c0_i32_0 = arith.constant 0 : i32
    %c0_i32_1 = arith.constant 0 : i32
    return %c0_i32, %c0_i32_0 : i32, i32
  }
  func.func @transform_15(%arg0: i32) -> (i32, i32, i32) {
    %c0_i32 = arith.constant 0 : i32
    %c0_i32_0 = arith.constant 0 : i32
    %c0_i32_1 = arith.constant 0 : i32
    %c0_i32_2 = arith.constant 0 : i32
    return %c0_i32, %c0_i32_0, %c0_i32_1 : i32, i32, i32
  }
  func.func @transform_16(%arg0: i32) -> (i32, i32, i32) {
    %c0_i32 = arith.constant 0 : i32
    %c0_i32_0 = arith.constant 0 : i32
    %c0_i32_1 = arith.constant 0 : i32
    %c0_i32_2 = arith.constant 0 : i32
    return %c0_i32, %c0_i32_0, %c0_i32_1 : i32, i32, i32
  }
  func.func @transform_17(%arg0: i32) -> (i32, i32, i32) {
    %c0_i32 = arith.constant 0 : i32
    %c0_i32_0 = arith.constant 0 : i32
    %c0_i32_1 = arith.constant 0 : i32
    %c0_i32_2 = arith.constant 0 : i32
    return %c0_i32, %c0_i32_0, %c0_i32_1 : i32, i32, i32
  }
  func.func @transform_18(%arg0: i32) -> (i32, i32, i32) {
    %c0_i32 = arith.constant 0 : i32
    %c0_i32_0 = arith.constant 0 : i32
    %c0_i32_1 = arith.constant 0 : i32
    %c0_i32_2 = arith.constant 0 : i32
    return %c0_i32, %c0_i32_0, %c0_i32_1 : i32, i32, i32
  }
  func.func @transform_19(%arg0: i32) -> (i32, i32) {
    %c0_i32 = arith.constant 0 : i32
    %c0_i32_0 = arith.constant 0 : i32
    %c0_i32_1 = arith.constant 0 : i32
    return %c0_i32, %c0_i32_0 : i32, i32
  }
  func.func @transform_20(%arg0: i32) -> (i32, i32) {
    %c0_i32 = arith.constant 0 : i32
    %c0_i32_0 = arith.constant 0 : i32
    %c0_i32_1 = arith.constant 0 : i32
    return %c0_i32, %c0_i32_0 : i32, i32
  }
  func.func @transform_21(%arg0: i32) -> (i32, i32) {
    %c0_i32 = arith.constant 0 : i32
    %c0_i32_0 = arith.constant 0 : i32
    %c0_i32_1 = arith.constant 0 : i32
    return %c0_i32, %c0_i32_0 : i32, i32
  }
  func.func @transform_22(%arg0: i32) -> (i32, i32) {
    %c0_i32 = arith.constant 0 : i32
    %c0_i32_0 = arith.constant 0 : i32
    %c0_i32_1 = arith.constant 0 : i32
    return %c0_i32, %c0_i32_0 : i32, i32
  }
  func.func @transform_23(%arg0: i32) -> (i32, i32) {
    %c0_i32 = arith.constant 0 : i32
    %c0_i32_0 = arith.constant 0 : i32
    %c0_i32_1 = arith.constant 0 : i32
    return %c0_i32, %c0_i32_0 : i32, i32
  }
  func.func @transform_24(%arg0: i32) -> (i32, i32) {
    %c0_i32 = arith.constant 0 : i32
    %c0_i32_0 = arith.constant 0 : i32
    %c0_i32_1 = arith.constant 0 : i32
    return %c0_i32, %c0_i32_0 : i32, i32
  }
  func.func @transform_25(%arg0: i32) -> (i32, i32, i32) {
    %c0_i32 = arith.constant 0 : i32
    %c0_i32_0 = arith.constant 0 : i32
    %c0_i32_1 = arith.constant 0 : i32
    %c0_i32_2 = arith.constant 0 : i32
    return %c0_i32, %c0_i32_0, %c0_i32_1 : i32, i32, i32
  }
  func.func @transform_26(%arg0: i32) -> (i32, i32, i32) {
    %c0_i32 = arith.constant 0 : i32
    %c0_i32_0 = arith.constant 0 : i32
    %c0_i32_1 = arith.constant 0 : i32
    %c0_i32_2 = arith.constant 0 : i32
    return %c0_i32, %c0_i32_0, %c0_i32_1 : i32, i32, i32
  }
  func.func @transform_27(%arg0: i32) -> (i32, i32, i32) {
    %c0_i32 = arith.constant 0 : i32
    %c0_i32_0 = arith.constant 0 : i32
    %c0_i32_1 = arith.constant 0 : i32
    %c0_i32_2 = arith.constant 0 : i32
    return %c0_i32, %c0_i32_0, %c0_i32_1 : i32, i32, i32
  }
  func.func @transform_28(%arg0: i32) -> (i32, i32, i32) {
    %c0_i32 = arith.constant 0 : i32
    %c0_i32_0 = arith.constant 0 : i32
    %c0_i32_1 = arith.constant 0 : i32
    %c0_i32_2 = arith.constant 0 : i32
    return %c0_i32, %c0_i32_0, %c0_i32_1 : i32, i32, i32
  }
  func.func @transform_29(%arg0: i32) -> (i32, i32) {
    %c0_i32 = arith.constant 0 : i32
    %c0_i32_0 = arith.constant 0 : i32
    %c0_i32_1 = arith.constant 0 : i32
    return %c0_i32, %c0_i32_0 : i32, i32
  }
  func.func @transform_30(%arg0: i32) -> (i32, i32) {
    %c0_i32 = arith.constant 0 : i32
    %c0_i32_0 = arith.constant 0 : i32
    %c0_i32_1 = arith.constant 0 : i32
    return %c0_i32, %c0_i32_0 : i32, i32
  }
  func.func @transform_31(%arg0: i32) -> (i32, i32) {
    %c0_i32 = arith.constant 0 : i32
    %c0_i32_0 = arith.constant 0 : i32
    %c0_i32_1 = arith.constant 0 : i32
    return %c0_i32, %c0_i32_0 : i32, i32
  }
  func.func @transform_32(%arg0: i32) -> (i32, i32) {
    %c0_i32 = arith.constant 0 : i32
    %c0_i32_0 = arith.constant 0 : i32
    %c0_i32_1 = arith.constant 0 : i32
    return %c0_i32, %c0_i32_0 : i32, i32
  }
  func.func @transform_33(%arg0: i32) -> (i32, i32) {
    %c0_i32 = arith.constant 0 : i32
    %c0_i32_0 = arith.constant 0 : i32
    %c0_i32_1 = arith.constant 0 : i32
    return %c0_i32, %c0_i32_0 : i32, i32
  }
  func.func @transform_34(%arg0: i32) -> (i32, i32) {
    %c0_i32 = arith.constant 0 : i32
    %c0_i32_0 = arith.constant 0 : i32
    %c0_i32_1 = arith.constant 0 : i32
    return %c0_i32, %c0_i32_0 : i32, i32
  }
  func.func @transform_35(%arg0: i32) -> (i32, i32, i32) {
    %c0_i32 = arith.constant 0 : i32
    %c0_i32_0 = arith.constant 0 : i32
    %c0_i32_1 = arith.constant 0 : i32
    %c0_i32_2 = arith.constant 0 : i32
    return %c0_i32, %c0_i32_0, %c0_i32_1 : i32, i32, i32
  }
  func.func @transform_36(%arg0: i32) -> (i32, i32, i32) {
    %c0_i32 = arith.constant 0 : i32
    %c0_i32_0 = arith.constant 0 : i32
    %c0_i32_1 = arith.constant 0 : i32
    %c0_i32_2 = arith.constant 0 : i32
    return %c0_i32, %c0_i32_0, %c0_i32_1 : i32, i32, i32
  }
  func.func @transform_37(%arg0: i32) -> (i32, i32, i32) {
    %c0_i32 = arith.constant 0 : i32
    %c0_i32_0 = arith.constant 0 : i32
    %c0_i32_1 = arith.constant 0 : i32
    %c0_i32_2 = arith.constant 0 : i32
    return %c0_i32, %c0_i32_0, %c0_i32_1 : i32, i32, i32
  }
  func.func @transform_38(%arg0: i32) -> (i32, i32, i32) {
    %c0_i32 = arith.constant 0 : i32
    %c0_i32_0 = arith.constant 0 : i32
    %c0_i32_1 = arith.constant 0 : i32
    %c0_i32_2 = arith.constant 0 : i32
    return %c0_i32, %c0_i32_0, %c0_i32_1 : i32, i32, i32
  }
  func.func @transform_39(%arg0: i32) -> (i32, i32) {
    %c0_i32 = arith.constant 0 : i32
    %c0_i32_0 = arith.constant 0 : i32
    %c0_i32_1 = arith.constant 0 : i32
    return %c0_i32, %c0_i32_0 : i32, i32
  }
  func.func @transform_40(%arg0: i32) -> (i32, i32) {
    %c0_i32 = arith.constant 0 : i32
    %c0_i32_0 = arith.constant 0 : i32
    %c0_i32_1 = arith.constant 0 : i32
    return %c0_i32, %c0_i32_0 : i32, i32
  }
  func.func @transform_41(%arg0: i32) -> (i32, i32) {
    %c0_i32 = arith.constant 0 : i32
    %c0_i32_0 = arith.constant 0 : i32
    %c0_i32_1 = arith.constant 0 : i32
    return %c0_i32, %c0_i32_0 : i32, i32
  }
  func.func @transform_42(%arg0: i32) -> (i32, i32) {
    %c0_i32 = arith.constant 0 : i32
    %c0_i32_0 = arith.constant 0 : i32
    %c0_i32_1 = arith.constant 0 : i32
    return %c0_i32, %c0_i32_0 : i32, i32
  }
  func.func @transform_43(%arg0: i32) -> (i32, i32) {
    %c0_i32 = arith.constant 0 : i32
    %c0_i32_0 = arith.constant 0 : i32
    %c0_i32_1 = arith.constant 0 : i32
    return %c0_i32, %c0_i32_0 : i32, i32
  }
  func.func @transform_44(%arg0: i32) -> (i32, i32) {
    %c0_i32 = arith.constant 0 : i32
    %c0_i32_0 = arith.constant 0 : i32
    %c0_i32_1 = arith.constant 0 : i32
    return %c0_i32, %c0_i32_0 : i32, i32
  }
  func.func @transform_45(%arg0: i32) -> (i32, i32) {
    %c0_i32 = arith.constant 0 : i32
    %c0_i32_0 = arith.constant 0 : i32
    %c0_i32_1 = arith.constant 0 : i32
    return %c0_i32, %c0_i32_0 : i32, i32
  }
  func.func @transform_46(%arg0: i32) -> (i32, i32) {
    %c0_i32 = arith.constant 0 : i32
    %c0_i32_0 = arith.constant 0 : i32
    %c0_i32_1 = arith.constant 0 : i32
    return %c0_i32, %c0_i32_0 : i32, i32
  }
  func.func @transform_47(%arg0: i32) -> (i32, i32) {
    %c0_i32 = arith.constant 0 : i32
    %c0_i32_0 = arith.constant 0 : i32
    %c0_i32_1 = arith.constant 0 : i32
    return %c0_i32, %c0_i32_0 : i32, i32
  }
  func.func @transform_48(%arg0: i32) -> (i32, i32) {
    %c0_i32 = arith.constant 0 : i32
    %c0_i32_0 = arith.constant 0 : i32
    %c0_i32_1 = arith.constant 0 : i32
    return %c0_i32, %c0_i32_0 : i32, i32
  }
  func.func @transform_49(%arg0: i32) -> (i32, i32) {
    %c0_i32 = arith.constant 0 : i32
    %c0_i32_0 = arith.constant 0 : i32
    %c0_i32_1 = arith.constant 0 : i32
    return %c0_i32, %c0_i32_0 : i32, i32
  }
  func.func @transform_50(%arg0: i32) -> (i32, i32) {
    %c0_i32 = arith.constant 0 : i32
    %c0_i32_0 = arith.constant 0 : i32
    %c0_i32_1 = arith.constant 0 : i32
    return %c0_i32, %c0_i32_0 : i32, i32
  }
  func.func @transform_51(%arg0: i32) -> (i32, i32, i32) {
    %c0_i32 = arith.constant 0 : i32
    %c0_i32_0 = arith.constant 0 : i32
    %c0_i32_1 = arith.constant 0 : i32
    %c0_i32_2 = arith.constant 0 : i32
    return %c0_i32, %c0_i32_0, %c0_i32_1 : i32, i32, i32
  }
  func.func @transform_52(%arg0: i32) -> (i32, i32, i32) {
    %c0_i32 = arith.constant 0 : i32
    %c0_i32_0 = arith.constant 0 : i32
    %c0_i32_1 = arith.constant 0 : i32
    %c0_i32_2 = arith.constant 0 : i32
    return %c0_i32, %c0_i32_0, %c0_i32_1 : i32, i32, i32
  }
  func.func @transform_53(%arg0: i32) -> (i32, i32, i32) {
    %c0_i32 = arith.constant 0 : i32
    %c0_i32_0 = arith.constant 0 : i32
    %c0_i32_1 = arith.constant 0 : i32
    %c0_i32_2 = arith.constant 0 : i32
    return %c0_i32, %c0_i32_0, %c0_i32_1 : i32, i32, i32
  }
  func.func @transform_54(%arg0: i32) -> (i32, i32, i32) {
    %c0_i32 = arith.constant 0 : i32
    %c0_i32_0 = arith.constant 0 : i32
    %c0_i32_1 = arith.constant 0 : i32
    %c0_i32_2 = arith.constant 0 : i32
    return %c0_i32, %c0_i32_0, %c0_i32_1 : i32, i32, i32
  }
  func.func @transform_55(%arg0: i32) -> (i32, i32) {
    %c0_i32 = arith.constant 0 : i32
    %c0_i32_0 = arith.constant 0 : i32
    %c0_i32_1 = arith.constant 0 : i32
    return %c0_i32, %c0_i32_0 : i32, i32
  }
  func.func @transform_56(%arg0: i32) -> (i32, i32) {
    %c0_i32 = arith.constant 0 : i32
    %c0_i32_0 = arith.constant 0 : i32
    %c0_i32_1 = arith.constant 0 : i32
    return %c0_i32, %c0_i32_0 : i32, i32
  }
  func.func @transform_57(%arg0: i32) -> (i32, i32) {
    %c0_i32 = arith.constant 0 : i32
    %c0_i32_0 = arith.constant 0 : i32
    %c0_i32_1 = arith.constant 0 : i32
    return %c0_i32, %c0_i32_0 : i32, i32
  }
  func.func @transform_58(%arg0: i32) -> (i32, i32) {
    %c0_i32 = arith.constant 0 : i32
    %c0_i32_0 = arith.constant 0 : i32
    %c0_i32_1 = arith.constant 0 : i32
    return %c0_i32, %c0_i32_0 : i32, i32
  }
  func.func @transform_59(%arg0: i32) -> (i32, i32) {
    %c0_i32 = arith.constant 0 : i32
    %c0_i32_0 = arith.constant 0 : i32
    %c0_i32_1 = arith.constant 0 : i32
    return %c0_i32, %c0_i32_0 : i32, i32
  }
  func.func @transform_60(%arg0: i32) -> (i32, i32) {
    %c0_i32 = arith.constant 0 : i32
    %c0_i32_0 = arith.constant 0 : i32
    %c0_i32_1 = arith.constant 0 : i32
    return %c0_i32, %c0_i32_0 : i32, i32
  }
  func.func @transform_61(%arg0: i32) -> (i32, i32, i32) {
    %c0_i32 = arith.constant 0 : i32
    %c0_i32_0 = arith.constant 0 : i32
    %c0_i32_1 = arith.constant 0 : i32
    %c0_i32_2 = arith.constant 0 : i32
    return %c0_i32, %c0_i32_0, %c0_i32_1 : i32, i32, i32
  }
  func.func @transform_62(%arg0: i32) -> (i32, i32, i32) {
    %c0_i32 = arith.constant 0 : i32
    %c0_i32_0 = arith.constant 0 : i32
    %c0_i32_1 = arith.constant 0 : i32
    %c0_i32_2 = arith.constant 0 : i32
    return %c0_i32, %c0_i32_0, %c0_i32_1 : i32, i32, i32
  }
  func.func @transform_63(%arg0: i32) -> (i32, i32, i32) {
    %c0_i32 = arith.constant 0 : i32
    %c0_i32_0 = arith.constant 0 : i32
    %c0_i32_1 = arith.constant 0 : i32
    %c0_i32_2 = arith.constant 0 : i32
    return %c0_i32, %c0_i32_0, %c0_i32_1 : i32, i32, i32
  }
  func.func @transform_64(%arg0: i32) -> (i32, i32, i32) {
    %c0_i32 = arith.constant 0 : i32
    %c0_i32_0 = arith.constant 0 : i32
    %c0_i32_1 = arith.constant 0 : i32
    %c0_i32_2 = arith.constant 0 : i32
    return %c0_i32, %c0_i32_0, %c0_i32_1 : i32, i32, i32
  }
  func.func @transform_65(%arg0: i32) -> (i32, i32) {
    %c0_i32 = arith.constant 0 : i32
    %c0_i32_0 = arith.constant 0 : i32
    %c0_i32_1 = arith.constant 0 : i32
    return %c0_i32, %c0_i32_0 : i32, i32
  }
  func.func @transform_66(%arg0: i32) -> (i32, i32) {
    %c0_i32 = arith.constant 0 : i32
    %c0_i32_0 = arith.constant 0 : i32
    %c0_i32_1 = arith.constant 0 : i32
    return %c0_i32, %c0_i32_0 : i32, i32
  }
  func.func @transform_67(%arg0: i32) -> (i32, i32) {
    %c0_i32 = arith.constant 0 : i32
    %c0_i32_0 = arith.constant 0 : i32
    %c0_i32_1 = arith.constant 0 : i32
    return %c0_i32, %c0_i32_0 : i32, i32
  }
  func.func @transform_68(%arg0: i32) -> (i32, i32) {
    %c0_i32 = arith.constant 0 : i32
    %c0_i32_0 = arith.constant 0 : i32
    %c0_i32_1 = arith.constant 0 : i32
    return %c0_i32, %c0_i32_0 : i32, i32
  }
  func.func @transform_69(%arg0: i32) -> (i32, i32) {
    %c0_i32 = arith.constant 0 : i32
    %c0_i32_0 = arith.constant 0 : i32
    %c0_i32_1 = arith.constant 0 : i32
    return %c0_i32, %c0_i32_0 : i32, i32
  }
  func.func @transform_70(%arg0: i32) -> (i32, i32) {
    %c0_i32 = arith.constant 0 : i32
    %c0_i32_0 = arith.constant 0 : i32
    %c0_i32_1 = arith.constant 0 : i32
    return %c0_i32, %c0_i32_0 : i32, i32
  }
  func.func @transform_71(%arg0: i32) -> (i32, i32, i32) {
    %c0_i32 = arith.constant 0 : i32
    %c0_i32_0 = arith.constant 0 : i32
    %c0_i32_1 = arith.constant 0 : i32
    %c0_i32_2 = arith.constant 0 : i32
    return %c0_i32, %c0_i32_0, %c0_i32_1 : i32, i32, i32
  }
  func.func @transform_72(%arg0: i32) -> (i32, i32, i32) {
    %c0_i32 = arith.constant 0 : i32
    %c0_i32_0 = arith.constant 0 : i32
    %c0_i32_1 = arith.constant 0 : i32
    %c0_i32_2 = arith.constant 0 : i32
    return %c0_i32, %c0_i32_0, %c0_i32_1 : i32, i32, i32
  }
  func.func @transform_73(%arg0: i32) -> (i32, i32, i32) {
    %c0_i32 = arith.constant 0 : i32
    %c0_i32_0 = arith.constant 0 : i32
    %c0_i32_1 = arith.constant 0 : i32
    %c0_i32_2 = arith.constant 0 : i32
    return %c0_i32, %c0_i32_0, %c0_i32_1 : i32, i32, i32
  }
  func.func @transform_74(%arg0: i32) -> (i32, i32, i32) {
    %c0_i32 = arith.constant 0 : i32
    %c0_i32_0 = arith.constant 0 : i32
    %c0_i32_1 = arith.constant 0 : i32
    %c0_i32_2 = arith.constant 0 : i32
    return %c0_i32, %c0_i32_0, %c0_i32_1 : i32, i32, i32
  }
  func.func @transform_75(%arg0: i32) -> (i32, i32) {
    %c0_i32 = arith.constant 0 : i32
    %c0_i32_0 = arith.constant 0 : i32
    %c0_i32_1 = arith.constant 0 : i32
    return %c0_i32, %c0_i32_0 : i32, i32
  }
  func.func @transform_76(%arg0: i32) -> (i32, i32) {
    %c0_i32 = arith.constant 0 : i32
    %c0_i32_0 = arith.constant 0 : i32
    %c0_i32_1 = arith.constant 0 : i32
    return %c0_i32, %c0_i32_0 : i32, i32
  }
  func.func @transform_77(%arg0: i32) -> (i32, i32) {
    %c0_i32 = arith.constant 0 : i32
    %c0_i32_0 = arith.constant 0 : i32
    %c0_i32_1 = arith.constant 0 : i32
    return %c0_i32, %c0_i32_0 : i32, i32
  }
  func.func @transform_78(%arg0: i32) -> (i32, i32) {
    %c0_i32 = arith.constant 0 : i32
    %c0_i32_0 = arith.constant 0 : i32
    %c0_i32_1 = arith.constant 0 : i32
    return %c0_i32, %c0_i32_0 : i32, i32
  }
  func.func @transform_79(%arg0: i32) -> (i32, i32) {
    %c0_i32 = arith.constant 0 : i32
    %c0_i32_0 = arith.constant 0 : i32
    %c0_i32_1 = arith.constant 0 : i32
    return %c0_i32, %c0_i32_0 : i32, i32
  }
  func.func @transform_80(%arg0: i32) -> (i32, i32) {
    %c0_i32 = arith.constant 0 : i32
    %c0_i32_0 = arith.constant 0 : i32
    %c0_i32_1 = arith.constant 0 : i32
    return %c0_i32, %c0_i32_0 : i32, i32
  }
  func.func @transform_81(%arg0: i32) -> (i32, i32, i32) {
    %c0_i32 = arith.constant 0 : i32
    %c0_i32_0 = arith.constant 0 : i32
    %c0_i32_1 = arith.constant 0 : i32
    return %arg0, %c0_i32, %c0_i32_0 : i32, i32, i32
  }
}

</mosaic_0001>

<bundles_post_ra>
// kernel: mymodel_forward.1
= control target key start
LH: loop header
LB: loop body
LE: loop exit
PB: predicated region body
PF: predicated region fallthrough
CT: control target
= control target key end

     0   :  { %s10598_s6 = smov 1   ;;  %s10599_s10 = smov 2   ;;  %s12435_s0 = inlined_call_operand.smem [shape: u32[82], index: -1, kind: input, shape index: {}] }
   0x1   :  { %s10722_s5 = sld [smem:[%s12435_s0]]   ;;  %s10600_s14 = smov 3  }
   0x2   :  { %s10727_s9 = sld [smem:[%s12435_s0 + %s10598_s6]]   ;;  %s10601_s18 = smov 4  }
   0x3   :  { %s10732_s13 = sld [smem:[%s12435_s0 + %s10599_s10]]   ;;  %s10602_s22 = smov 5  }
   0x4   :  { %s10737_s17 = sld [smem:[%s12435_s0 + %s10600_s14]]   ;;  %s10603_s26 = smov 6  }
   0x5   :  { %s10742_s21 = sld [smem:[%s12435_s0 + %s10601_s18]]   ;;  %s10604_s30 = smov 7  }
   0x6   :  { %s10747_s25 = sld [smem:[%s12435_s0 + %s10602_s22]]   ;;  %s10605_s4 = smov 8  }
   0x7   :  { %12478 = sst [smem:[#allocation31_spill]] %s10722_s5  ;;  %s10606_s10 = smov 9  }
   0x8   :  { %12479 = sst [smem:[#allocation32_spill]] %s10727_s9  ;;  %s10607_s15 = smov 10  }
   0x9   :  { %12480 = sst [smem:[#allocation33_spill]] %s10732_s13  ;;  %s10608_s20 = smov 11  }
   0xa   :  { %s10752_s29 = sld [smem:[%s12435_s0 + %s10603_s26]]   ;;  %s10609_s26 = smov 12  }
   0xb   :  { %s10757_s3 = sld [smem:[%s12435_s0 + %s10604_s30]]   ;;  %s10610_s1 = smov 13  }
   0xc   :  { %12481 = sst [smem:[#allocation34_spill]] %s10747_s25  ;;  %s10611_s7 = smov 14  }
   0xd   :  { %s10762_s8 = sld [smem:[%s12435_s0 + %s10605_s4]]   ;;  %s10613_s22 = smov 16  }
   0xe   :  { %s10767_s14 = sld [smem:[%s12435_s0 + %s10606_s10]]   ;;  %s10614_s28 = smov 17  }
   0xf   :  { %s10772_s19 = sld [smem:[%s12435_s0 + %s10607_s15]]   ;;  %s10612_s15 = smov 15  }
  0x10   :  { %12482 = sst [smem:[#allocation35_spill]] %s10752_s29 }
  0x11   :  { %12483 = sst [smem:[#allocation36_spill]] %s10757_s3 }
  0x12   :  { %s10777_s24 = sld [smem:[%s12435_s0 + %s10608_s20]]  }
  0x13   :  { %12484 = sst [smem:[#allocation37_spill]] %s10762_s8 }
  0x14   :  { %12485 = sst [smem:[#allocation38_spill]] %s10767_s14 }
  0x15   :  { %12486 = sst [smem:[#allocation39_spill]] %s10772_s19 }
  0x16   :  { %s10782_s30 = sld [smem:[%s12435_s0 + %s10609_s26]]  }
  0x17   :  { %s10787_s6 = sld [smem:[%s12435_s0 + %s10610_s1]]  }
  0x18   :  { %12487 = sst [smem:[#allocation40_spill]] %s10777_s24 }
  0x19   :  { %s10792_s12 = sld [smem:[%s12435_s0 + %s10611_s7]]   ;;  %s10615_s7 = smov 18  }
  0x1a   :  { %s10797_s20 = sld [smem:[%s12435_s0 + %s10612_s15]]   ;;  %s10616_s15 = smov 19  }
  0x1b   :  { %s10802_s27 = sld [smem:[%s12435_s0 + %s10613_s22]]   ;;  %s10617_s22 = smov 20  }
  0x1c   :  { %12488 = sst [smem:[#allocation41_spill]] %s10782_s30 }
  0x1d   :  { %12489 = sst [smem:[#allocation42_spill]] %s10787_s6 }
  0x1e   :  { %s10807_s4 = sld [smem:[%s12435_s0 + %s10614_s28]]   ;;  %s10618_s28 = smov 21  }
  0x1f   :  { %12490 = sst [smem:[#allocation43_spill]] %s10792_s12 }
  0x20   :  { %12491 = sst [smem:[#allocation44_spill]] %s10797_s20 }
  0x21   :  { %12492 = sst [smem:[#allocation45_spill]] %s10802_s27 }
  0x22   :  { %s10812_s24 = sld [smem:[%s12435_s0 + %s10615_s7]]   ;;  %s10619_s7 = smov 22  }
  0x23   :  { %s10817_s20 = sld [smem:[%s12435_s0 + %s10616_s15]]   ;;  %s10620_s15 = smov 23  }
  0x24   :  { %12493 = sst [smem:[#allocation46_spill]] %s10807_s4 }
  0x25   :  { %s10822_s27 = sld [smem:[%s12435_s0 + %s10617_s22]]   ;;  %s10621_s22 = smov 24  }
  0x26   :  { %s10827_s4 = sld [smem:[%s12435_s0 + %s10618_s28]]   ;;  %s10622_s28 = smov 25  }
  0x28   :  { %12494 = sst [smem:[#allocation47_spill]] %s10812_s24 }
  0x29   :  { %12495 = sst [smem:[#allocation48_spill]] %s10817_s20 }
  0x2a   :  { %s10832_s24 = sld [smem:[%s12435_s0 + %s10619_s7]]   ;;  %s10623_s7 = smov 26  }
  0x2b   :  { %12496 = sst [smem:[#allocation49_spill]] %s10822_s27 }
  0x2c   :  { %12497 = sst [smem:[#allocation50_spill]] %s10827_s4 }
  0x2d   :  { %s10837_s20 = sld [smem:[%s12435_s0 + %s10620_s15]]   ;;  %s10624_s15 = smov 27  }
  0x2e   :  { %s10842_s27 = sld [smem:[%s12435_s0 + %s10621_s22]]   ;;  %s10625_s22 = smov 28  }
  0x2f   :  { %s10847_s4 = sld [smem:[%s12435_s0 + %s10622_s28]]   ;;  %s10626_s28 = smov 29  }
  0x30   :  { %12498 = sst [smem:[#allocation51_spill]] %s10832_s24 }
  0x31   :  { %s10852_s24 = sld [smem:[%s12435_s0 + %s10623_s7]]   ;;  %s10627_s7 = smov 30  }
  0x33   :  { %12499 = sst [smem:[#allocation52_spill]] %s10837_s20 }
  0x34   :  { %12500 = sst [smem:[#allocation53_spill]] %s10842_s27 }
  0x35   :  { %12501 = sst [smem:[#allocation54_spill]] %s10847_s4 }
  0x36   :  { %s10857_s20 = sld [smem:[%s12435_s0 + %s10624_s15]]   ;;  %s10628_s15 = smov 31  }
  0x37   :  { %12502 = sst [smem:[#allocation55_spill]] %s10852_s24 }
  0x38   :  { %s10862_s27 = sld [smem:[%s12435_s0 + %s10625_s22]]   ;;  %s10629_s22 = smov 32  }
  0x39   :  { %s10867_s4 = sld [smem:[%s12435_s0 + %s10626_s28]]   ;;  %s10630_s28 = smov 33  }
  0x3a   :  { %s10872_s24 = sld [smem:[%s12435_s0 + %s10627_s7]]   ;;  %s10631_s7 = smov 34  }
  0x3c   :  { %12503 = sst [smem:[#allocation56_spill]] %s10857_s20 }
  0x3d   :  { %s10877_s20 = sld [smem:[%s12435_s0 + %s10628_s15]]   ;;  %s10632_s15 = smov 35  }
  0x3e   :  { %12504 = sst [smem:[#allocation57_spill]] %s10862_s27 }
  0x3f   :  { %12505 = sst [smem:[#allocation58_spill]] %s10867_s4 }
  0x40   :  { %12506 = sst [smem:[#allocation59_spill]] %s10872_s24 }
  0x41   :  { %s10882_s27 = sld [smem:[%s12435_s0 + %s10629_s22]]   ;;  %s10633_s22 = smov 36  }
  0x42   :  { %s10887_s4 = sld [smem:[%s12435_s0 + %s10630_s28]]   ;;  %s10634_s28 = smov 37  }
  0x43   :  { %12507 = sst [smem:[#allocation60_spill]] %s10877_s20 }
  0x44   :  { %s10892_s24 = sld [smem:[%s12435_s0 + %s10631_s7]]   ;;  %s10635_s7 = smov 38  }
  0x45   :  { %s10897_s20 = sld [smem:[%s12435_s0 + %s10632_s15]]   ;;  %s10636_s15 = smov 39  }
  0x47   :  { %12508 = sst [smem:[#allocation61_spill]] %s10882_s27 }
  0x48   :  { %12509 = sst [smem:[#allocation62_spill]] %s10887_s4 }
  0x49   :  { %s10902_s27 = sld [smem:[%s12435_s0 + %s10633_s22]]   ;;  %s10637_s22 = smov 40  }
  0x4a   :  { %12510 = sst [smem:[#allocation63_spill]] %s10892_s24 }
  0x4b   :  { %12511 = sst [smem:[#allocation64_spill]] %s10897_s20 }
  0x4c   :  { %s10907_s4 = sld [smem:[%s12435_s0 + %s10634_s28]]   ;;  %s10638_s28 = smov 41  }
  0x4d   :  { %s10912_s24 = sld [smem:[%s12435_s0 + %s10635_s7]]   ;;  %s10639_s7 = smov 42  }
  0x4e   :  { %s10917_s20 = sld [smem:[%s12435_s0 + %s10636_s15]]   ;;  %s10640_s15 = smov 43  }
  0x4f   :  { %12512 = sst [smem:[#allocation65_spill]] %s10902_s27 }
  0x50   :  { %s10922_s27 = sld [smem:[%s12435_s0 + %s10637_s22]]   ;;  %s10641_s22 = smov 44  }
  0x52   :  { %12513 = sst [smem:[#allocation66_spill]] %s10907_s4 }
  0x53   :  { %12514 = sst [smem:[#allocation67_spill]] %s10912_s24 }
  0x54   :  { %12515 = sst [smem:[#allocation68_spill]] %s10917_s20 }
  0x55   :  { %s10927_s4 = sld [smem:[%s12435_s0 + %s10638_s28]]   ;;  %s10642_s28 = smov 45  }
  0x56   :  { %12516 = sst [smem:[#allocation69_spill]] %s10922_s27 }
  0x57   :  { %s10932_s24 = sld [smem:[%s12435_s0 + %s10639_s7]]   ;;  %s10643_s7 = smov 46  }
  0x58   :  { %s10937_s20 = sld [smem:[%s12435_s0 + %s10640_s15]]   ;;  %s10644_s15 = smov 47  }
  0x59   :  { %s10942_s27 = sld [smem:[%s12435_s0 + %s10641_s22]]   ;;  %s10645_s22 = smov 48  }
  0x5b   :  { %12517 = sst [smem:[#allocation70_spill]] %s10927_s4 }
  0x5c   :  { %s10947_s4 = sld [smem:[%s12435_s0 + %s10642_s28]]   ;;  %s10646_s28 = smov 49  }
  0x5d   :  { %12518 = sst [smem:[#allocation71_spill]] %s10932_s24 }
  0x5e   :  { %12519 = sst [smem:[#allocation72_spill]] %s10937_s20 }
  0x5f   :  { %12520 = sst [smem:[#allocation73_spill]] %s10942_s27 }
  0x60   :  { %s10952_s24 = sld [smem:[%s12435_s0 + %s10643_s7]]   ;;  %s10647_s7 = smov 50  }
  0x61   :  { %s10957_s20 = sld [smem:[%s12435_s0 + %s10644_s15]]   ;;  %s10648_s15 = smov 51  }
  0x62   :  { %12521 = sst [smem:[#allocation74_spill]] %s10947_s4 }
  0x63   :  { %s10962_s27 = sld [smem:[%s12435_s0 + %s10645_s22]]   ;;  %s10649_s22 = smov 52  }
  0x64   :  { %s10967_s4 = sld [smem:[%s12435_s0 + %s10646_s28]]   ;;  %s10650_s28 = smov 53  }
  0x66   :  { %12522 = sst [smem:[#allocation75_spill]] %s10952_s24 }
  0x67   :  { %12523 = sst [smem:[#allocation76_spill]] %s10957_s20 }
  0x68   :  { %s10972_s24 = sld [smem:[%s12435_s0 + %s10647_s7]]   ;;  %s10651_s7 = smov 54  }
  0x69   :  { %12524 = sst [smem:[#allocation77_spill]] %s10962_s27 }
  0x6a   :  { %12525 = sst [smem:[#allocation78_spill]] %s10967_s4 }
  0x6b   :  { %s10977_s20 = sld [smem:[%s12435_s0 + %s10648_s15]]   ;;  %s10652_s15 = smov 55  }
  0x6c   :  { %s10982_s27 = sld [smem:[%s12435_s0 + %s10649_s22]]   ;;  %s10653_s22 = smov 56  }
  0x6d   :  { %s10987_s4 = sld [smem:[%s12435_s0 + %s10650_s28]]   ;;  %s10654_s28 = smov 57  }
  0x6e   :  { %s10992_s6 = sld [smem:[%s12435_s0 + %s10651_s7]]   ;;  %s10655_s7 = smov 58  }
  0x71   :  { %12526 = sst [smem:[#allocation79_spill]] %s10977_s20 }
  0x72   :  { %12527 = sst [smem:[#allocation80_spill]] %s10982_s27 }
  0x73   :  { %12528 = sst [smem:[#allocation81_spill]] %s10987_s4 }
  0x74   :  { %12529 = sst [smem:[#allocation82_spill]] %s10992_s6 }
  0x75   :  { %s10997_s20 = sld [smem:[%s12435_s0 + %s10652_s15]]   ;;  %s10656_s15 = smov 59  }
  0x76   :  { %s11002_s27 = sld [smem:[%s12435_s0 + %s10653_s22]]   ;;  %s10657_s22 = smov 60  }
  0x77   :  { %s11007_s4 = sld [smem:[%s12435_s0 + %s10654_s28]]   ;;  %s10658_s28 = smov 61  }
  0x78   :  { %s11012_s6 = sld [smem:[%s12435_s0 + %s10655_s7]]   ;;  %s10659_s7 = smov 62  }
  0x79   :  { %s11022_s12 = sld [smem:[%s12435_s0 + %s10657_s22]]   ;;  %s10661_s22 = smov 64  }
  0x7a   :  { %s11032_s14 = sld [smem:[%s12435_s0 + %s10659_s7]]   ;;  %s10663_s7 = smov 66  }
  0x7b   :  { %12530 = sst [smem:[#allocation83_spill]] %s10997_s20 }
  0x7c   :  { %s11017_s20 = sld [smem:[%s12435_s0 + %s10656_s15]]   ;;  %s10660_s15 = smov 63  }
  0x7d   :  { %12531 = sst [smem:[#allocation84_spill]] %s11007_s4 }
  0x7e   :  { %12532 = sst [smem:[#allocation85_spill]] %s11012_s6 }
  0x7f   :  { %s11027_s4 = sld [smem:[%s12435_s0 + %s10658_s28]]   ;;  %s10662_s28 = smov 65  }
  0x80   :  { %12535 = sst [smem:[#allocation88_spill]] %s11032_s14 }
  0x81   :  { %s11042_s30 = sld [smem:[%s12435_s0 + %s10661_s22]]   ;;  %s10665_s22 = smov 68  }
  0x82   :  { %12533 = sst [smem:[#allocation86_spill]] %s11017_s20 }
  0x83   :  { %s11037_s20 = sld [smem:[%s12435_s0 + %s10660_s15]]   ;;  %s10664_s15 = smov 67  }
  0x84   :  { %s11052_s14 = sld [smem:[%s12435_s0 + %s10663_s7]]   ;;  %s10667_s7 = smov 70  }
  0x85   :  { %12534 = sst [smem:[#allocation87_spill]] %s11027_s4 }
  0x86   :  { %s11047_s4 = sld [smem:[%s12435_s0 + %s10662_s28]]   ;;  %s10666_s28 = smov 69  }
  0x87   :  { %12537 = sst [smem:[#allocation90_spill]] %s11042_s30 }
  0x88   :  { %s11062_s30 = sld [smem:[%s12435_s0 + %s10665_s22]]   ;;  %s10669_s22 = smov 72  }
  0x89   :  { %12536 = sst [smem:[#allocation89_spill]] %s11037_s20 }
  0x8a   :  { %s11057_s20 = sld [smem:[%s12435_s0 + %s10664_s15]]   ;;  %s10668_s15 = smov 71  }
  0x8b   :  { %s11072_s19 = sld [smem:[%s12435_s0 + %s10667_s7]]   ;;  %s10671_s7 = smov 74  }
  0x8c   :  { %12538 = sst [smem:[#allocation91_spill]] %s11047_s4 }
  0x8d   :  { %s11067_s4 = sld [smem:[%s12435_s0 + %s10666_s28]]   ;;  %s10670_s28 = smov 73  }
  0x8e   :  { %s11082_s3 = sld [smem:[%s12435_s0 + %s10669_s22]]   ;;  %s10673_s22 = smov 76  }
  0x8f   :  { %s11092_s8 = sld [smem:[%s12435_s0 + %s10671_s7]]   ;;  %s10675_s7 = smov 78  }
  0x90   :  { %12539 = sst [smem:[#allocation92_spill]] %s11057_s20 }
  0x91   :  { %s11077_s20 = sld [smem:[%s12435_s0 + %s10668_s15]]   ;;  %s10672_s15 = smov 75  }
  0x93   :  { %12540 = sst [smem:[#allocation93_spill]] %s11067_s4 }
  0x94   :  { %12542 = sst [smem:[#allocation95_spill]] %s11082_s3 }
  0x95   :  { %s11087_s4 = sld [smem:[%s12435_s0 + %s10670_s28]]   ;;  %s10674_s28 = smov 77  }
  0x96   :  { %12544 = sst [smem:[#allocation97_spill]] %s11092_s8 }
  0x97   :  { %12541 = sst [smem:[#allocation94_spill]] %s11077_s20 }
  0x98   :  { %s11097_s20 = sld [smem:[%s12435_s0 + %s10672_s15]]   ;;  %s10676_s15 = smov 79  }
  0x99   :  { %s11102_s3 = sld [smem:[%s12435_s0 + %s10673_s22]]   ;;  %s10677_s22 = smov 80  }
  0x9a   :  { %s11112_s8 = sld [smem:[%s12435_s0 + %s10675_s7]]  }
  0x9b   :  { %12543 = sst [smem:[#allocation96_spill]] %s11087_s4 }
  0x9c   :  { %s11107_s4 = sld [smem:[%s12435_s0 + %s10674_s28]]   ;;  %s10678_s28 = smov 81  }
  0x9d   :  { %s11117_s25 = sld [smem:[%s12435_s0 + %s10676_s15]]  }
  0x9e   :  { %s11122_s29 = sld [smem:[%s12435_s0 + %s10677_s22]]  }
  0x9f   :  { %12545 = sst [smem:[#allocation98_spill]] %s11102_s3 }
  0xa0   :  { %12547 = sst [smem:[#allocation100_spill]] %s11112_s8 }
  0xa1   :  { %s11127_s13 = sld [smem:[%s12435_s0 + %s10678_s28]]  }
  0xa2   :  { %12546 = sst [smem:[#allocation99_spill]] %s11107_s4 }
  0xa3   :  { %168 = vsyncpa [#allocation5], 0 }
  0xa4   :  { %169 = vsyncpa [#allocation7], 0 }
  0xa5   :  { %170 = vsyncpa [#allocation10], 0 }
  0xa6   :  { %171 = vsyncpa [#allocation13], 0 }
  0xa7   :  { %172 = vsyncpa [#allocation16], 0 }
  0xa8   :  { %173 = vsyncpa [#allocation19], 0 }
  0xa9   :  { %174 = vsyncpa [#allocation22], 0  ;;  %s11129_s7 = smov 0  }
  0xaa LB: > { %s12548_s9 = sld [smem:[#allocation32_spill]]  ;;  %s12549_s8 = sld [smem:[#allocation100_spill]]  ;;  %s10436_s7 = sphi %s11129_s7, %s180_s7  }
  0xab   : > { %s12550_s6 = sld [smem:[#allocation85_spill]]  ;;  %s12551_s4 = sld [smem:[#allocation99_spill]] }
  0xac   : > { %s12552_s3 = sld [smem:[#allocation98_spill]]  ;;  %s10679_s10 = smov [#allocation6]  }
  0xad   : > { %s2103_s0 = sshll.u32 %s10679_s10, 4  ;;  %s11135_s11 = sadd.s32 4294967295, %s10436_s7   ;;  %s11140_s0 = int_to_ptr.vmem [resolvable:$true] %s2103_s0 }
  0xae   : > { %p8164_p0 = scmp.ge.s32.totalorder %s10436_s7, 1  ;;  %p1917_p1 = scmp.lt.s32.totalorder %s10436_s7, 3 }
  0xaf   : > { %p12456_p2 = scmp.eq.s32.totalorder %s11135_s11, 0  ;;  %s10680_s16 = smov [#allocation9]  }
  0xb0   : > { %p11142_p3 = pnand %p8164_p0, %p1917_p1  ;;  %s2131_s18 = sshll.u32 %s10680_s16, 4  ;;  %s11148_s18 = int_to_ptr.vmem [resolvable:$true] %s2131_s18 }
  0xb1   : > { %s10681_s22 = smov [#allocation12]   ;;  %s10682_s28 = smov [#allocation15]  }
  0xb2   : > { %s12553_s15 = scalar_select %p11142_p3, 1, 0 }
  0xb3   : > { %p9351_p4 = pneg %p11142_p3  ;;  %s2171_s23 = sshll.u32 %s10681_s22, 4  ;;  %s11156_s23 = int_to_ptr.vmem [resolvable:$true] %s2171_s23 }
  0xb4   : > { %s2208_s1 = sshll.u32 %s10682_s28, 4  ;;  %s9878_s2 = scalar_lea.hbm %s11002_s27, 16  ;;  %s11158_s1 = int_to_ptr.vmem [resolvable:$true] %s2208_s1 }
  0xb5   : > { %p11152_p5 = pnand %p12456_p2, %p9351_p4  ;;  %p9879_p6 = scmp.ne.s32.totalorder %s11002_s27, %s9878_s2 }
  0xb6   : > { %p9885_p10 = scmp.lt.u32.totalorder %s9878_s2, %s11002_s27 }
  0xb7   : > { %p11164_p7 = pneg %p11152_p5 }
  0xb9   : > { %p9881_p8 = pnand %p11164_p7, %p9879_p6 }
  0xbb   : > { %p9882_p9 = pneg %p9881_p8 }
  0xbd   : > { %p9887_p11 = pnand %p9885_p10, %p9882_p9 }
  0xbf   : > { %9890 = shalt.err (!%p9887_p11)
}
  0xc0   : > { %s9891_s16 = scalar_lea.vmem %s11140_s0, 16  ;;  %s9898_s22 = scalar_lea.vmem %s11140_s0, 32 }
  0xc1   : > { %p9892_p12 = scmp.ne.s32.totalorder %s11140_s0, %s9891_s16  ;;  %p9899_p1 = scmp.lt.s32.totalorder %s11140_s0, %s11140_s0 }
  0xc2   : > { %p9900_p4 = scmp.lt.s32.totalorder %s9898_s22, %s9891_s16 }
  0xc3   : > { %p9894_p13 = pnand %p9892_p12, %p11164_p7 }
  0xc4   : > { %p9901_p2 = por %p9900_p4, %p9899_p1 }
  0xc5   : > { %p9895_p0 = pneg %p9894_p13 }
  0xc7   : > { %p9902_p6 = pnand %p9901_p2, %p9895_p0 }
  0xc9   : > { %9905 = shalt.err (!%p9902_p6)
}
  0xca   : > { %9357 = dma.hbm_to_vmem [thread:$0]  (!%p11152_p5), %s11002_s27, 16, %s11140_s0, [#allocation7]  }
  0xcb   : > { %s9906_s28 = scalar_lea.hbm %s11022_s12, 16 }
  0xcc   : > { %p9907_p8 = scmp.ne.s32.totalorder %s11022_s12, %s9906_s28  ;;  %p9913_p11 = scmp.lt.u32.totalorder %s9906_s28, %s11022_s12 }
  0xce   : > { %p9909_p9 = pnand %p9907_p8, %p11164_p7 }
  0xd0   : > { %p9910_p10 = pneg %p9909_p9 }
  0xd2   : > { %p9915_p12 = pnand %p9913_p11, %p9910_p10 }
  0xd4   : > { %9918 = shalt.err (!%p9915_p12)
}
  0xd5   : > { %s9919_s2 = scalar_lea.vmem %s11148_s18, 16  ;;  %s9926_s16 = scalar_lea.vmem %s11148_s18, 32 }
  0xd6   : > { %p9920_p2 = scmp.ne.s32.totalorder %s11148_s18, %s9919_s2  ;;  %p9927_p1 = scmp.lt.s32.totalorder %s11148_s18, %s11148_s18 }
  0xd7   : > { %p9928_p4 = scmp.lt.s32.totalorder %s9926_s16, %s9919_s2 }
  0xd8   : > { %p9922_p13 = pnand %p9920_p2, %p11164_p7 }
  0xd9   : > { %p9929_p6 = por %p9928_p4, %p9927_p1 }
  0xda   : > { %p9923_p0 = pneg %p9922_p13 }
  0xdc   : > { %p9930_p8 = pnand %p9929_p6, %p9923_p0 }
  0xde   : > { %9933 = shalt.err (!%p9930_p8)
}
  0xdf   : > { %9363 = dma.hbm_to_vmem [thread:$0]  (!%p11152_p5), %s11022_s12, 16, %s11148_s18, [#allocation10]  }
  0xe0   : > { %s9934_s0 = scalar_lea.hbm %s11062_s30, 16 }
  0xe1   : > { %p9935_p9 = scmp.ne.s32.totalorder %s11062_s30, %s9934_s0  ;;  %p9941_p12 = scmp.lt.u32.totalorder %s9934_s0, %s11062_s30 }
  0xe3   : > { %p9937_p10 = pnand %p9935_p9, %p11164_p7 }
  0xe5   : > { %p9938_p11 = pneg %p9937_p10 }
  0xe7   : > { %p9943_p2 = pnand %p9941_p12, %p9938_p11 }
  0xe9   : > { %9946 = shalt.err (!%p9943_p2)
}
  0xea   : > { %s9947_s22 = scalar_lea.vmem %s11156_s23, 16  ;;  %s9954_s28 = scalar_lea.vmem %s11156_s23, 32 }
  0xeb   : > { %p9948_p13 = scmp.ne.s32.totalorder %s11156_s23, %s9947_s22  ;;  %p9955_p4 = scmp.lt.s32.totalorder %s11156_s23, %s11156_s23 }
  0xec   : > { %p9956_p6 = scmp.lt.s32.totalorder %s9954_s28, %s9947_s22 }
  0xed   : > { %p9950_p0 = pnand %p9948_p13, %p11164_p7 }
  0xee   : > { %p9957_p8 = por %p9956_p6, %p9955_p4 }
  0xef   : > { %p9951_p1 = pneg %p9950_p0 }
  0xf1   : > { %p9958_p9 = pnand %p9957_p8, %p9951_p1 }
  0xf3   : > { %9961 = shalt.err (!%p9958_p9)
}
  0xf4   : > { %9369 = dma.hbm_to_vmem [thread:$0]  (!%p11152_p5), %s11062_s30, 16, %s11156_s23, [#allocation13]  }
  0xf5   : > { %s9962_s18 = scalar_lea.hbm %s11097_s20, 128 }
  0xf6   : > { %p9963_p10 = scmp.ne.s32.totalorder %s11097_s20, %s9962_s18  ;;  %p9969_p2 = scmp.lt.u32.totalorder %s9962_s18, %s11097_s20 }
  0xf8   : > { %p9965_p11 = pnand %p9963_p10, %p11164_p7 }
  0xfa   : > { %p9966_p12 = pneg %p9965_p11 }
  0xfc   : > { %p9971_p13 = pnand %p9969_p2, %p9966_p12 }
  0xfe   : > { %9974 = shalt.err (!%p9971_p13)
}
  0xff   : > { %s9975_s2 = scalar_lea.vmem %s11158_s1, 128  ;;  %p9983_p6 = scmp.lt.s32.totalorder %s11158_s1, %s11158_s1 }
 0x100   : > { %p9976_p0 = scmp.ne.s32.totalorder %s11158_s1, %s9975_s2  ;;  %p9984_p8 = scmp.lt.s32.totalorder %s9975_s2, %s9975_s2 }
 0x102   : > { %p9978_p1 = pnand %p9976_p0, %p11164_p7  ;;  %p9985_p9 = por %p9984_p8, %p9983_p6 }
 0x104   : > { %p9979_p4 = pneg %p9978_p1 }
 0x106   : > { %p9986_p3 = pnand %p9985_p9, %p9979_p4 }
 0x108   : > { %9989 = shalt.err (!%p9986_p3)
}
 0x109   : > { %9375 = dma.hbm_to_vmem [thread:$0]  (!%p11152_p5), %s11097_s20, 128, %s11158_s1, [#allocation16]  }
 0x10a   : > { %s10683_s23 = smov [#allocation18]   ;;  %s10684_s0 = smov [#allocation21]  }
 0x10b   : > { %s2230_s16 = sshll.u32 %s10683_s23, 4  ;;  %s2252_s22 = sshll.u32 %s10684_s0, 4  ;;  %s2231_s16 = int_to_ptr.vmem [resolvable:$true] %s2230_s16  ;;  %s2253_s22 = int_to_ptr.vmem [resolvable:$true] %s2252_s22 }
 0x10c   : > { %s9990_s28 = scalar_lea.hbm %s12551_s4, 128 }
 0x10d   : > { %p9991_p10 = scmp.ne.s32.totalorder %s12551_s4, %s9990_s28  ;;  %p9997_p3 = scmp.lt.u32.totalorder %s9990_s28, %s12551_s4 }
 0x10f   : > { %p9993_p11 = pnand %p9991_p10, %p11164_p7 }
 0x111   : > { %p9994_p12 = pneg %p9993_p11 }
 0x113   : > { %p9999_p2 = pnand %p9997_p3, %p9994_p12 }
 0x115   : > { %10002 = shalt.err (!%p9999_p2)
}
 0x116   : > { %s10003_s18 = scalar_lea.vmem %s2231_s16, 128  ;;  %p10011_p4 = scmp.lt.s32.totalorder %s2231_s16, %s2231_s16 }
 0x117   : > { %p10004_p13 = scmp.ne.s32.totalorder %s2231_s16, %s10003_s18  ;;  %p10012_p6 = scmp.lt.s32.totalorder %s10003_s18, %s10003_s18 }
 0x119   : > { %p10006_p0 = pnand %p10004_p13, %p11164_p7  ;;  %p10013_p8 = por %p10012_p6, %p10011_p4 }
 0x11b   : > { %p10007_p1 = pneg %p10006_p0 }
 0x11d   : > { %p10014_p9 = pnand %p10013_p8, %p10007_p1 }
 0x11f   : > { %10017 = shalt.err (!%p10014_p9)
}
 0x120   : > { %9381 = dma.hbm_to_vmem [thread:$0]  (!%p11152_p5), %s12551_s4, 128, %s2231_s16, [#allocation19]  }
 0x121   : > { %s10018_s1 = scalar_lea.hbm %s11117_s25, 128 }
 0x122   : > { %p10019_p10 = scmp.ne.s32.totalorder %s11117_s25, %s10018_s1  ;;  %p10025_p3 = scmp.lt.u32.totalorder %s10018_s1, %s11117_s25 }
 0x124   : > { %p10021_p11 = pnand %p10019_p10, %p11164_p7 }
 0x126   : > { %p10022_p12 = pneg %p10021_p11 }
 0x128   : > { %p10027_p2 = pnand %p10025_p3, %p10022_p12 }
 0x12a   : > { %10030 = shalt.err (!%p10027_p2)
}
 0x12b   : > { %s10031_s2 = scalar_lea.vmem %s2253_s22, 128  ;;  %p10039_p4 = scmp.lt.s32.totalorder %s2253_s22, %s2253_s22 }
 0x12c   : > { %p10032_p13 = scmp.ne.s32.totalorder %s2253_s22, %s10031_s2  ;;  %p10040_p6 = scmp.lt.s32.totalorder %s10031_s2, %s10031_s2 }
 0x12e   : > { %p10034_p0 = pnand %p10032_p13, %p11164_p7  ;;  %p10041_p8 = por %p10040_p6, %p10039_p4 }
 0x130   : > { %p10035_p1 = pneg %p10034_p0 }
 0x132   : > { %p10042_p9 = pnand %p10041_p8, %p10035_p1 }
 0x134   : > { %10045 = shalt.err (!%p10042_p9)
}
 0x135   : > { %9387 = dma.hbm_to_vmem [thread:$0]  (!%p11152_p5), %s11117_s25, 128, %s2253_s22, [#allocation22]  }
 0x136   : > { %s10685_s23 = smov [#allocation4]   ;;  %s10686_s0 = smov [#allocation8]  }
 0x137   : > { %s2077_s16 = sshll.u32 %s10685_s23, 4  ;;  %s2117_s28 = sshll.u32 %s10686_s0, 4  ;;  %s2078_s16 = int_to_ptr.vmem [resolvable:$true] %s2077_s16  ;;  %s2118_s28 = int_to_ptr.vmem [resolvable:$true] %s2117_s28 }
 0x138   : > { %s10046_s18 = scalar_lea.hbm %s10972_s24, 16 }
 0x139   : > { %p10047_p10 = scmp.ne.s32.totalorder %s10972_s24, %s10046_s18  ;;  %p10053_p3 = scmp.lt.u32.totalorder %s10046_s18, %s10972_s24 }
 0x13b   : > { %p10049_p11 = pnand %p10047_p10, %p11164_p7 }
 0x13d   : > { %p10050_p12 = pneg %p10049_p11 }
 0x13f   : > { %p10055_p2 = pnand %p10053_p3, %p10050_p12 }
 0x141   : > { %10058 = shalt.err (!%p10055_p2)
}
 0x142   : > { %s10059_s1 = scalar_lea.vmem %s2078_s16, 16  ;;  %s10066_s22 = scalar_lea.vmem %s2078_s16, 32 }
 0x143   : > { %p10060_p13 = scmp.ne.s32.totalorder %s2078_s16, %s10059_s1  ;;  %p10067_p4 = scmp.lt.s32.totalorder %s2078_s16, %s2078_s16 }
 0x144   : > { %p10068_p6 = scmp.lt.s32.totalorder %s10066_s22, %s10059_s1 }
 0x145   : > { %p10062_p0 = pnand %p10060_p13, %p11164_p7 }
 0x146   : > { %p10069_p8 = por %p10068_p6, %p10067_p4 }
 0x147   : > { %p10063_p1 = pneg %p10062_p0 }
 0x149   : > { %p10070_p9 = pnand %p10069_p8, %p10063_p1 }
 0x14b   : > { %10073 = shalt.err (!%p10070_p9)
}
 0x14c   : > { %9354 = dma.hbm_to_vmem [thread:$0]  (!%p11152_p5), %s10972_s24, 16, %s2078_s16, [#allocation5]  }
 0x14d   : > { %s10074_s2 = scalar_lea.hbm %s12550_s6, 16 }
 0x14e   : > { %p10075_p10 = scmp.ne.s32.totalorder %s12550_s6, %s10074_s2  ;;  %p10081_p3 = scmp.lt.u32.totalorder %s10074_s2, %s12550_s6 }
 0x150   : > { %p10077_p11 = pnand %p10075_p10, %p11164_p7 }
 0x152   : > { %p10078_p12 = pneg %p10077_p11 }
 0x154   : > { %p10083_p2 = pnand %p10081_p3, %p10078_p12 }
 0x156   : > { %10086 = shalt.err (!%p10083_p2)
}
 0x157   : > { %s10087_s23 = scalar_lea.vmem %s2118_s28, 16  ;;  %s10094_s0 = scalar_lea.vmem %s2118_s28, 32 }
 0x158   : > { %p10088_p13 = scmp.ne.s32.totalorder %s2118_s28, %s10087_s23  ;;  %p10095_p4 = scmp.lt.s32.totalorder %s2118_s28, %s2118_s28 }
 0x159   : > { %p10096_p6 = scmp.lt.s32.totalorder %s10094_s0, %s10087_s23 }
 0x15a   : > { %p10090_p0 = pnand %p10088_p13, %p11164_p7 }
 0x15b   : > { %p10097_p8 = por %p10096_p6, %p10095_p4 }
 0x15c   : > { %p10091_p1 = pneg %p10090_p0 }
 0x15e   : > { %p10098_p9 = pnand %p10097_p8, %p10091_p1 }
 0x160   : > { %10101 = shalt.err (!%p10098_p9)
}
 0x161   : > { %9360 = dma.hbm_to_vmem [thread:$0]  (!%p11152_p5), %s12550_s6, 16, %s2118_s28, [#allocation7]  }
 0x162   : > { %s10687_s16 = smov [#allocation11]   ;;  %s10688_s1 = smov [#allocation14]  }
 0x163   : > { %s2157_s18 = sshll.u32 %s10687_s16, 4  ;;  %s2185_s22 = sshll.u32 %s10688_s1, 4  ;;  %s2158_s18 = int_to_ptr.vmem [resolvable:$true] %s2157_s18  ;;  %s2186_s22 = int_to_ptr.vmem [resolvable:$true] %s2185_s22 }
 0x164   : > { %s10102_s2 = scalar_lea.hbm %s11052_s14, 16 }
 0x165   : > { %p10103_p10 = scmp.ne.s32.totalorder %s11052_s14, %s10102_s2  ;;  %p10109_p3 = scmp.lt.u32.totalorder %s10102_s2, %s11052_s14 }
 0x167   : > { %p10105_p11 = pnand %p10103_p10, %p11164_p7 }
 0x169   : > { %p10106_p12 = pneg %p10105_p11 }
 0x16b   : > { %p10111_p2 = pnand %p10109_p3, %p10106_p12 }
 0x16d   : > { %10114 = shalt.err (!%p10111_p2)
}
 0x16e   : > { %s10115_s23 = scalar_lea.vmem %s2158_s18, 16  ;;  %s10122_s28 = scalar_lea.vmem %s2158_s18, 32 }
 0x16f   : > { %p10116_p13 = scmp.ne.s32.totalorder %s2158_s18, %s10115_s23  ;;  %p10123_p4 = scmp.lt.s32.totalorder %s2158_s18, %s2158_s18 }
 0x170   : > { %p10124_p6 = scmp.lt.s32.totalorder %s10122_s28, %s10115_s23 }
 0x171   : > { %p10118_p0 = pnand %p10116_p13, %p11164_p7 }
 0x172   : > { %p10125_p8 = por %p10124_p6, %p10123_p4 }
 0x173   : > { %p10119_p1 = pneg %p10118_p0 }
 0x175   : > { %p10126_p9 = pnand %p10125_p8, %p10119_p1 }
 0x177   : > { %10129 = shalt.err (!%p10126_p9)
}
 0x178   : > { %9366 = dma.hbm_to_vmem [thread:$0]  (!%p11152_p5), %s11052_s14, 16, %s2158_s18, [#allocation10]  }
 0x179   : > { %s10130_s0 = scalar_lea.hbm %s11072_s19, 16 }
 0x17a   : > { %p10131_p10 = scmp.ne.s32.totalorder %s11072_s19, %s10130_s0  ;;  %p10137_p3 = scmp.lt.u32.totalorder %s10130_s0, %s11072_s19 }
 0x17c   : > { %p10133_p11 = pnand %p10131_p10, %p11164_p7 }
 0x17e   : > { %p10134_p12 = pneg %p10133_p11 }
 0x180   : > { %p10139_p2 = pnand %p10137_p3, %p10134_p12 }
 0x182   : > { %10142 = shalt.err (!%p10139_p2)
}
 0x183   : > { %s10143_s16 = scalar_lea.vmem %s2186_s22, 16  ;;  %s10150_s1 = scalar_lea.vmem %s2186_s22, 32 }
 0x184   : > { %p10144_p13 = scmp.ne.s32.totalorder %s2186_s22, %s10143_s16  ;;  %p10151_p4 = scmp.lt.s32.totalorder %s2186_s22, %s2186_s22 }
 0x185   : > { %p10152_p6 = scmp.lt.s32.totalorder %s10150_s1, %s10143_s16 }
 0x186   : > { %p10146_p0 = pnand %p10144_p13, %p11164_p7 }
 0x187   : > { %p10153_p8 = por %p10152_p6, %p10151_p4 }
 0x188   : > { %p10147_p1 = pneg %p10146_p0 }
 0x18a   : > { %p10154_p9 = pnand %p10153_p8, %p10147_p1 }
 0x18c   : > { %10157 = shalt.err (!%p10154_p9)
}
 0x18d   : > { %9372 = dma.hbm_to_vmem [thread:$0]  (!%p11152_p5), %s11072_s19, 16, %s2186_s22, [#allocation13]  }
 0x18e   : > { %s10689_s18 = smov [#allocation17]   ;;  %s10690_s23 = smov [#allocation20]  }
 0x18f   : > { %s2219_s2 = sshll.u32 %s10689_s18, 4  ;;  %s2241_s28 = sshll.u32 %s10690_s23, 4  ;;  %s2220_s2 = int_to_ptr.vmem [resolvable:$true] %s2219_s2  ;;  %s2242_s28 = int_to_ptr.vmem [resolvable:$true] %s2241_s28 }
 0x190   : > { %s10158_s0 = scalar_lea.hbm %s12552_s3, 16 }
 0x191   : > { %p10159_p10 = scmp.ne.s32.totalorder %s12552_s3, %s10158_s0  ;;  %p10165_p3 = scmp.lt.u32.totalorder %s10158_s0, %s12552_s3 }
 0x193   : > { %p10161_p11 = pnand %p10159_p10, %p11164_p7 }
 0x195   : > { %p10162_p12 = pneg %p10161_p11 }
 0x197   : > { %p10167_p2 = pnand %p10165_p3, %p10162_p12 }
 0x199   : > { %10170 = shalt.err (!%p10167_p2)
}
 0x19a   : > { %s10171_s16 = scalar_lea.vmem %s2220_s2, 16  ;;  %s10178_s22 = scalar_lea.vmem %s2220_s2, 32 }
 0x19b   : > { %p10172_p13 = scmp.ne.s32.totalorder %s2220_s2, %s10171_s16  ;;  %p10179_p4 = scmp.lt.s32.totalorder %s2220_s2, %s2220_s2 }
 0x19c   : > { %p10180_p6 = scmp.lt.s32.totalorder %s10178_s22, %s10171_s16 }
 0x19d   : > { %p10174_p0 = pnand %p10172_p13, %p11164_p7 }
 0x19e   : > { %p10181_p8 = por %p10180_p6, %p10179_p4 }
 0x19f   : > { %p10175_p1 = pneg %p10174_p0 }
 0x1a1   : > { %p10182_p9 = pnand %p10181_p8, %p10175_p1 }
 0x1a3   : > { %10185 = shalt.err (!%p10182_p9)
}
 0x1a4   : > { %9378 = dma.hbm_to_vmem [thread:$0]  (!%p11152_p5), %s12552_s3, 16, %s2220_s2, [#allocation16]  }
 0x1a5   : > { %s10186_s1 = scalar_lea.hbm %s12549_s8, 16 }
 0x1a6   : > { %p10187_p10 = scmp.ne.s32.totalorder %s12549_s8, %s10186_s1  ;;  %p10193_p3 = scmp.lt.u32.totalorder %s10186_s1, %s12549_s8 }
 0x1a8   : > { %p10189_p11 = pnand %p10187_p10, %p11164_p7 }
 0x1aa   : > { %p10190_p12 = pneg %p10189_p11 }
 0x1ac   : > { %p10195_p2 = pnand %p10193_p3, %p10190_p12 }
 0x1ae   : > { %10198 = shalt.err (!%p10195_p2)
}
 0x1af   : > { %s10199_s18 = scalar_lea.vmem %s2242_s28, 16  ;;  %s10206_s23 = scalar_lea.vmem %s2242_s28, 32 }
 0x1b0   : > { %p10200_p13 = scmp.ne.s32.totalorder %s2242_s28, %s10199_s18  ;;  %p10207_p4 = scmp.lt.s32.totalorder %s2242_s28, %s2242_s28 }
 0x1b1   : > { %p10208_p6 = scmp.lt.s32.totalorder %s10206_s23, %s10199_s18 }
 0x1b2   : > { %p10202_p0 = pnand %p10200_p13, %p11164_p7 }
 0x1b3   : > { %p10209_p8 = por %p10208_p6, %p10207_p4 }
 0x1b4   : > { %p10203_p1 = pneg %p10202_p0 }
 0x1b6   : > { %p10210_p9 = pnand %p10209_p8, %p10203_p1 }
 0x1b8   : > { %10213 = shalt.err (!%p10210_p9)
}
 0x1b9   : > { %9384 = dma.hbm_to_vmem [thread:$0]  (!%p11152_p5), %s12549_s8, 16, %s2242_s28, [#allocation19]  }
 0x1ba   : > { %s10691_s2 = smov [#allocation23]   ;;  %s10214_s16 = scalar_lea.hbm %s11122_s29, 16 }
 0x1bb   : > { %s2263_s0 = sshll.u32 %s10691_s2, 4  ;;  %p10215_p10 = scmp.ne.s32.totalorder %s11122_s29, %s10214_s16  ;;  %s2264_s0 = int_to_ptr.vmem [resolvable:$true] %s2263_s0 }
 0x1bc   : > { %p10221_p3 = scmp.lt.u32.totalorder %s10214_s16, %s11122_s29 }
 0x1bd   : > { %p10217_p11 = pnand %p10215_p10, %p11164_p7 }
 0x1bf   : > { %p10218_p12 = pneg %p10217_p11 }
 0x1c1   : > { %p10223_p2 = pnand %p10221_p3, %p10218_p12 }
 0x1c3   : > { %10226 = shalt.err (!%p10223_p2)
}
 0x1c4   : > { %s10227_s22 = scalar_lea.vmem %s2264_s0, 16  ;;  %s10234_s1 = scalar_lea.vmem %s2264_s0, 32 }
 0x1c5   : > { %p10228_p13 = scmp.ne.s32.totalorder %s2264_s0, %s10227_s22  ;;  %p10235_p4 = scmp.lt.s32.totalorder %s2264_s0, %s2264_s0 }
 0x1c6   : > { %p10236_p6 = scmp.lt.s32.totalorder %s10234_s1, %s10227_s22 }
 0x1c7   : > { %p10230_p0 = pnand %p10228_p13, %p11164_p7 }
 0x1c8   : > { %p10237_p8 = por %p10236_p6, %p10235_p4 }
 0x1c9   : > { %p10231_p1 = pneg %p10230_p0 }
 0x1cb   : > { %p10238_p9 = pnand %p10237_p8, %p10231_p1 }
 0x1cd   : > { %10241 = shalt.err (!%p10238_p9)
}
 0x1ce   : > { %9390 = dma.hbm_to_vmem [thread:$0]  (!%p11152_p5), %s11122_s29, 16, %s2264_s0, [#allocation22]  }
 0x1cf   : > { %p12556_p10 = scmp.ne.s32.totalorder %s12553_s15, 0 }
 0x1d0   : > { %p12557_p11 = scmp.eq.s32.totalorder (!%p12556_p10), %s11135_s11, 0 }
 0x1d1   : > { %2286 = sbr.rel (%p12556_p10) target bundleno = 8124 (0x1fbc), region = 344 }
 0x1d8   : > { %10407 = dma.done.wait (%p12557_p11), [#allocation5], 16   ;;  %p12558_p12 = pmov %p12557_p11 }
 0x1d9   : > { %p12559_p7 = pmov %p12557_p11 }
 0x1da   : > { %10409 = vsyncadd (%p12558_p12), [#allocation5], 4294967280 }
 0x1db   : > { %10411 = dma.done.wait (%p12559_p7), [#allocation7], 32   ;;  %p12560_p3 = pmov %p12559_p7 }
 0x1dd   : > { %10413 = vsyncadd (%p12560_p3), [#allocation7], 4294967264  ;;  %p12561_p2 = pmov %p12560_p3 }
 0x1df   : > { %10415 = dma.done.wait (%p12561_p2), [#allocation10], 32   ;;  %p12562_p5 = pmov %p12561_p2 }
 0x1e0   : > { %p12563_p13 = pmov %p12561_p2 }
 0x1e1   : > { %10417 = vsyncadd (%p12562_p5), [#allocation10], 4294967264 }
 0x1e2   : > { %10419 = dma.done.wait (%p12563_p13), [#allocation13], 32   ;;  %p12564_p0 = pmov %p12561_p2 }
 0x1e4   : > { %10421 = vsyncadd (%p12564_p0), [#allocation13], 4294967264  ;;  %p12565_p1 = pmov %p12564_p0 }
 0x1e5   : > { %p12566_p4 = pmov %p12564_p0 }
 0x1e6   : > { %10423 = dma.done.wait (%p12565_p1), [#allocation16], 144  }
 0x1e7   : > { %10425 = vsyncadd (%p12566_p4), [#allocation16], 4294967152  ;;  %p12567_p6 = pmov %p12564_p0 }
 0x1e8   : > { %p12568_p8 = pmov %p12564_p0 }
 0x1e9   : > { %10427 = dma.done.wait (%p12567_p6), [#allocation19], 144  }
 0x1ea   : > { %10429 = vsyncadd (%p12568_p8), [#allocation19], 4294967152  ;;  %p12569_p9 = pmov %p12564_p0 }
 0x1eb   : > { %p12570_p10 = pmov %p12564_p0 }
 0x1ec   : > { %10431 = dma.done.wait (%p12569_p9), [#allocation22], 144  }
 0x1ed   : > { %10433 = vsyncadd (%p12570_p10), [#allocation22], 4294967152  ;;  %s12571_s5 = sld [smem:[#allocation31_spill]]  ;;  %p2521_p11 = scmp.lt.s32.totalorder %s11135_s11, 1  ;;  %vm2560_vm0 = vcmask 261120   ;;  %v2525_v0 = vld [vmem:[%s12548_s9] sm:$0xff] }
 0x1ee   : > { %s8193_s15 = sshll.u32 %s11135_s11, 2  ;;  %v2526_v1 = vld [vmem:[%s12548_s9 + $0x8] sm:$0xff]  ;;  %v2527_v2 = vld [vmem:[%s12548_s9 + $0x10] sm:$0xff]  ;;  %v2528_v4 = vld [vmem:[%s12548_s9 + $0x18] sm:$0xff]  ;;  %vm2738_vm1 = vcmask 490496   ;;  %v10692_v41 = vmov 0  }
 0x1ef   : > { %p2515_p12 = scmp.lt.s32.totalorder %s8193_s15, 7  ;;  %s12677_s11 = smov (!%p2521_p11, %s11135_s11), 1  ;;  %v8922_v3 = vpack.c.bf16 %v2526_v1, %v2525_v0  ;;  %v8926_v6 = vpack.c.bf16 %v2528_v4, %v2527_v2  ;;  %v11427_v38 = vld [vmem:[%s10737_s17] sm:$0xff]  ;;  %v2540_v40 = vld [vmem:[%s10742_s21 + $0x10] sm:$0xff]  ;;  %9861 = vset.pattern.permute.xlu0 %v10692_v41  ;;  %9862 = vset.pattern.permute.xlu1 %v10692_v41  ;;  %v2539_v42 = vld [vmem:[%s10742_s21 + $0x8] sm:$0xff]  ;;  %vm2763_vm2 = vcmask 1043456  }
 0x1f0   : > { %s8196_s26 = sshll.u32 %s12677_s11, 2  ;;  %8608 = vmatprep.mubr.msk.f32.mxu1 %vm2738_vm1, %v11427_v38  ;;  %v2538_v39 = vld [vmem:[%s10742_s21] sm:$0xff]  ;;  %s12572_s11 = sld [smem:[#allocation33_spill]]  ;;  %2710 = vperm.xlu1 %9862, %v2540_v40   ;;  %v2541_v43 = vld [vmem:[%s10742_s21 + $0x18] sm:$0xff]  ;;  %v2543_v44 = vld [vmem:[%s10742_s21 + $0x28] sm:$0xff]  ;;  %vm10693_vm3 = vmmov 1  }
 0x1f1   : > { %s12679_s15 = smov (!%p2515_p12, %s8193_s15), 7  ;;  %s11353_s10 = scalar_lea.vmem %s11127_s13, %s8196_s26  ;;  %8923 = vmatprep.subr.bf16.mxu0 %v8922_v3  ;;  %2700 = vperm.xlu0 %9861, %v2538_v39   ;;  %v2542_v45 = vld [vmem:[%s10742_s21 + $0x20] sm:$0xff]  ;;  %v2545_v46 = vld [vmem:[%s10742_s21 + $0x38] sm:$0xff]  ;;  %v2544_v47 = vld [vmem:[%s10742_s21 + $0x30] sm:$0xff]  ;;  %vm2880_vm5 = vcmask 523264   ;;  %vm3183_vm6 = vcmask 1048064  }
 0x1f2   : > { %s8389_s28 = sshll.u32 %s12679_s15, 6  ;;  %8925 = vmatpush3.bf16.msra.mxu0 %v8922_v3  ;;  %vm11455_vm4 = vmpackc.low %vm2763_vm2, %vm10693_vm3  ;;  %s12458_s23 = smov 64  }
 0x1f3   : > { %s11356_s18 = scalar_lea.vmem %s12571_s5, %s8389_s28  ;;  %8927 = vmatprep.subr.bf16.mxu0 %v8926_v6  ;;  %s11711_s2 = smov 0  }
 0x1f4   : > { %v2546_v5 = vld [vmem:[%s11356_s18] sm:$0xff]  ;;  %v2547_v7 = vld [vmem:[%s11356_s18 + $0x8] sm:$0xff]  ;;  %v2548_v8 = vld [vmem:[%s11356_s18 + $0x10] sm:$0xff]  ;;  %2715 = vperm.xlu1 %9862, %v2541_v43  }
 0x1f5   : > { %8580 = vmatprep.mubr.msk.f32.mxu0 %vm2560_vm0, %v2546_v5  ;;  %v2549_v9 = vld [vmem:[%s11356_s18 + $0x18] sm:$0xff]  ;;  %v2550_v10 = vld [vmem:[%s11356_s18 + $0x20] sm:$0xff]  ;;  %v2551_v11 = vld [vmem:[%s11356_s18 + $0x28] sm:$0xff]  ;;  %2705 = vperm.xlu0 %9861, %v2539_v42  }
 0x1f6   : > { %8929 = vmatpush3.bf16.msra.mxu0 %v8926_v6  ;;  %v2552_v12 = vld [vmem:[%s11356_s18 + $0x30] sm:$0xff]  ;;  %v2553_v13 = vld [vmem:[%s11356_s18 + $0x38] sm:$0xf]  ;;  %v8215_v14 = vld [vmem:[%s11356_s18 + $0x40] sm:$0xff] }
 0x1f7   : > { %8949 = vmatprep.subr.bf16.mxu0 %v8922_v3  ;;  %v8216_v15 = vld [vmem:[%s11356_s18 + $0x48] sm:$0xff]  ;;  %v8217_v16 = vld [vmem:[%s11356_s18 + $0x50] sm:$0xff]  ;;  %v8218_v17 = vld [vmem:[%s11356_s18 + $0x58] sm:$0xff] }
 0x1f8   : > { %v8219_v18 = vld [vmem:[%s11356_s18 + $0x60] sm:$0xff]  ;;  %v8220_v19 = vld [vmem:[%s11356_s18 + $0x68] sm:$0xff]  ;;  %v8221_v20 = vld [vmem:[%s11356_s18 + $0x70] sm:$0xff]  ;;  %2725 = vperm.xlu1 %9862, %v2543_v44  }
 0x1f9   : > { %8581 = vmatmul.mubr.msk.f32.vlgmr.msra.gmra.mrb[0].mxu0 %vm2560_vm0, %v2547_v7  ;;  %v8222_v21 = vld [vmem:[%s11356_s18 + $0x78] sm:$0xf]  ;;  %v8240_v22 = vld [vmem:[%s11356_s18 + $0x80] sm:$0xff]  ;;  %v8241_v23 = vld [vmem:[%s11356_s18 + $0x88] sm:$0xff]  ;;  %2720 = vperm.xlu0 %9861, %v2542_v45  }
 0x1fa   : > { %8951 = vmatpush3.bf16.msra.mxu0 %v8922_v3  ;;  %8583 = vmatprep.mubr.msk.f32.mxu0 %vm2560_vm0, %v2548_v8  ;;  %v8242_v24 = vld [vmem:[%s11356_s18 + $0x90] sm:$0xff]  ;;  %v8243_v25 = vld [vmem:[%s11356_s18 + $0x98] sm:$0xff]  ;;  %v8244_v26 = vld [vmem:[%s11356_s18 + $0xa0] sm:$0xff] }
 0x1fb   : > { %8953 = vmatprep.subr.bf16.mxu0 %v8926_v6  ;;  %v8245_v27 = vld [vmem:[%s11356_s18 + $0xa8] sm:$0xff]  ;;  %v8246_v28 = vld [vmem:[%s11356_s18 + $0xb0] sm:$0xff]  ;;  %v8247_v29 = vld [vmem:[%s11356_s18 + $0xb8] sm:$0xf] }
 0x1fc   : > { %v8265_v30 = vld [vmem:[%s11356_s18 + $0xc0] sm:$0xff]  ;;  %v8266_v31 = vld [vmem:[%s11356_s18 + $0xc8] sm:$0xff]  ;;  %v8267_v32 = vld [vmem:[%s11356_s18 + $0xd0] sm:$0xff]  ;;  %2735 = vperm.xlu1 %9862, %v2545_v46  }
 0x1fd   : > { %8584 = vmatmul.mubr.msk.f32.gmra.mrb[2].mxu0 %vm2560_vm0, %v2549_v9  ;;  %v8268_v33 = vld [vmem:[%s11356_s18 + $0xd8] sm:$0xff]  ;;  %v8269_v34 = vld [vmem:[%s11356_s18 + $0xe0] sm:$0xff]  ;;  %v8270_v35 = vld [vmem:[%s11356_s18 + $0xe8] sm:$0xff]  ;;  %2730 = vperm.xlu0 %9861, %v2544_v47  }
 0x1fe   : > { %8586 = vmatprep.mubr.msk.f32.mxu0 %vm2560_vm0, %v2550_v10  ;;  %8955 = vmatpush3.bf16.msra.mxu0 %v8926_v6  ;;  %v8271_v36 = vld [vmem:[%s11356_s18 + $0xf0] sm:$0xff]  ;;  %v8272_v37 = vld [vmem:[%s11356_s18 + $0xf8] sm:$0xf]  ;;  %v11444_v48 = vld [vmem:[%s12572_s11] ss:$0 sm:$0xff] }
 0x1ff   : > { %8975 = vmatprep.subr.bf16.mxu0 %v8922_v3  ;;  %v11490_v43 = vld [vmem:[%s10737_s17 + $0x28] sm:$0xff]  ;;  %v11494_v46 = vld [vmem:[%s10737_s17 + $0x30] sm:$0xff] }
 0x201   : > { %8587 = vmatmul.mubr.msk.f32.gmra.mrb[4].mxu0 %vm2560_vm0, %v2551_v11 }
 0x202   : > { %8589 = vmatprep.mubr.msk.f32.mxu0 %vm2560_vm0, %v2552_v12 }
 0x205   : > { %8590 = vmatmul.mubr.msk.f32.gmra.mrb[6].mxu0 %vm2560_vm0, %v2553_v13 }
 0x206   : > { %8628 = vmatprep.mubr.msk.f32.mxu0 %vm2560_vm0, %v8215_v14 }
 0x209   : > { %8629 = vmatmul.mubr.msk.f32.vlgmr.msra.gmra.mrb[8].mxu0 %vm2560_vm0, %v8216_v15 }
 0x20a   : > { %8977 = vmatpush3.bf16.msra.mxu0 %v8922_v3  ;;  %8631 = vmatprep.mubr.msk.f32.mxu0 %vm2560_vm0, %v8217_v16 }
 0x20b   : > { %8979 = vmatprep.subr.bf16.mxu0 %v8926_v6 }
 0x20d   : > { %8632 = vmatmul.mubr.msk.f32.gmra.mrb[10].mxu0 %vm2560_vm0, %v8218_v17 }
 0x20e   : > { %8634 = vmatprep.mubr.msk.f32.mxu0 %vm2560_vm0, %v8219_v18  ;;  %8981 = vmatpush3.bf16.msra.mxu0 %v8926_v6 }
 0x20f   : > { %9001 = vmatprep.subr.bf16.mxu0 %v8922_v3 }
 0x211   : > { %8635 = vmatmul.mubr.msk.f32.gmra.mrb[12].mxu0 %vm2560_vm0, %v8220_v19 }
 0x212   : > { %8637 = vmatprep.mubr.msk.f32.mxu0 %vm2560_vm0, %v8221_v20 }
 0x215   : > { %8638 = vmatmul.mubr.msk.f32.gmra.mrb[14].mxu0 %vm2560_vm0, %v8222_v21 }
 0x216   : > { %8676 = vmatprep.mubr.msk.f32.mxu0 %vm2560_vm0, %v8240_v22 }
 0x219   : > { %8677 = vmatmul.mubr.msk.f32.vlgmr.msra.gmra.mrb[16].mxu0 %vm2560_vm0, %v8241_v23  ;;  %v11466_v23 = vld [vmem:[%s10737_s17 + $0x8] sm:$0xff] }
 0x21a   : > { %9003 = vmatpush3.bf16.msra.mxu0 %v8922_v3  ;;  %8679 = vmatprep.mubr.msk.f32.mxu0 %vm2560_vm0, %v8242_v24 }
 0x21b   : > { %9005 = vmatprep.subr.bf16.mxu0 %v8926_v6 }
 0x21d   : > { %8680 = vmatmul.mubr.msk.f32.gmra.mrb[18].mxu0 %vm2560_vm0, %v8243_v25 }
 0x21e   : > { %8682 = vmatprep.mubr.msk.f32.mxu0 %vm2560_vm0, %v8244_v26  ;;  %9007 = vmatpush3.bf16.msra.mxu0 %v8926_v6  ;;  %v11470_v26 = vld [vmem:[%s10737_s17 + $0x10] sm:$0xff] }
 0x221   : > { %8683 = vmatmul.mubr.msk.f32.gmra.mrb[20].mxu0 %vm2560_vm0, %v8245_v27 }
 0x222   : > { %8685 = vmatprep.mubr.msk.f32.mxu0 %vm2560_vm0, %v8246_v28 }
 0x225   : > { %8686 = vmatmul.mubr.msk.f32.gmra.mrb[22].mxu0 %vm2560_vm0, %v8247_v29 }
 0x226   : > { %8724 = vmatprep.mubr.msk.f32.mxu0 %vm2560_vm0, %v8265_v30 }
 0x229   : > { %8725 = vmatmul.mubr.msk.f32.vlgmr.msra.gmra.mrb[24].mxu0 %vm2560_vm0, %v8266_v31 }
 0x22a   : > { %8727 = vmatprep.mubr.msk.f32.mxu0 %vm2560_vm0, %v8267_v32  ;;  %v11478_v32 = vld [vmem:[%s10737_s17 + $0x18] sm:$0xff] }
 0x22d   : > { %8728 = vmatmul.mubr.msk.f32.gmra.mrb[26].mxu0 %vm2560_vm0, %v8268_v33 }
 0x22e   : > { %8730 = vmatprep.mubr.msk.f32.mxu0 %vm2560_vm0, %v8269_v34 }
 0x231   : > { %8731 = vmatmul.mubr.msk.f32.gmra.mrb[28].mxu0 %vm2560_vm0, %v8270_v35  ;;  %v11482_v35 = vld [vmem:[%s10737_s17 + $0x20] sm:$0xff] }
 0x232   : > { %8733 = vmatprep.mubr.msk.f32.mxu0 %vm2560_vm0, %v8271_v36 }
 0x235   : > { %8734 = vmatmul.mubr.msk.f32.gmra.mrb[30].mxu0 %vm2560_vm0, %v8272_v37 }
 0x236   : > { %8752 = vmatprep.mubr.msk.f32.mxu0 %vm2738_vm1, %v11427_v38 }
 0x26f   : > { %v11585_v15 = vpop.permute.xlu1 %2710 }
 0x2cc   : > { %v8582_v49 = vpop.f32.mrb[0].mxu0 }
 0x2cd   : > { %v2657_v50 = vadd.f32 %v8582_v49, %v11444_v48  ;;  %v2651_v51 = vpop.f32.mrb[1].mxu0 }
 0x2ce   : > { %v2652_v52 = vadd.f32 %v11444_v48, %v2651_v51 }
 0x2cf   : > { %v2691_v53 = vmax.f32 %v2657_v50, 0.0 }
 0x2d0   : > { %v2690_v54 = vmax.f32 %v2652_v52, 0.0  ;;  %v8585_v55 = vpop.f32.mrb[2].mxu0 }
 0x2d1   : > { %v2667_v56 = vadd.f32 %v8585_v55, %v11444_v48  ;;  %v2661_v57 = vpop.f32.mrb[3].mxu0 }
 0x2d2   : > { %v2662_v58 = vadd.f32 %v11444_v48, %v2661_v57  ;;  %v8930_v59 = vpack.c.bf16 %v2691_v53, %v2690_v54  ;;  %v11502_v53 = vld [vmem:[%s10737_s17 + $0x38] sm:$0xff] }
 0x2d3   : > { %v2693_v60 = vmax.f32 %v2667_v56, 0.0 }
 0x2d4   : > { %v2692_v61 = vmax.f32 %v2662_v58, 0.0  ;;  %v8588_v62 = vpop.f32.mrb[4].mxu0  ;;  %8931 = vmatprep.subr.bf16.mxu1 %v8930_v59 }
 0x2d5   : > { %v2677_v63 = vadd.f32 %v8588_v62, %v11444_v48  ;;  %v2671_v0 = vpop.f32.mrb[5].mxu0  ;;  %8933 = vmatpush3.bf16.msra.mxu1 %v8930_v59 }
 0x2d6   : > { %v8934_v1 = vpack.c.bf16 %v2693_v60, %v2692_v61  ;;  %v2672_v2 = vadd.f32 %v11444_v48, %v2671_v0 }
 0x2d7   : > { %v2695_v3 = vmax.f32 %v2677_v63, 0.0 }
 0x2d8   : > { %v2694_v4 = vmax.f32 %v2672_v2, 0.0  ;;  %v8591_v5 = vpop.f32.mrb[6].mxu0  ;;  %8935 = vmatprep.subr.bf16.mxu1 %v8934_v1 }
 0x2d9   : > { %v2687_v6 = vadd.f32 %v8591_v5, %v11444_v48  ;;  %v2681_v7 = vpop.f32.mrb[7].mxu0  ;;  %8937 = vmatpush3.bf16.msra.mxu1 %v8934_v1 }
 0x2da   : > { %v8938_v8 = vpack.c.bf16 %v2695_v3, %v2694_v4  ;;  %v2682_v9 = vadd.f32 %v11444_v48, %v2681_v7 }
 0x2db   : > { %v2697_v10 = vmax.f32 %v2687_v6, 0.0 }
 0x2dc   : > { %v2696_v11 = vmax.f32 %v2682_v9, 0.0  ;;  %8939 = vmatprep.subr.bf16.mxu1 %v8938_v8  ;;  %v8630_v12 = vpop.f32.mrb[8].mxu0 }
 0x2dd   : > { %v2994_v13 = vadd.f32 %v8630_v12, %v11444_v48  ;;  %8941 = vmatpush3.bf16.msra.mxu1 %v8938_v8  ;;  %v2988_v14 = vpop.f32.mrb[9].mxu0 }
 0x2de   : > { %v8942_v16 = vpack.c.bf16 %v2697_v10, %v2696_v11  ;;  %v2989_v17 = vadd.f32 %v11444_v48, %v2988_v14 }
 0x2df   : > { %v3028_v18 = vmax.f32 %v2994_v13, 0.0 }
 0x2e0   : > { %v3027_v19 = vmax.f32 %v2989_v17, 0.0  ;;  %8944 = vmatprep.subr.msk.bf16.mxu1 %vm11455_vm4, %v8942_v16  ;;  %v8633_v20 = vpop.f32.mrb[10].mxu0 }
 0x2e1   : > { %v3004_v21 = vadd.f32 %v8633_v20, %v11444_v48  ;;  %8947 = vmatpush3.bf16.msk.msra.mxu1 %vm11455_vm4, %v8942_v16  ;;  %v2998_v22 = vpop.f32.mrb[11].mxu0 }
 0x2e2   : > { %v8956_v24 = vpack.c.bf16 %v3028_v18, %v3027_v19  ;;  %v2999_v25 = vadd.f32 %v11444_v48, %v2998_v22 }
 0x2e3   : > { %v3030_v27 = vmax.f32 %v3004_v21, 0.0 }
 0x2e4   : > { %v3029_v28 = vmax.f32 %v2999_v25, 0.0  ;;  %8609 = vmatmul.mubr.msk.f32.vlgmr.msra.gmra.mrb[0].mxu1 %vm2738_vm1, %v11466_v23  ;;  %v8636_v29 = vpop.f32.mrb[12].mxu0  ;;  %8957 = vmatprep.subr.bf16.mxu1 %v8956_v24 }
 0x2e5   : > { %v3014_v30 = vadd.f32 %v8636_v29, %v11444_v48  ;;  %v3008_v31 = vpop.f32.mrb[13].mxu0  ;;  %8959 = vmatpush3.bf16.msra.mxu1 %v8956_v24  ;;  %8611 = vmatprep.mubr.msk.f32.mxu1 %vm2738_vm1, %v11470_v26 }
 0x2e6   : > { %v8960_v33 = vpack.c.bf16 %v3030_v27, %v3029_v28  ;;  %v3009_v34 = vadd.f32 %v11444_v48, %v3008_v31 }
 0x2e7   : > { %v3032_v36 = vmax.f32 %v3014_v30, 0.0 }
 0x2e8   : > { %v3031_v37 = vmax.f32 %v3009_v34, 0.0  ;;  %8612 = vmatmul.mubr.msk.f32.gmra.mrb[2].mxu1 %vm2738_vm1, %v11478_v32  ;;  %v8639_v39 = vpop.f32.mrb[14].mxu0  ;;  %8961 = vmatprep.subr.bf16.mxu1 %v8960_v33 }
 0x2e9   : > { %v3024_v40 = vadd.f32 %v8639_v39, %v11444_v48  ;;  %v3018_v42 = vpop.f32.mrb[15].mxu0  ;;  %8963 = vmatpush3.bf16.msra.mxu1 %v8960_v33  ;;  %8614 = vmatprep.mubr.msk.f32.mxu1 %vm2738_vm1, %v11482_v35 }
 0x2ea   : > { %v8964_v44 = vpack.c.bf16 %v3032_v36, %v3031_v37  ;;  %v3019_v45 = vadd.f32 %v11444_v48, %v3018_v42 }
 0x2eb   : > { %v3034_v47 = vmax.f32 %v3024_v40, 0.0 }
 0x2ec   : > { %v3033_v49 = vmax.f32 %v3019_v45, 0.0  ;;  %8615 = vmatmul.mubr.msk.f32.gmra.mrb[4].mxu1 %vm2738_vm1, %v11490_v43  ;;  %8965 = vmatprep.subr.bf16.mxu1 %v8964_v44  ;;  %v8678_v50 = vpop.f32.mrb[16].mxu0 }
 0x2ed   : > { %v3297_v51 = vadd.f32 %v8678_v50, %v11444_v48  ;;  %8967 = vmatpush3.bf16.msra.mxu1 %v8964_v44  ;;  %v3291_v52 = vpop.f32.mrb[17].mxu0  ;;  %8617 = vmatprep.mubr.msk.f32.mxu1 %vm2738_vm1, %v11494_v46 }
 0x2ee   : > { %v8968_v54 = vpack.c.bf16 %v3034_v47, %v3033_v49  ;;  %v3292_v55 = vadd.f32 %v11444_v48, %v3291_v52 }
 0x2ef   : > { %v3331_v56 = vmax.f32 %v3297_v51, 0.0 }
 0x2f0   : > { %v3330_v57 = vmax.f32 %v3292_v55, 0.0  ;;  %8618 = vmatmul.mubr.msk.f32.gmra.mrb[6].mxu1 %vm2738_vm1, %v11502_v53  ;;  %8970 = vmatprep.subr.msk.bf16.mxu1 %vm11455_vm4, %v8968_v54  ;;  %v8681_v58 = vpop.f32.mrb[18].mxu0 }
 0x2f1   : > { %v3307_v59 = vadd.f32 %v8681_v58, %v11444_v48  ;;  %8973 = vmatpush3.bf16.msk.msra.mxu1 %vm11455_vm4, %v8968_v54  ;;  %v3301_v60 = vpop.f32.mrb[19].mxu0  ;;  %8656 = vmatprep.mubr.msk.f32.mxu1 %vm2738_vm1, %v11427_v38 }
 0x2f2   : > { %v8982_v61 = vpack.c.bf16 %v3331_v56, %v3330_v57  ;;  %v3302_v62 = vadd.f32 %v11444_v48, %v3301_v60 }
 0x2f3   : > { %v3333_v63 = vmax.f32 %v3307_v59, 0.0 }
 0x2f4   : > { %v3332_v0 = vmax.f32 %v3302_v62, 0.0  ;;  %8657 = vmatmul.mubr.msk.f32.vlgmr.msra.gmra.mrb[8].mxu1 %vm2738_vm1, %v11466_v23  ;;  %v8684_v1 = vpop.f32.mrb[20].mxu0  ;;  %8983 = vmatprep.subr.bf16.mxu1 %v8982_v61 }
 0x2f5   : > { %v3317_v2 = vadd.f32 %v8684_v1, %v11444_v48  ;;  %v3311_v3 = vpop.f32.mrb[21].mxu0  ;;  %8985 = vmatpush3.bf16.msra.mxu1 %v8982_v61  ;;  %8659 = vmatprep.mubr.msk.f32.mxu1 %vm2738_vm1, %v11470_v26 }
 0x2f6   : > { %v8986_v4 = vpack.c.bf16 %v3333_v63, %v3332_v0  ;;  %v3312_v5 = vadd.f32 %v11444_v48, %v3311_v3 }
 0x2f7   : > { %v3335_v6 = vmax.f32 %v3317_v2, 0.0 }
 0x2f8   : > { %v3334_v7 = vmax.f32 %v3312_v5, 0.0  ;;  %8660 = vmatmul.mubr.msk.f32.gmra.mrb[10].mxu1 %vm2738_vm1, %v11478_v32  ;;  %v8687_v8 = vpop.f32.mrb[22].mxu0  ;;  %8987 = vmatprep.subr.bf16.mxu1 %v8986_v4 }
 0x2f9   : > { %v3327_v9 = vadd.f32 %v8687_v8, %v11444_v48  ;;  %v3321_v10 = vpop.f32.mrb[23].mxu0  ;;  %8989 = vmatpush3.bf16.msra.mxu1 %v8986_v4  ;;  %8662 = vmatprep.mubr.msk.f32.mxu1 %vm2738_vm1, %v11482_v35 }
 0x2fa   : > { %v8990_v11 = vpack.c.bf16 %v3335_v6, %v3334_v7  ;;  %v3322_v12 = vadd.f32 %v11444_v48, %v3321_v10 }
 0x2fb   : > { %v3337_v13 = vmax.f32 %v3327_v9, 0.0 }
 0x2fc   : > { %v3336_v14 = vmax.f32 %v3322_v12, 0.0  ;;  %8663 = vmatmul.mubr.msk.f32.gmra.mrb[12].mxu1 %vm2738_vm1, %v11490_v43  ;;  %8991 = vmatprep.subr.bf16.mxu1 %v8990_v11  ;;  %v8726_v16 = vpop.f32.mrb[24].mxu0 }
 0x2fd   : > { %v3567_v17 = vadd.f32 %v8726_v16, %v11444_v48  ;;  %8993 = vmatpush3.bf16.msra.mxu1 %v8990_v11  ;;  %v3561_v18 = vpop.f32.mrb[25].mxu0  ;;  %8665 = vmatprep.mubr.msk.f32.mxu1 %vm2738_vm1, %v11494_v46 }
 0x2fe   : > { %v8994_v19 = vpack.c.bf16 %v3337_v13, %v3336_v14  ;;  %v3562_v20 = vadd.f32 %v11444_v48, %v3561_v18 }
 0x2ff   : > { %v3601_v21 = vmax.f32 %v3567_v17, 0.0 }
 0x300   : > { %v3600_v22 = vmax.f32 %v3562_v20, 0.0  ;;  %8666 = vmatmul.mubr.msk.f32.gmra.mrb[14].mxu1 %vm2738_vm1, %v11502_v53  ;;  %8996 = vmatprep.subr.msk.bf16.mxu1 %vm11455_vm4, %v8994_v19  ;;  %v8729_v24 = vpop.f32.mrb[26].mxu0 }
 0x301   : > { %v3577_v25 = vadd.f32 %v8729_v24, %v11444_v48  ;;  %8999 = vmatpush3.bf16.msk.msra.mxu1 %vm11455_vm4, %v8994_v19  ;;  %v3571_v27 = vpop.f32.mrb[27].mxu0  ;;  %8704 = vmatprep.mubr.msk.f32.mxu1 %vm2738_vm1, %v11427_v38 }
 0x302   : > { %v9008_v28 = vpack.c.bf16 %v3601_v21, %v3600_v22  ;;  %v3572_v29 = vadd.f32 %v11444_v48, %v3571_v27 }
 0x303   : > { %v3603_v30 = vmax.f32 %v3577_v25, 0.0 }
 0x304   : > { %v3602_v31 = vmax.f32 %v3572_v29, 0.0  ;;  %8705 = vmatmul.mubr.msk.f32.vlgmr.msra.gmra.mrb[16].mxu1 %vm2738_vm1, %v11466_v23  ;;  %v8732_v33 = vpop.f32.mrb[28].mxu0  ;;  %9009 = vmatprep.subr.bf16.mxu0 %v9008_v28 }
 0x305   : > { %v3587_v34 = vadd.f32 %v8732_v33, %v11444_v48  ;;  %9219 = vmatprep.subr.bf16.mxu1 %v9008_v28  ;;  %v3581_v36 = vpop.f32.mrb[29].mxu0  ;;  %9011 = vmatpush3.bf16.msra.mxu0 %v9008_v28 }
 0x306   : > { %v9012_v37 = vpack.c.bf16 %v3603_v30, %v3602_v31  ;;  %v3582_v39 = vadd.f32 %v11444_v48, %v3581_v36  ;;  %9223 = vmatpush3.bf16.msra.mxu1 %v9008_v28  ;;  %8707 = vmatprep.mubr.msk.f32.mxu1 %vm2738_vm1, %v11470_v26 }
 0x307   : > { %v3605_v38 = vmax.f32 %v3587_v34, 0.0 }
 0x308   : > { %v3604_v40 = vmax.f32 %v3582_v39, 0.0  ;;  %8708 = vmatmul.mubr.msk.f32.gmra.mrb[18].mxu1 %vm2738_vm1, %v11478_v32  ;;  %v8735_v42 = vpop.f32.mrb[30].mxu0  ;;  %9013 = vmatprep.subr.bf16.mxu0 %v9012_v37 }
 0x309   : > { %v3597_v44 = vadd.f32 %v8735_v42, %v11444_v48  ;;  %9220 = vmatprep.subr.bf16.mxu1 %v9012_v37  ;;  %v3591_v45 = vpop.f32.mrb[31].mxu0  ;;  %9015 = vmatpush3.bf16.msra.mxu0 %v9012_v37 }
 0x30a   : > { %v9016_v47 = vpack.c.bf16 %v3605_v38, %v3604_v40  ;;  %v3592_v49 = vadd.f32 %v11444_v48, %v3591_v45  ;;  %9224 = vmatpush3.bf16.msra.mxu1 %v9012_v37  ;;  %8710 = vmatprep.mubr.msk.f32.mxu1 %vm2738_vm1, %v11482_v35  ;;  %v11583_v48 = vpop.permute.xlu0 %2700 }
 0x30b   : > { %v3607_v50 = vmax.f32 %v3597_v44, 0.0 }
 0x30c   : > { %v3606_v51 = vmax.f32 %v3592_v49, 0.0  ;;  %8711 = vmatmul.mubr.msk.f32.gmra.mrb[20].mxu1 %vm2738_vm1, %v11490_v43  ;;  %9017 = vmatprep.subr.bf16.mxu0 %v9016_v47 }
 0x30d   : > { %9221 = vmatprep.subr.bf16.mxu1 %v9016_v47  ;;  %9019 = vmatpush3.bf16.msra.mxu0 %v9016_v47 }
 0x30e   : > { %v9020_v52 = vpack.c.bf16 %v3607_v50, %v3606_v51  ;;  %9225 = vmatpush3.bf16.msra.mxu1 %v9016_v47  ;;  %8713 = vmatprep.mubr.msk.f32.mxu1 %vm2738_vm1, %v11494_v46 }
 0x310   : > { %8714 = vmatmul.mubr.msk.f32.gmra.mrb[22].mxu1 %vm2738_vm1, %v11502_v53  ;;  %9022 = vmatprep.subr.msk.bf16.mxu0 %vm11455_vm4, %v9020_v52 }
 0x311   : > { %9222 = vmatprep.subr.msk.bf16.mxu1 %vm11455_vm4, %v9020_v52  ;;  %9025 = vmatpush3.bf16.msk.msra.mxu0 %vm11455_vm4, %v9020_v52 }
 0x312   : > { %9226 = vmatpush3.bf16.msk.msra.mxu1 %vm11455_vm4, %v9020_v52  ;;  %8755 = vmatprep.mubr.msk.f32.mxu1 %vm2738_vm1, %v11470_v26  ;;  %v11589_v26 = vpop.permute.xlu1 %2715 }
 0x314   : > { %8753 = vmatmul.mubr.msk.f32.vlgmr.msra.gmra.mrb[32].mxu0 %vm2738_vm1, %v11466_v23  ;;  %v11587_v23 = vpop.permute.xlu0 %2705 }
 0x315   : > { %8756 = vmatmul.mubr.msk.f32.vlgmr.msra.gmra.mrb[24].mxu1 %vm2738_vm1, %v11478_v32 }
 0x316   : > { %8758 = vmatprep.mubr.msk.f32.mxu1 %vm2738_vm1, %v11482_v35  ;;  %v11593_v57 = vpop.permute.xlu1 %2725 }
 0x318   : > { %v11597_v59 = vpop.permute.xlu0 %2720 }
 0x319   : > { %8759 = vmatmul.mubr.msk.f32.gmra.mrb[26].mxu1 %vm2738_vm1, %v11490_v43 }
 0x31a   : > { %8761 = vmatprep.mubr.msk.f32.mxu1 %vm2738_vm1, %v11494_v46  ;;  %v11605_v3 = vpop.permute.xlu1 %2735 }
 0x31c   : > { %v11607_v5 = vpop.permute.xlu0 %2730 }
 0x31d   : > { %8762 = vmatmul.mubr.msk.f32.gmra.mrb[28].mxu1 %vm2738_vm1, %v11502_v53 }
 0x3b7   : > { %v8610_v32 = vpop.f32.mrb[0].mxu1 }
 0x3b8   : > { %v2839_v35 = vadd.f32 %v8610_v32, %v11587_v23  ;;  %v2833_v54 = vpop.f32.mrb[1].mxu1 }
 0x3b9   : > { %v2834_v43 = vadd.f32 %v2833_v54, %v11583_v48 }
 0x3ba   : > { %v2873_v55 = vmax.f32 %v2839_v35, 0.0 }
 0x3bb   : > { %v2872_v46 = vmax.f32 %v2834_v43, 0.0  ;;  %v8613_v56 = vpop.f32.mrb[2].mxu1 }
 0x3bc   : > { %2882 = vst.msk [vmem:[#allocation2 + $0x10] sm:$0xff] %vm2880_vm5, %v2873_v55  ;;  %v2849_v53 = vadd.f32 %v8613_v56, %v11589_v26  ;;  %v2843_v58 = vpop.f32.mrb[3].mxu1 }
 0x3bd   : > { %2881 = vst.msk [vmem:[#allocation2] sm:$0xff] %vm2880_vm5, %v2872_v46  ;;  %v2844_v60 = vadd.f32 %v2843_v58, %v11585_v15 }
 0x3be   : > { %v2875_v61 = vmax.f32 %v2849_v53, 0.0 }
 0x3bf   : > { %v2874_v62 = vmax.f32 %v2844_v60, 0.0  ;;  %v8616_v63 = vpop.f32.mrb[4].mxu1 }
 0x3c0   : > { %2884 = vst.msk [vmem:[#allocation2 + $0x30] sm:$0xff] %vm2880_vm5, %v2875_v61  ;;  %v2859_v0 = vadd.f32 %v8616_v63, %v11593_v57  ;;  %v2853_v1 = vpop.f32.mrb[5].mxu1 }
 0x3c1   : > { %2883 = vst.msk [vmem:[#allocation2 + $0x20] sm:$0xff] %vm2880_vm5, %v2874_v62  ;;  %v2854_v2 = vadd.f32 %v2853_v1, %v11597_v59 }
 0x3c2   : > { %v2877_v4 = vmax.f32 %v2859_v0, 0.0 }
 0x3c3   : > { %v2876_v6 = vmax.f32 %v2854_v2, 0.0  ;;  %v8619_v7 = vpop.f32.mrb[6].mxu1 }
 0x3c4   : > { %2886 = vst.msk [vmem:[#allocation2 + $0x50] sm:$0xff] %vm2880_vm5, %v2877_v4  ;;  %v2863_v8 = vpop.f32.mrb[7].mxu1  ;;  %v2869_v9 = vadd.f32 %v8619_v7, %v11605_v3 }
 0x3c5   : > { %2885 = vst.msk [vmem:[#allocation2 + $0x40] sm:$0xff] %vm2880_vm5, %v2876_v6  ;;  %v2864_v10 = vadd.f32 %v2863_v8, %v11607_v5 }
 0x3c6   : > { %v2879_v11 = vmax.f32 %v2869_v9, 0.0 }
 0x3c7   : > { %v2878_v12 = vmax.f32 %v2864_v10, 0.0  ;;  %v8658_v13 = vpop.f32.mrb[8].mxu1 }
 0x3c8   : > { %2888 = vst.msk [vmem:[#allocation2 + $0x70] sm:$0xff] %vm2880_vm5, %v2879_v11  ;;  %v3110_v14 = vadd.f32 %v8658_v13, %v11587_v23  ;;  %v3104_v16 = vpop.f32.mrb[9].mxu1 }
 0x3c9   : > { %2887 = vst.msk [vmem:[#allocation2 + $0x60] sm:$0xff] %vm2880_vm5, %v2878_v12  ;;  %v3105_v17 = vadd.f32 %v3104_v16, %v11583_v48 }
 0x3ca   : > { %v3144_v18 = vmax.f32 %v3110_v14, 0.0 }
 0x3cb   : > { %v3143_v19 = vmax.f32 %v3105_v17, 0.0  ;;  %v8661_v20 = vpop.f32.mrb[10].mxu1 }
 0x3cc   : > { %v3120_v21 = vadd.f32 %v8661_v20, %v11589_v26  ;;  %v3114_v22 = vpop.f32.mrb[11].mxu1  ;;  %3161 = vrot.lane.b32.xlu1 %v3144_v18, %s12458_s23 }
 0x3cd   : > { %v3115_v24 = vadd.f32 %v3114_v22, %v11585_v15  ;;  %3159 = vrot.lane.b32.xlu0 %v3143_v19, %s12458_s23 }
 0x3ce   : > { %v3146_v25 = vmax.f32 %v3120_v21, 0.0 }
 0x3cf   : > { %v3145_v27 = vmax.f32 %v3115_v24, 0.0  ;;  %v8664_v28 = vpop.f32.mrb[12].mxu1 }
 0x3d0   : > { %v3130_v29 = vadd.f32 %v8664_v28, %v11593_v57  ;;  %v3124_v30 = vpop.f32.mrb[13].mxu1  ;;  %3165 = vrot.lane.b32.xlu1 %v3146_v25, %s12458_s23 }
 0x3d1   : > { %v3125_v31 = vadd.f32 %v3124_v30, %v11597_v59  ;;  %3163 = vrot.lane.b32.xlu0 %v3145_v27, %s12458_s23 }
 0x3d2   : > { %v3148_v33 = vmax.f32 %v3130_v29, 0.0 }
 0x3d3   : > { %v3147_v34 = vmax.f32 %v3125_v31, 0.0  ;;  %v8667_v36 = vpop.f32.mrb[14].mxu1 }
 0x3d4   : > { %v3140_v37 = vadd.f32 %v8667_v36, %v11605_v3  ;;  %v3134_v39 = vpop.f32.mrb[15].mxu1  ;;  %3169 = vrot.lane.b32.xlu1 %v3148_v33, %s12458_s23 }
 0x3d5   : > { %v3135_v38 = vadd.f32 %v3134_v39, %v11607_v5  ;;  %3167 = vrot.lane.b32.xlu0 %v3147_v34, %s12458_s23 }
 0x3d6   : > { %v3150_v40 = vmax.f32 %v3140_v37, 0.0 }
 0x3d7   : > { %v3149_v42 = vmax.f32 %v3135_v38, 0.0  ;;  %v8706_v44 = vpop.f32.mrb[16].mxu1 }
 0x3d8   : > { %v3413_v45 = vadd.f32 %v8706_v44, %v11587_v23  ;;  %v3407_v47 = vpop.f32.mrb[17].mxu1  ;;  %3173 = vrot.lane.b32.xlu1 %v3150_v40, %s12458_s23 }
 0x3d9   : > { %v3408_v49 = vadd.f32 %v3407_v47, %v11583_v48  ;;  %3171 = vrot.lane.b32.xlu0 %v3149_v42, %s12458_s23 }
 0x3da   : > { %v3447_v50 = vmax.f32 %v3413_v45, 0.0 }
 0x3db   : > { %v3446_v51 = vmax.f32 %v3408_v49, 0.0  ;;  %v8709_v52 = vpop.f32.mrb[18].mxu1 }
 0x3dc   : > { %3455 = vst.msk [vmem:[#allocation2 + $0x18] sm:$0xff] %vm2880_vm5, %v3447_v50  ;;  %v3423_v32 = vadd.f32 %v8709_v52, %v11589_v26  ;;  %v3417_v35 = vpop.f32.mrb[19].mxu1 }
 0x3dd   : > { %3454 = vst.msk [vmem:[#allocation2 + $0x8] sm:$0xff] %vm2880_vm5, %v3446_v51  ;;  %v3418_v54 = vadd.f32 %v3417_v35, %v11585_v15 }
 0x3de   : > { %v3449_v43 = vmax.f32 %v3423_v32, 0.0 }
 0x3df   : > { %v3448_v55 = vmax.f32 %v3418_v54, 0.0  ;;  %v8712_v46 = vpop.f32.mrb[20].mxu1 }
 0x3e0   : > { %3457 = vst.msk [vmem:[#allocation2 + $0x38] sm:$0xff] %vm2880_vm5, %v3449_v43  ;;  %v3433_v56 = vadd.f32 %v8712_v46, %v11593_v57  ;;  %v3427_v53 = vpop.f32.mrb[21].mxu1 }
 0x3e1   : > { %3456 = vst.msk [vmem:[#allocation2 + $0x28] sm:$0xff] %vm2880_vm5, %v3448_v55  ;;  %v3428_v58 = vadd.f32 %v3427_v53, %v11597_v59 }
 0x3e2   : > { %v3451_v60 = vmax.f32 %v3433_v56, 0.0 }
 0x3e3   : > { %v3450_v61 = vmax.f32 %v3428_v58, 0.0  ;;  %v8715_v62 = vpop.f32.mrb[22].mxu1 }
 0x3e4   : > { %3459 = vst.msk [vmem:[#allocation2 + $0x58] sm:$0xff] %vm2880_vm5, %v3451_v60  ;;  %v3443_v63 = vadd.f32 %v8715_v62, %v11605_v3  ;;  %v3437_v0 = vpop.f32.mrb[23].mxu1 }
 0x3e5   : > { %3458 = vst.msk [vmem:[#allocation2 + $0x48] sm:$0xff] %vm2880_vm5, %v3450_v61  ;;  %v3438_v1 = vadd.f32 %v3437_v0, %v11607_v5 }
 0x3e6   : > { %v3453_v2 = vmax.f32 %v3443_v63, 0.0 }
 0x3e7   : > { %v3452_v4 = vmax.f32 %v3438_v1, 0.0  ;;  %v8754_v6 = vpop.f32.mrb[32].mxu0 }
 0x3e8   : > { %3461 = vst.msk [vmem:[#allocation2 + $0x78] sm:$0xff] %vm2880_vm5, %v3453_v2  ;;  %v3683_v7 = vadd.f32 %v8754_v6, %v11587_v23  ;;  %v8757_v8 = vpop.f32.mrb[24].mxu1  ;;  %v3677_v9 = vpop.f32.mrb[33].mxu0 }
 0x3e9   : > { %3460 = vst.msk [vmem:[#allocation2 + $0x68] sm:$0xff] %vm2880_vm5, %v3452_v4  ;;  %v3678_v10 = vadd.f32 %v3677_v9, %v11583_v48  ;;  %v3687_v11 = vpop.f32.mrb[25].mxu1  ;;  %v3693_v13 = vadd.f32 %v8757_v8, %v11589_v26 }
 0x3ea   : > { %v3717_v12 = vmax.f32 %v3683_v7, 0.0  ;;  %v3688_v16 = vadd.f32 %v3687_v11, %v11585_v15 }
 0x3eb   : > { %v3716_v14 = vmax.f32 %v3678_v10, 0.0  ;;  %v3719_v23 = vmax.f32 %v3693_v13, 0.0 }
 0x3ec   : > { %v8760_v17 = vpop.f32.mrb[26].mxu1  ;;  %3734 = vrot.lane.b32.xlu1 %v3717_v12, %s12458_s23  ;;  %v3718_v20 = vmax.f32 %v3688_v16, 0.0 }
 0x3ed   : > { %v3697_v18 = vpop.f32.mrb[27].mxu1  ;;  %3732 = vrot.lane.b32.xlu0 %v3716_v14, %s12458_s23  ;;  %v3703_v19 = vadd.f32 %v8760_v17, %v11593_v57 }
 0x3ee   : > { %v3698_v21 = vadd.f32 %v3697_v18, %v11597_v59 }
 0x3ef   : > { %v3721_v26 = vmax.f32 %v3703_v19, 0.0 }
 0x3f0   : > { %v8763_v48 = vpop.f32.mrb[28].mxu1  ;;  %3738 = vrot.lane.b32.xlu1 %v3719_v23, %s12458_s23  ;;  %v3720_v24 = vmax.f32 %v3698_v21, 0.0 }
 0x3f1   : > { %v3707_v22 = vpop.f32.mrb[29].mxu1  ;;  %3736 = vrot.lane.b32.xlu0 %v3718_v20, %s12458_s23  ;;  %v3713_v15 = vadd.f32 %v8763_v48, %v11605_v3 }
 0x3f2   : > { %v3708_v25 = vadd.f32 %v3707_v22, %v11607_v5 }
 0x3f3   : > { %v3723_v57 = vmax.f32 %v3713_v15, 0.0 }
 0x3f4   : > { %3742 = vrot.lane.b32.xlu1 %v3721_v26, %s12458_s23  ;;  %v3722_v27 = vmax.f32 %v3708_v25, 0.0 }
 0x3f5   : > { %3740 = vrot.lane.b32.xlu0 %v3720_v24, %s12458_s23 }
 0x3f8   : > { %3746 = vrot.lane.b32.xlu1 %v3723_v57, %s12458_s23 }
 0x3f9   : > { %3744 = vrot.lane.b32.xlu0 %v3722_v27, %s12458_s23 }
 0x43e   : > { %v3162_v59 = vpop.permute.xlu1 %3161 }
 0x43f   : > { %v3160_v28 = vpop.permute.xlu0 %3159  ;;  %3185 = vst.msk [vmem:[#allocation2 + $0x10] sm:$0xff] %vm3183_vm6, %v3162_v59 }
 0x440   : > { %3184 = vst.msk [vmem:[#allocation2] sm:$0xff] %vm3183_vm6, %v3160_v28 }
 0x442   : > { %v3166_v3 = vpop.permute.xlu1 %3165 }
 0x443   : > { %v3164_v29 = vpop.permute.xlu0 %3163  ;;  %3187 = vst.msk [vmem:[#allocation2 + $0x30] sm:$0xff] %vm3183_vm6, %v3166_v3 }
 0x444   : > { %3186 = vst.msk [vmem:[#allocation2 + $0x20] sm:$0xff] %vm3183_vm6, %v3164_v29 }
 0x446   : > { %v3766_v5 = vld [vmem:[#allocation2 + $0x10] sm:$0xff]   ;;  %v3170_v30 = vpop.permute.xlu1 %3169 }
 0x447   : > { %v3764_v31 = vld [vmem:[#allocation2] sm:$0xff]   ;;  %v3168_v33 = vpop.permute.xlu0 %3167  ;;  %3189 = vst.msk [vmem:[#allocation2 + $0x50] sm:$0xff] %vm3183_vm6, %v3170_v30 }
 0x448   : > { %3188 = vst.msk [vmem:[#allocation2 + $0x40] sm:$0xff] %vm3183_vm6, %v3168_v33 }
 0x44a   : > { %v3770_v34 = vld [vmem:[#allocation2 + $0x30] sm:$0xff]   ;;  %v3174_v36 = vpop.permute.xlu1 %3173 }
 0x44b   : > { %v3768_v37 = vld [vmem:[#allocation2 + $0x20] sm:$0xff]   ;;  %v3172_v39 = vpop.permute.xlu0 %3171  ;;  %3191 = vst.msk [vmem:[#allocation2 + $0x70] sm:$0xff] %vm3183_vm6, %v3174_v36 }
 0x44c   : > { %3190 = vst.msk [vmem:[#allocation2 + $0x60] sm:$0xff] %vm3183_vm6, %v3172_v39 }
 0x44e   : > { %v3774_v38 = vld [vmem:[#allocation2 + $0x50] sm:$0xff]  }
 0x44f   : > { %v3772_v40 = vld [vmem:[#allocation2 + $0x40] sm:$0xff]  }
 0x452   : > { %v3778_v42 = vld [vmem:[#allocation2 + $0x70] sm:$0xff]  }
 0x453   : > { %v3776_v44 = vld [vmem:[#allocation2 + $0x60] sm:$0xff]  }
 0x45e   : > { %v3735_v45 = vpop.permute.xlu1 %3734 }
 0x45f   : > { %3757 = vst.msk [vmem:[#allocation2 + $0x18] sm:$0xff] %vm3183_vm6, %v3735_v45  ;;  %v3733_v47 = vpop.permute.xlu0 %3732 }
 0x460   : > { %3756 = vst.msk [vmem:[#allocation2 + $0x8] sm:$0xff] %vm3183_vm6, %v3733_v47 }
 0x462   : > { %v3739_v49 = vpop.permute.xlu1 %3738 }
 0x463   : > { %3759 = vst.msk [vmem:[#allocation2 + $0x38] sm:$0xff] %vm3183_vm6, %v3739_v49  ;;  %v3737_v50 = vpop.permute.xlu0 %3736 }
 0x464   : > { %3758 = vst.msk [vmem:[#allocation2 + $0x28] sm:$0xff] %vm3183_vm6, %v3737_v50 }
 0x466   : > { %v3767_v51 = vld [vmem:[#allocation2 + $0x18] sm:$0xff]   ;;  %v3743_v52 = vpop.permute.xlu1 %3742 }
 0x467   : > { %v3765_v32 = vld [vmem:[#allocation2 + $0x8] sm:$0xff]   ;;  %3761 = vst.msk [vmem:[#allocation2 + $0x58] sm:$0xff] %vm3183_vm6, %v3743_v52  ;;  %v3741_v35 = vpop.permute.xlu0 %3740 }
 0x468   : > { %3760 = vst.msk [vmem:[#allocation2 + $0x48] sm:$0xff] %vm3183_vm6, %v3741_v35 }
 0x46a   : > { %v3771_v54 = vld [vmem:[#allocation2 + $0x38] sm:$0xff]   ;;  %v3747_v43 = vpop.permute.xlu1 %3746 }
 0x46b   : > { %v3769_v55 = vld [vmem:[#allocation2 + $0x28] sm:$0xff]   ;;  %3763 = vst.msk [vmem:[#allocation2 + $0x78] sm:$0xff] %vm3183_vm6, %v3747_v43  ;;  %v3745_v46 = vpop.permute.xlu0 %3744 }
 0x46c   : > { %3762 = vst.msk [vmem:[#allocation2 + $0x68] sm:$0xff] %vm3183_vm6, %v3745_v46 }
 0x46e   : > { %v3775_v56 = vld [vmem:[#allocation2 + $0x58] sm:$0xff]  }
 0x46f   : > { %v3773_v53 = vld [vmem:[#allocation2 + $0x48] sm:$0xff]  }
 0x472   : > { %v3779_v58 = vld [vmem:[#allocation2 + $0x78] sm:$0xff]  }
 0x473   : > { %v3777_v60 = vld [vmem:[#allocation2 + $0x68] sm:$0xff]  }
 0x474 LB: >> { %s12575_s0 = sld [smem:[#allocation35_spill]]  ;;  %v9026_v61 = vpack.c.bf16 %v10488_v51, %v10496_v32  ;;  %v9028_v62 = vpack.c.bf16 %v10492_v5, %v10500_v31  ;;  %v9030_v63 = vpack.c.bf16 %v10472_v54, %v10480_v55  ;;  %v9032_v0 = vpack.c.bf16 %v10476_v34, %v10484_v37  ;;  %s11773_s16 = sshll.u32 %s10504_s2, 6  ;;  %s10504_s2 = sphi %s11711_s2, %s3785_s2   ;;  %v10500_v31 = vphi %v3764_v31, %v12603_v31   ;;  %v10496_v32 = vphi %v3765_v32, %v12602_v32   ;;  %v10492_v5 = vphi %v3766_v5, %v12601_v5   ;;  %v10488_v51 = vphi %v3767_v51, %v12600_v51   ;;  %v10484_v37 = vphi %v3768_v37, %v12599_v37   ;;  %v10480_v55 = vphi %v3769_v55, %v12598_v55   ;;  %v10476_v34 = vphi %v3770_v34, %v12597_v34   ;;  %v10472_v54 = vphi %v3771_v54, %v12596_v54   ;;  %v10468_v40 = vphi %v3772_v40, %v12595_v40   ;;  %v10464_v53 = vphi %v3773_v53, %v12594_v53   ;;  %v10460_v38 = vphi %v3774_v38, %v12593_v38   ;;  %v10456_v56 = vphi %v3775_v56, %v12592_v56   ;;  %v10452_v44 = vphi %v3776_v44, %v12591_v44   ;;  %v10448_v60 = vphi %v3777_v60, %v12590_v60   ;;  %v10444_v42 = vphi %v3778_v42, %v12589_v42   ;;  %v10440_v58 = vphi %v3779_v58, %v12588_v58  }
 0x475   : >> { %v9034_v1 = vpack.c.bf16 %v10456_v56, %v10464_v53  ;;  %v9036_v2 = vpack.c.bf16 %v10460_v38, %v10468_v40  ;;  %s12576_s1 = sld [smem:[#allocation34_spill]]  ;;  %v9038_v7 = vpack.c.bf16 %v10440_v58, %v10448_v60  ;;  %v10695_v8 = vmov 0.0   ;;  %s12577_s15 = sld [smem:[#allocation37_spill]] }
 0x476   : >> { %9027 = vmatprep.subr.bf16.mxu0 %v9026_v61  ;;  %3949 = vmatprep.mubr.f32.mxu0 %v10695_v8  ;;  %v10696_v9 = vmov 0   ;;  %v9040_v10 = vpack.c.bf16 %v10444_v42, %v10452_v44  ;;  %s12578_s18 = sld [smem:[#allocation36_spill]]  ;;  %s3785_s2 = sadd.s32 1, %s10504_s2  }
 0x477   : >> { %9029 = vmatpush1.bf16.msra.mxu0 %v9028_v62  ;;  %9863 = vset.pattern.permute.xlu0 %v10696_v9  ;;  %p11893_p7 = scmp.ge.s32.totalorder %s3785_s2, 10  }
 0x478   : >> { %9031 = vmatprep.subr.bf16.mxu0 %v9030_v63  ;;  %9864 = vset.pattern.permute.xlu1 %v10696_v9  ;;  %s12605_s2 = sld [smem:[#allocation41_spill]] (%p11893_p7) }
 0x479   : >> { %4160 = vmatprep.mubr.f32.mxu1 %v10695_v8 }
 0x47a   : >> { %s11777_s22 = scalar_lea.vmem %s12575_s0, %s11773_s16 }
 0x47b   : >> { %9033 = vmatpush1.bf16.msra.mxu0 %v9032_v0  ;;  %v3813_v4 = vld [vmem:[%s11777_s22] sm:$0xff]  ;;  %v3815_v6 = vld [vmem:[%s11777_s22 + $0x10] sm:$0xff]  ;;  %v3814_v11 = vld [vmem:[%s11777_s22 + $0x8] sm:$0xff]  ;;  %s11795_s26 = scalar_lea.vmem %s12576_s1, %s11773_s16  ;;  %s4023_s28 = scalar_lea.vmem %s12577_s15, %s11773_s16 }
 0x47c   : >> { %9035 = vmatprep.subr.bf16.mxu0 %v9034_v1  ;;  %3823 = vperm.xlu0 %9863, %v3813_v4   ;;  %v3816_v12 = vld [vmem:[%s11777_s22 + $0x18] sm:$0xff]  ;;  %v3804_v13 = vld [vmem:[%s11795_s26] sm:$0xff]  ;;  %v3818_v16 = vld [vmem:[%s11777_s22 + $0x28] sm:$0xff]  ;;  %s4014_s11 = scalar_lea.vmem %s12578_s18, %s11773_s16  ;;  %s12604_s16 = sld [smem:[#allocation39_spill]] (%p11893_p7) }
 0x47d   : >> { %3833 = vperm.xlu1 %9864, %v3815_v6   ;;  %v3817_v14 = vld [vmem:[%s11777_s22 + $0x20] sm:$0xff]  ;;  %v3805_v17 = vld [vmem:[%s11795_s26 + $0x8] sm:$0xff]  ;;  %v3819_v18 = vld [vmem:[%s11777_s22 + $0x30] sm:$0xff]  ;;  %s12607_s1 = sld [smem:[#allocation43_spill]] (%p11893_p7)  ;;  %s12608_s15 = sld [smem:[#allocation42_spill]] (%p11893_p7) }
 0x47e   : >> { %v3820_v23 = vld [vmem:[%s11777_s22 + $0x38] sm:$0xff]  ;;  %v3806_v19 = vld [vmem:[%s11795_s26 + $0x10] sm:$0xff]  ;;  %v4024_v20 = vld [vmem:[%s4023_s28] sm:$0xff]  ;;  %s12606_s22 = sld [smem:[#allocation38_spill]] (%p11893_p7) }
 0x47f   : >> { %9037 = vmatpush1.bf16.msra.mxu0 %v9036_v2  ;;  %v4025_v21 = vld [vmem:[%s4023_s28 + $0x8] sm:$0xff]  ;;  %v3807_v48 = vld [vmem:[%s11795_s26 + $0x18] sm:$0xff]  ;;  %v4026_v22 = vld [vmem:[%s4023_s28 + $0x10] sm:$0xff] }
 0x480   : >> { %9039 = vmatprep.subr.bf16.mxu0 %v9038_v7  ;;  %3828 = vperm.xlu0 %9863, %v3814_v11   ;;  %v4027_v26 = vld [vmem:[%s4023_s28 + $0x18] sm:$0xff]  ;;  %v3808_v15 = vld [vmem:[%s11795_s26 + $0x20] sm:$0xff]  ;;  %v4029_v25 = vld [vmem:[%s4023_s28 + $0x28] sm:$0xff] }
 0x481   : >> { %3838 = vperm.xlu1 %9864, %v3816_v12   ;;  %v4028_v24 = vld [vmem:[%s4023_s28 + $0x20] sm:$0xff]  ;;  %v3809_v57 = vld [vmem:[%s11795_s26 + $0x28] sm:$0xff]  ;;  %v4030_v27 = vld [vmem:[%s4023_s28 + $0x30] sm:$0xff] }
 0x482   : >> { %v4031_v59 = vld [vmem:[%s4023_s28 + $0x38] sm:$0xff]  ;;  %v3810_v28 = vld [vmem:[%s11795_s26 + $0x30] sm:$0xff]  ;;  %s12071_s28 = smov (%p11893_p7), 0  }
 0x483   : >> { %9041 = vmatpush1.bf16.msra.mxu0 %v9040_v10  ;;  %v3811_v3 = vld [vmem:[%s11795_s26 + $0x38] sm:$0xff]  ;;  %s12609_s26 = sld [smem:[#allocation40_spill]] (%p11893_p7) }
 0x484   : >> { %3843 = vperm.xlu0 %9863, %v3817_v14  }
 0x485   : >> { %3848 = vperm.xlu1 %9864, %v3818_v16  }
 0x486   : >> { %8291 = vmatmul.mubr.msk.f32.vlgmr.msra.gmra.mrb[0].mxu0 %vm2880_vm5, %v3804_v13 }
 0x487   : >> { %3955 = vmatprep.mubr.f32.mxu0 %v10695_v8 }
 0x488   : >> { %3853 = vperm.xlu0 %9863, %v3819_v18  }
 0x489   : >> { %3858 = vperm.xlu1 %9864, %v3820_v23  }
 0x48a   : >> { %8292 = vmatmul.mubr.msk.f32.gmra.mrb[2].mxu0 %vm2880_vm5, %v3805_v17 }
 0x48b   : >> { %3961 = vmatprep.mubr.f32.mxu0 %v10695_v8 }
 0x48c   : >> { %4034 = vperm.xlu0 %9863, %v4024_v20  }
 0x48d   : >> { %4039 = vperm.xlu1 %9864, %v4025_v21  }
 0x48e   : >> { %8293 = vmatmul.mubr.msk.f32.gmra.mrb[4].mxu0 %vm2880_vm5, %v3806_v19 }
 0x48f   : >> { %3967 = vmatprep.mubr.f32.mxu0 %v10695_v8 }
 0x490   : >> { %4044 = vperm.xlu0 %9863, %v4026_v22  }
 0x491   : >> { %4049 = vperm.xlu1 %9864, %v4027_v26  }
 0x492   : >> { %8294 = vmatmul.mubr.msk.f32.gmra.mrb[6].mxu0 %vm2880_vm5, %v3807_v48 }
 0x493   : >> { %3973 = vmatprep.mubr.f32.mxu0 %v10695_v8 }
 0x494   : >> { %4054 = vperm.xlu0 %9863, %v4028_v24  }
 0x495   : >> { %4059 = vperm.xlu1 %9864, %v4029_v25  }
 0x496   : >> { %8295 = vmatmul.mubr.msk.f32.gmra.mrb[8].mxu0 %vm2880_vm5, %v3808_v15 }
 0x497   : >> { %3979 = vmatprep.mubr.f32.mxu0 %v10695_v8 }
 0x498   : >> { %4064 = vperm.xlu0 %9863, %v4030_v27  }
 0x499   : >> { %4069 = vperm.xlu1 %9864, %v4031_v59  }
 0x49a   : >> { %8296 = vmatmul.mubr.msk.f32.gmra.mrb[10].mxu0 %vm2880_vm5, %v3809_v57 }
 0x49b   : >> { %3985 = vmatprep.mubr.f32.mxu0 %v10695_v8 }
 0x49c   : > { %9865 = vset.pattern.permute.xlu0 (%p11893_p7), %v10692_v41 }
 0x49d   : > { %9866 = vset.pattern.permute.xlu1 (%p11893_p7), %v10692_v41 }
 0x49e   : >> { %8297 = vmatmul.mubr.msk.f32.gmra.mrb[12].mxu0 %vm2880_vm5, %v3810_v28 }
 0x49f   : >> { %3991 = vmatprep.mubr.f32.mxu0 %v10695_v8 }
 0x4a2   : >> { %8298 = vmatmul.mubr.msk.f32.gmra.mrb[14].mxu0 %vm2880_vm5, %v3811_v3 }
 0x4fb   : >> { %v3824_v29 = vpop.permute.xlu0 %3823 }
 0x4fc   : >> { %v3834_v52 = vpop.permute.xlu1 %3833 }
 0x4ff   : >> { %v3829_v39 = vpop.permute.xlu0 %3828 }
 0x500   : >> { %v3839_v6 = vpop.permute.xlu1 %3838 }
 0x503   : >> { %v3844_v20 = vpop.permute.xlu0 %3843 }
 0x504   : >> { %v3849_v22 = vpop.permute.xlu1 %3848 }
 0x559   : >> { %v3951_v30 = vpop.f32.mrb[0].mxu0 }
 0x55a   : >> { %v3953_v33 = vpop.f32.mrb[1].mxu0  ;;  %v3952_v36 = vadd.f32 %v3951_v30, %v3824_v29 }
 0x55b   : >> { %v3954_v45 = vadd.f32 %v3953_v33, %v3824_v29 }
 0x55c   : >> { %v3998_v43 = vmax.f32 %v3952_v36, 0.0  ;;  %v3854_v36 = vpop.permute.xlu0 %3853 }
 0x55d   : >> { %v3957_v47 = vpop.f32.mrb[2].mxu0  ;;  %v3999_v61 = vmax.f32 %v3954_v45, 0.0 }
 0x55e   : >> { %v3958_v49 = vadd.f32 %v3957_v47, %v3829_v39  ;;  %v3959_v50 = vpop.f32.mrb[3].mxu0  ;;  %v3859_v47 = vpop.permute.xlu1 %3858 }
 0x55f   : >> { %v3960_v35 = vadd.f32 %v3959_v50, %v3829_v39 }
 0x560   : >> { %v4000_v46 = vmax.f32 %v3958_v49, 0.0 }
 0x561   : >> { %v4001_v62 = vmax.f32 %v3960_v35, 0.0  ;;  %v3963_v63 = vpop.f32.mrb[4].mxu0 }
 0x562   : >> { %v3965_v0 = vpop.f32.mrb[5].mxu0  ;;  %v9044_v1 = vpack.c.bf16 %v4000_v46, %v3998_v43  ;;  %v3964_v4 = vadd.f32 %v3963_v63, %v3834_v52 }
 0x563   : >> { %v9042_v2 = vpack.c.bf16 %v4001_v62, %v3999_v61  ;;  %v3966_v7 = vadd.f32 %v3965_v0, %v3834_v52 }
 0x564   : >> { %v4002_v13 = vmax.f32 %v3964_v4, 0.0  ;;  %v4016_v4 = vld [vmem:[%s4014_s11 + $0x8] sm:$0xff] }
 0x565   : >> { %v3969_v9 = vpop.f32.mrb[6].mxu0  ;;  %9043 = vmatprep.subr.bf16.mxu1 %v9042_v2  ;;  %v4003_v16 = vmax.f32 %v3966_v7, 0.0  ;;  %v4015_v2 = vld [vmem:[%s4014_s11] sm:$0xff]  ;;  %v4018_v7 = vld [vmem:[%s4014_s11 + $0x18] sm:$0xff] }
 0x566   : >> { %v3970_v10 = vadd.f32 %v3969_v9, %v3839_v6  ;;  %v3971_v11 = vpop.f32.mrb[7].mxu0  ;;  %9045 = vmatpush1.bf16.msra.mxu1 %v9044_v1  ;;  %v4019_v9 = vld [vmem:[%s4014_s11 + $0x20] sm:$0xff] }
 0x567   : >> { %v3972_v12 = vadd.f32 %v3971_v11, %v3839_v6  ;;  %v4017_v6 = vld [vmem:[%s4014_s11 + $0x10] sm:$0xff] }
 0x568   : >> { %v4004_v14 = vmax.f32 %v3970_v10, 0.0  ;;  %v4020_v10 = vld [vmem:[%s4014_s11 + $0x28] sm:$0xff]  ;;  %v4021_v11 = vld [vmem:[%s4014_s11 + $0x30] sm:$0xff] }
 0x569   : >> { %v4005_v17 = vmax.f32 %v3972_v12, 0.0  ;;  %v3975_v18 = vpop.f32.mrb[8].mxu0  ;;  %v4022_v12 = vld [vmem:[%s4014_s11 + $0x38] sm:$0xff] }
 0x56a   : >> { %v9048_v23 = vpack.c.bf16 %v4004_v14, %v4002_v13  ;;  %v3977_v19 = vpop.f32.mrb[9].mxu0  ;;  %v3976_v48 = vadd.f32 %v3975_v18, %v3844_v20  ;;  %v4035_v13 = vpop.permute.xlu0 %4034 }
 0x56b   : >> { %v9046_v21 = vpack.c.bf16 %v4005_v17, %v4003_v16  ;;  %v3978_v26 = vadd.f32 %v3977_v19, %v3844_v20  ;;  %v4040_v19 = vpop.permute.xlu1 %4039 }
 0x56c   : >> { %v4006_v27 = vmax.f32 %v3976_v48, 0.0 }
 0x56d   : >> { %v3981_v15 = vpop.f32.mrb[10].mxu0  ;;  %9047 = vmatprep.subr.bf16.mxu1 %v9046_v21  ;;  %v4007_v28 = vmax.f32 %v3978_v26, 0.0 }
 0x56e   : >> { %v3982_v24 = vadd.f32 %v3981_v15, %v3849_v22  ;;  %v3983_v25 = vpop.f32.mrb[11].mxu0  ;;  %9049 = vmatpush1.bf16.msra.mxu1 %v9048_v23 }
 0x56f   : >> { %v3984_v57 = vadd.f32 %v3983_v25, %v3849_v22  ;;  %v4045_v25 = vpop.permute.xlu0 %4044 }
 0x570   : >> { %v4008_v59 = vmax.f32 %v3982_v24, 0.0 }
 0x571   : >> { %v4009_v3 = vmax.f32 %v3984_v57, 0.0  ;;  %v3987_v29 = vpop.f32.mrb[12].mxu0 }
 0x572   : >> { %v9052_v30 = vpack.c.bf16 %v4008_v59, %v4006_v27  ;;  %v3989_v33 = vpop.f32.mrb[13].mxu0  ;;  %v3988_v45 = vadd.f32 %v3987_v29, %v3854_v36 }
 0x573   : >> { %v9050_v39 = vpack.c.bf16 %v4009_v3, %v4007_v28  ;;  %v3990_v49 = vadd.f32 %v3989_v33, %v3854_v36 }
 0x574   : >> { %v4010_v46 = vmax.f32 %v3988_v45, 0.0 }
 0x575   : >> { %v3993_v50 = vpop.f32.mrb[14].mxu0  ;;  %9051 = vmatprep.subr.bf16.mxu1 %v9050_v39  ;;  %v4011_v62 = vmax.f32 %v3990_v49, 0.0 }
 0x576   : >> { %v3994_v52 = vadd.f32 %v3993_v50, %v3859_v47  ;;  %v3995_v35 = vpop.f32.mrb[15].mxu0  ;;  %9053 = vmatpush1.bf16.msra.mxu1 %v9052_v30  ;;  %v4050_v30 = vpop.permute.xlu1 %4049 }
 0x577   : >> { %v3996_v43 = vadd.f32 %v3995_v35, %v3859_v47  ;;  %v4055_v50 = vpop.permute.xlu0 %4054 }
 0x578   : >> { %v4012_v61 = vmax.f32 %v3994_v52, 0.0 }
 0x579   : >> { %v4013_v63 = vmax.f32 %v3996_v43, 0.0 }
 0x57a   : >> { %v9056_v0 = vpack.c.bf16 %v4012_v61, %v4010_v46 }
 0x57b   : >> { %v9054_v1 = vpack.c.bf16 %v4013_v63, %v4011_v62  ;;  %v4060_v63 = vpop.permute.xlu1 %4059 }
 0x57d   : >> { %9055 = vmatprep.subr.bf16.mxu1 %v9054_v1 }
 0x57e   : >> { %9057 = vmatpush1.bf16.msra.mxu1 %v9056_v0 }
 0x581   : >> { %8299 = vmatmul.mubr.msk.f32.vlgmr.msra.gmra.mrb[0].mxu1 %vm2880_vm5, %v4015_v2 }
 0x582   : >> { %4166 = vmatprep.mubr.f32.mxu1 %v10695_v8 }
 0x585   : >> { %8300 = vmatmul.mubr.msk.f32.gmra.mrb[2].mxu1 %vm2880_vm5, %v4016_v4 }
 0x586   : >> { %4172 = vmatprep.mubr.f32.mxu1 %v10695_v8 }
 0x589   : >> { %8301 = vmatmul.mubr.msk.f32.gmra.mrb[4].mxu1 %vm2880_vm5, %v4017_v6 }
 0x58a   : >> { %4178 = vmatprep.mubr.f32.mxu1 %v10695_v8 }
 0x58d   : >> { %8302 = vmatmul.mubr.msk.f32.gmra.mrb[6].mxu1 %vm2880_vm5, %v4018_v7 }
 0x58e   : >> { %4184 = vmatprep.mubr.f32.mxu1 %v10695_v8 }
 0x591   : >> { %8303 = vmatmul.mubr.msk.f32.gmra.mrb[8].mxu1 %vm2880_vm5, %v4019_v9  ;;  %v4065_v9 = vpop.permute.xlu0 %4064 }
 0x592   : >> { %4190 = vmatprep.mubr.f32.mxu1 %v10695_v8 }
 0x595   : >> { %8304 = vmatmul.mubr.msk.f32.gmra.mrb[10].mxu1 %vm2880_vm5, %v4020_v10 }
 0x596   : >> { %4196 = vmatprep.mubr.f32.mxu1 %v10695_v8 }
 0x599   : >> { %8305 = vmatmul.mubr.msk.f32.gmra.mrb[12].mxu1 %vm2880_vm5, %v4021_v11 }
 0x59a   : >> { %4202 = vmatprep.mubr.f32.mxu1 %v10695_v8 }
 0x59d   : >> { %8306 = vmatmul.mubr.msk.f32.gmra.mrb[14].mxu1 %vm2880_vm5, %v4022_v12 }
 0x654   : >> { %v4162_v14 = vpop.f32.mrb[0].mxu1 }
 0x655   : >> { %v4163_v16 = vadd.f32 %v4162_v14, %v4035_v13  ;;  %v4164_v17 = vpop.f32.mrb[1].mxu1 }
 0x656   : >> { %v4165_v18 = vadd.f32 %v4164_v17, %v4035_v13  ;;  %v4070_v17 = vpop.permute.xlu1 %4069 }
 0x657   : >> { %v11844_v31 = vadd.f32 %v10500_v31, %v4163_v16 }
 0x658   : >> { %v11847_v32 = vadd.f32 %v10496_v32, %v4165_v18  ;;  %v4168_v21 = vpop.f32.mrb[2].mxu1 }
 0x659   : >> { %v12579_v23 = vmov %v11844_v31  ;;  %v4169_v22 = vadd.f32 %v4168_v21, %v4040_v19  ;;  %v4170_v8 = vpop.f32.mrb[3].mxu1 }
 0x65a   : >> { %v12580_v20 = vmov %v11847_v32  ;;  %v4225_v48 = vmax.f32 %v12579_v23, 0.0   ;;  %v4171_v15 = vadd.f32 %v4170_v8, %v4040_v19  ;;  %v4246_v23 = vld [vmem:[%s12604_s16 + $0x8] sm:$0xff] (%p11893_p7) }
 0x65b   : >> { %v4226_v26 = vmax.f32 %v12580_v20, 0.0   ;;  %v11852_v5 = vadd.f32 %v10492_v5, %v4169_v22 }
 0x65c   : >> { %v11855_v51 = vadd.f32 %v10488_v51, %v4171_v15  ;;  %v4174_v31 = vpop.f32.mrb[4].mxu1 }
 0x65d   : >> { %v12581_v24 = vmov %v11852_v5  ;;  %v4175_v59 = vadd.f32 %v4174_v31, %v4045_v25  ;;  %v4176_v32 = vpop.f32.mrb[5].mxu1  ;;  %v12603_v31 = vmov %v4225_v48 }
 0x65e   : >> { %v12582_v57 = vmov %v11855_v51  ;;  %v4227_v27 = vmax.f32 %v12581_v24, 0.0   ;;  %v4177_v3 = vadd.f32 %v4176_v32, %v4045_v25  ;;  %v12602_v32 = vmov %v4226_v26  ;;  %v4253_v24 = vld [vmem:[%s12605_s2] sm:$0xff] (%p11893_p7) }
 0x65f   : >> { %v4228_v28 = vmax.f32 %v12582_v57, 0.0   ;;  %v11860_v37 = vadd.f32 %v10484_v37, %v4175_v59 }
 0x660   : >> { %v11863_v55 = vadd.f32 %v10480_v55, %v4177_v3  ;;  %v4180_v5 = vpop.f32.mrb[6].mxu1 }
 0x661   : >> { %v12583_v29 = vmov %v11860_v37  ;;  %v4181_v39 = vadd.f32 %v4180_v5, %v4050_v30  ;;  %v4182_v51 = vpop.f32.mrb[7].mxu1  ;;  %v12601_v5 = vmov %v4227_v27  ;;  %v11953_v31 = vpack.c.bf16 (%p11893_p7), %v4228_v28, %v4226_v26 }
 0x662   : >> { %v12584_v33 = vmov %v11863_v55  ;;  %v4229_v36 = vmax.f32 %v12583_v29, 0.0   ;;  %v4183_v47 = vadd.f32 %v4182_v51, %v4050_v30  ;;  %v12600_v51 = vmov %v4228_v28  ;;  %v4255_v28 = vld [vmem:[%s12605_s2 + $0x10] sm:$0xff] (%p11893_p7)  ;;  %v4256_v29 = vld [vmem:[%s12605_s2 + $0x18] sm:$0xff] (%p11893_p7)  ;;  %v4261_v5 = vld [vmem:[%s12607_s1] sm:$0xff] (%p11893_p7) }
 0x663   : >> { %v4230_v45 = vmax.f32 %v12584_v33, 0.0   ;;  %v11868_v34 = vadd.f32 %v10476_v34, %v4181_v39  ;;  %v11959_v30 = vpack.c.bf16 (%p11893_p7), %v4227_v27, %v4225_v48  ;;  %9059 = vmatprep.subr.bf16.mxu0 (%p11893_p7), %v11953_v31  ;;  %v4248_v48 = vld [vmem:[%s12604_s16 + $0x18] sm:$0xff] (%p11893_p7)  ;;  %v4254_v27 = vld [vmem:[%s12605_s2 + $0x8] sm:$0xff] (%p11893_p7)  ;;  %v4241_v33 = vld [vmem:[%s12606_s22] sm:$0xff] (%p11893_p7) }
 0x664   : >> { %v4216_v52 = vadd.f32 %v10472_v54, %v4183_v47  ;;  %v4186_v35 = vpop.f32.mrb[8].mxu1  ;;  %v4242_v51 = vld [vmem:[%s12606_s22 + $0x8] sm:$0xff] (%p11893_p7)  ;;  %v4264_v47 = vld [vmem:[%s12607_s1 + $0x18] sm:$0xff] (%p11893_p7) }
 0x665   : >> { %v12585_v49 = vmov %v11868_v34  ;;  %v4187_v37 = vadd.f32 %v4186_v35, %v4055_v50  ;;  %v4188_v46 = vpop.f32.mrb[9].mxu1  ;;  %9061 = vmatpush1.bf16.msra.mxu0 (%p11893_p7), %v11959_v30 }
 0x666   : >> { %v4231_v43 = vmax.f32 %v12585_v49, 0.0   ;;  %v4232_v61 = vmax.f32 %v4216_v52, 0.0   ;;  %v4189_v55 = vadd.f32 %v4188_v46, %v4055_v50  ;;  %v4243_v49 = vld [vmem:[%s12606_s22 + $0x10] sm:$0xff] (%p11893_p7)  ;;  %v4244_v50 = vld [vmem:[%s12606_s22 + $0x18] sm:$0xff] (%p11893_p7)  ;;  %v4257_v52 = vld [vmem:[%s12608_s15] sm:$0xff] (%p11893_p7) }
 0x667   : >> { %v11873_v40 = vadd.f32 %v10468_v40, %v4187_v37  ;;  %v12599_v37 = vmov %v4229_v36 }
 0x668   : >> { %v11876_v0 = vadd.f32 %v10464_v53, %v4189_v55  ;;  %v4192_v1 = vpop.f32.mrb[10].mxu1  ;;  %v12598_v55 = vmov %v4230_v45  ;;  %v11963_v39 = vpack.c.bf16 (%p11893_p7), %v4232_v61, %v4230_v45  ;;  %v4263_v45 = vld [vmem:[%s12607_s1 + $0x10] sm:$0xff] (%p11893_p7) }
 0x669   : >> { %v12586_v62 = vmov %v11873_v40  ;;  %v4193_v34 = vadd.f32 %v4192_v1, %v4060_v63  ;;  %v4194_v4 = vpop.f32.mrb[11].mxu1 }
 0x66a   : >> { %v4233_v2 = vmax.f32 %v12586_v62, 0.0   ;;  %v4234_v6 = vmax.f32 %v11876_v0, 0.0   ;;  %v4195_v54 = vadd.f32 %v4194_v4, %v4060_v63  ;;  %9063 = vmatprep.subr.bf16.mxu0 (%p11893_p7), %v11963_v39 }
 0x66b   : >> { %v11881_v7 = vadd.f32 %v10460_v38, %v4193_v34  ;;  %v12597_v34 = vmov %v4231_v43 }
 0x66c   : >> { %v4220_v10 = vadd.f32 %v10456_v56, %v4195_v54  ;;  %v4198_v11 = vpop.f32.mrb[12].mxu1  ;;  %v12596_v54 = vmov %v4232_v61 }
 0x66d   : >> { %v4235_v12 = vmax.f32 %v11881_v7, 0.0   ;;  %v4199_v40 = vadd.f32 %v4198_v11, %v4065_v9  ;;  %v4200_v53 = vpop.f32.mrb[13].mxu1 }
 0x66e   : >> { %v4236_v13 = vmax.f32 %v4220_v10, 0.0   ;;  %v4201_v14 = vadd.f32 %v4200_v53, %v4065_v9  ;;  %v12594_v53 = vmov %v4234_v6 }
 0x66f   : >> { %v11886_v16 = vadd.f32 %v10452_v44, %v4199_v40  ;;  %v12595_v40 = vmov %v4233_v2  ;;  %v11987_v26 = vpack.c.bf16 (%p11893_p7), %v4235_v12, %v4233_v2 }
 0x670   : >> { %v4222_v18 = vadd.f32 %v10448_v60, %v4201_v14  ;;  %v4204_v19 = vpop.f32.mrb[14].mxu1  ;;  %v11980_v20 = vpack.c.bf16 (%p11893_p7), %v4236_v13, %v4234_v6 }
 0x671   : >> { %v4237_v21 = vmax.f32 %v11886_v16, 0.0   ;;  %v4205_v38 = vadd.f32 %v4204_v19, %v4070_v17  ;;  %v4206_v22 = vpop.f32.mrb[15].mxu1 }
 0x672   : >> { %v4238_v8 = vmax.f32 %v4222_v18, 0.0   ;;  %v4207_v56 = vadd.f32 %v4206_v22, %v4070_v17  ;;  %3784 = sbr.rel (!%p11893_p7) target bundleno = 1140 (0x474), region = 588 }
 0x673   : >> { %v4223_v15 = vadd.f32 %v10444_v42, %v4205_v38  ;;  %v12591_v44 = vmov %v4237_v21  ;;  %v12593_v38 = vmov %v4235_v12 }
 0x674   : >> { %v4224_v25 = vadd.f32 %v10440_v58, %v4207_v56  ;;  %v12590_v60 = vmov %v4238_v8  ;;  %v12592_v56 = vmov %v4236_v13  ;;  %v4247_v44 = vld [vmem:[%s12604_s16 + $0x10] sm:$0xff] (%p11893_p7) }
 0x675   : >> { %v4239_v59 = vmax.f32 %v4223_v15, 0.0   ;;  %v10697_v60 = vmov (%p11893_p7), 0.0   ;;  %4277 = vperm.xlu1 (%p11893_p7), %9866, %v4247_v44   ;;  %v4249_v56 = vld [vmem:[%s12609_s26] sm:$0xff] (%p11893_p7)  ;;  %v4250_v15 = vld [vmem:[%s12609_s26 + $0x8] sm:$0xff] (%p11893_p7) }
 0x676   : >> { %v4240_v3 = vmax.f32 %v4224_v25, 0.0   ;;  %4361 = vmatprep.mubr.f32.mxu0 (%p11893_p7), %v10697_v60  ;;  %4490 = vmatprep.mubr.f32.mxu1 (%p11893_p7), %v10697_v60  ;;  %v4251_v25 = vld [vmem:[%s12609_s26 + $0x10] sm:$0xff] (%p11893_p7) }
 0x677   : >> { %v12589_v42 = vmov %v4239_v59  ;;  %v11995_v32 = vpack.c.bf16 (%p11893_p7), %v4239_v59, %v4237_v21  ;;  %v4252_v59 = vld [vmem:[%s12609_s26 + $0x18] sm:$0xff] (%p11893_p7) }
 0x678   : >> { %v12588_v58 = vmov %v4240_v3  ;;  %v4245_v42 = vld [vmem:[%s12604_s16] sm:$0xff] (%p11893_p7)  ;;  %v11991_v57 = vpack.c.bf16 (%p11893_p7), %v4240_v3, %v4238_v8  ;;  %v4258_v3 = vld [vmem:[%s12608_s15 + $0x8] sm:$0xff] (%p11893_p7) }
 0x679   : > { %4267 = vperm.xlu0 %9865, %v4245_v42   ;;  %v11975_v58 = vpack.c.bf16 %v4231_v43, %v4229_v36  ;;  %4282 = vperm.xlu1 %9866, %v4248_v48   ;;  %v4262_v36 = vld [vmem:[%s12607_s1 + $0x8] sm:$0xff] }
 0x67b   : > { %9065 = vmatpush1.bf16.msra.mxu0 %v11975_v58 }
 0x67c   : > { %9067 = vmatprep.subr.bf16.mxu0 %v11980_v20 }
 0x67d   : > { %4272 = vperm.xlu0 %9865, %v4246_v23   ;;  %4401 = vperm.xlu1 %9866, %v4254_v27  }
 0x67f   : > { %9069 = vmatpush1.bf16.msra.mxu0 %v11987_v26 }
 0x680   : > { %9071 = vmatprep.subr.bf16.mxu0 %v11991_v57 }
 0x681   : > { %4396 = vperm.xlu0 %9865, %v4253_v24   ;;  %4411 = vperm.xlu1 %9866, %v4256_v29  }
 0x683   : > { %9073 = vmatpush1.bf16.msra.mxu0 %v11995_v32 }
 0x684   : > { %9083 = vmatprep.subr.bf16.mxu0 %v11953_v31 }
 0x685   : > { %4406 = vperm.xlu0 %9865, %v4255_v28   ;;  %4522 = vperm.xlu1 %9866, %v4262_v36  }
 0x686   : > { %8307 = vmatmul.mubr.msk.f32.vlgmr.msra.gmra.mrb[0].mxu0 %vm2880_vm5, %v4241_v33 }
 0x687   : > { %4367 = vmatprep.mubr.f32.mxu0 %v10697_v60  ;;  %9085 = vmatpush1.bf16.msra.mxu0 %v11959_v30 }
 0x688   : > { %9087 = vmatprep.subr.bf16.mxu0 %v11963_v39 }
 0x689   : > { %4517 = vperm.xlu0 %9865, %v4261_v5   ;;  %4532 = vperm.xlu1 %9866, %v4264_v47  }
 0x68a   : > { %8308 = vmatmul.mubr.msk.f32.gmra.mrb[2].mxu0 %vm2880_vm5, %v4242_v51 }
 0x68b   : > { %4373 = vmatprep.mubr.f32.mxu0 %v10697_v60  ;;  %9089 = vmatpush1.bf16.msra.mxu0 %v11975_v58 }
 0x68c   : > { %9091 = vmatprep.subr.bf16.mxu0 %v11980_v20 }
 0x68d   : > { %4527 = vperm.xlu0 %9865, %v4263_v45  }
 0x68e   : > { %8309 = vmatmul.mubr.msk.f32.gmra.mrb[4].mxu0 %vm2880_vm5, %v4243_v49 }
 0x68f   : > { %4379 = vmatprep.mubr.f32.mxu0 %v10697_v60  ;;  %9093 = vmatpush1.bf16.msra.mxu0 %v11987_v26 }
 0x690   : > { %9095 = vmatprep.subr.bf16.mxu0 %v11991_v57 }
 0x692   : > { %8310 = vmatmul.mubr.msk.f32.gmra.mrb[6].mxu0 %vm2880_vm5, %v4244_v50 }
 0x693   : > { %9097 = vmatpush1.bf16.msra.mxu0 %v11995_v32  ;;  %4611 = vmatprep.mubr.f32.mxu0 %v10697_v60 }
 0x696   : > { %8315 = vmatmul.mubr.msk.f32.vlgmr.msra.gmra.mrb[8].mxu0 %vm2880_vm5, %v4257_v52 }
 0x6f4   : > { %v4278_v1 = vpop.permute.xlu1 %4277 }
 0x6f8   : > { %v4268_v35 = vpop.permute.xlu0 %4267  ;;  %v4283_v40 = vpop.permute.xlu1 %4282 }
 0x6fc   : > { %v4273_v61 = vpop.permute.xlu0 %4272 }
 0x700   : > { %v4397_v44 = vpop.permute.xlu0 %4396 }
 0x759   : > { %v4363_v43 = vpop.f32.mrb[0].mxu0 }
 0x75a   : > { %v4365_v37 = vpop.f32.mrb[1].mxu0  ;;  %v4364_v46 = vadd.f32 %v4363_v43, %v4268_v35 }
 0x75b   : > { %v4366_v55 = vadd.f32 %v4365_v37, %v4268_v35 }
 0x75c   : > { %v4386_v34 = vmax.f32 %v4364_v46, 0.0 }
 0x75d   : > { %v4369_v62 = vpop.f32.mrb[2].mxu0  ;;  %v4387_v6 = vmax.f32 %v4366_v55, 0.0 }
 0x75e   : > { %v4370_v63 = vadd.f32 %v4369_v62, %v4273_v61  ;;  %v4371_v0 = vpop.f32.mrb[3].mxu0 }
 0x75f   : > { %v4372_v2 = vadd.f32 %v4371_v0, %v4273_v61 }
 0x760   : > { %v4388_v4 = vmax.f32 %v4370_v63, 0.0 }
 0x761   : > { %v4389_v54 = vmax.f32 %v4372_v2, 0.0  ;;  %v4375_v7 = vpop.f32.mrb[4].mxu0 }
 0x762   : > { %v4377_v9 = vpop.f32.mrb[5].mxu0  ;;  %v9076_v10 = vpack.c.bf16 %v4388_v4, %v4386_v34  ;;  %v4376_v12 = vadd.f32 %v4375_v7, %v4278_v1 }
 0x763   : > { %v9074_v11 = vpack.c.bf16 %v4389_v54, %v4387_v6  ;;  %v4378_v53 = vadd.f32 %v4377_v9, %v4278_v1 }
 0x764   : > { %v4390_v18 = vmax.f32 %v4376_v12, 0.0 }
 0x765   : > { %v4381_v13 = vpop.f32.mrb[6].mxu0  ;;  %9075 = vmatprep.subr.bf16.mxu1 %v9074_v11  ;;  %v4391_v21 = vmax.f32 %v4378_v53, 0.0 }
 0x766   : > { %v4382_v14 = vadd.f32 %v4381_v13, %v4283_v40  ;;  %v4383_v16 = vpop.f32.mrb[7].mxu0  ;;  %9077 = vmatpush1.bf16.msra.mxu1 %v9076_v10 }
 0x767   : > { %v4384_v17 = vadd.f32 %v4383_v16, %v4283_v40 }
 0x768   : > { %v4392_v19 = vmax.f32 %v4382_v14, 0.0 }
 0x769   : > { %v4393_v38 = vmax.f32 %v4384_v17, 0.0 }
 0x76a   : > { %v9080_v22 = vpack.c.bf16 %v4392_v19, %v4390_v18 }
 0x76b   : > { %v9078_v8 = vpack.c.bf16 %v4393_v38, %v4391_v21 }
 0x76d   : > { %9079 = vmatprep.subr.bf16.mxu1 %v9078_v8 }
 0x76e   : > { %9081 = vmatpush1.bf16.msra.mxu1 %v9080_v22 }
 0x76f   : > { %9227 = vmatprep.subr.bf16.mxu1 %v11953_v31  ;;  %v4259_v31 = vld [vmem:[%s12608_s15 + $0x10] sm:$0xff] }
 0x771   : > { %8311 = vmatmul.mubr.msk.f32.vlgmr.msra.gmra.mrb[0].mxu1 %vm2560_vm0, %v4249_v56 }
 0x772   : > { %9231 = vmatpush1.bf16.msra.mxu1 %v11959_v30  ;;  %4496 = vmatprep.mubr.f32.mxu1 %v10697_v60  ;;  %v4260_v30 = vld [vmem:[%s12608_s15 + $0x18] sm:$0xff] }
 0x773   : > { %9228 = vmatprep.subr.bf16.mxu1 %v11963_v39  ;;  %v4613_v39 = vpop.f32.mrb[8].mxu0 }
 0x774   : > { %v4615_v42 = vpop.f32.mrb[9].mxu0 }
 0x775   : > { %8312 = vmatmul.mubr.msk.f32.gmra.mrb[2].mxu1 %vm2560_vm0, %v4250_v15 }
 0x776   : > { %9232 = vmatpush1.bf16.msra.mxu1 %v11975_v58  ;;  %4502 = vmatprep.mubr.f32.mxu1 %v10697_v60  ;;  %v4407_v58 = vpop.permute.xlu0 %4406 }
 0x777   : > { %9229 = vmatprep.subr.bf16.mxu1 %v11980_v20 }
 0x779   : > { %8313 = vmatmul.mubr.msk.f32.gmra.mrb[4].mxu1 %vm2560_vm0, %v4251_v25 }
 0x77a   : > { %9233 = vmatpush1.bf16.msra.mxu1 %v11987_v26  ;;  %4508 = vmatprep.mubr.f32.mxu1 %v10697_v60  ;;  %v4402_v26 = vpop.permute.xlu1 %4401  ;;  %v4518_v24 = vpop.permute.xlu0 %4517 }
 0x77b   : > { %9230 = vmatprep.subr.bf16.mxu1 %v11991_v57 }
 0x77d   : > { %8314 = vmatmul.mubr.msk.f32.gmra.mrb[6].mxu1 %vm2560_vm0, %v4252_v59 }
 0x77e   : > { %9234 = vmatpush1.bf16.msra.mxu1 %v11995_v32  ;;  %4617 = vmatprep.mubr.f32.mxu1 %v10697_v60  ;;  %v4412_v5 = vpop.permute.xlu1 %4411  ;;  %v4528_v47 = vpop.permute.xlu0 %4527 }
 0x77f   : > { %v9245_v43 = vadd.f32 %v4528_v47, %v4407_v58 }
 0x781   : > { %8316 = vmatmul.mubr.msk.f32.vlgmr.msra.gmra.mrb[2].mxu1 %vm2880_vm5, %v4258_v3 }
 0x782   : > { %4623 = vmatprep.mubr.f32.mxu1 %v10697_v60  ;;  %v4523_v51 = vpop.permute.xlu1 %4522 }
 0x783   : > { %v9241_v45 = vadd.f32 %v4523_v51, %v4402_v26 }
 0x785   : > { %8317 = vmatmul.mubr.msk.f32.gmra.mrb[4].mxu1 %vm2880_vm5, %v4259_v31 }
 0x786   : > { %4629 = vmatprep.mubr.f32.mxu1 %v10697_v60  ;;  %v4533_v46 = vpop.permute.xlu1 %4532 }
 0x787   : > { %v9249_v1 = vadd.f32 %v4533_v46, %v4412_v5 }
 0x789   : > { %8318 = vmatmul.mubr.msk.f32.gmra.mrb[6].mxu1 %vm2880_vm5, %v4260_v30 }
 0x844   : > { %v4492_v23 = vpop.f32.mrb[0].mxu1 }
 0x845   : > { %v4493_v20 = vadd.f32 %v4492_v23, %v4397_v44  ;;  %v4494_v48 = vpop.f32.mrb[1].mxu1 }
 0x846   : > { %v4495_v57 = vadd.f32 %v4494_v48, %v4397_v44 }
 0x847   : > { %v9236_v27 = vadd.f32 %v4518_v24, %v4493_v20 }
 0x848   : > { %v9239_v32 = vadd.f32 %v4518_v24, %v4495_v57 }
 0x849   : > { %v9237_v28 = vadd.f32 %v9236_v27, %v4613_v39 }
 0x84a   : > { %v9240_v29 = vadd.f32 %v9239_v32, %v4615_v42 }
 0x84b   : > { %v4644_v33 = vmax.f32 %v9237_v28, 0.0  }
 0x84c   : > { %v4645_v36 = vmax.f32 %v9240_v29, 0.0  }
 0x854   : > { %v4619_v49 = vpop.f32.mrb[2].mxu1 }
 0x855   : > { %v9242_v50 = vadd.f32 %v9241_v45, %v4619_v49  ;;  %v4621_v52 = vpop.f32.mrb[3].mxu1 }
 0x856   : > { %v9244_v35 = vadd.f32 %v9241_v45, %v4621_v52 }
 0x857   : > { %v4646_v37 = vmax.f32 %v9242_v50, 0.0  }
 0x858   : > { %v4647_v61 = vmax.f32 %v9244_v35, 0.0   ;;  %v4625_v55 = vpop.f32.mrb[4].mxu1 }
 0x859   : > { %v9246_v62 = vadd.f32 %v9245_v43, %v4625_v55  ;;  %v4627_v63 = vpop.f32.mrb[5].mxu1 }
 0x85a   : > { %v9248_v0 = vadd.f32 %v9245_v43, %v4627_v63 }
 0x85b   : > { %v4648_v2 = vmax.f32 %v9246_v62, 0.0  }
 0x85c   : > { %v4649_v34 = vmax.f32 %v9248_v0, 0.0   ;;  %v4631_v4 = vpop.f32.mrb[6].mxu1 }
 0x85d   : > { %v9250_v6 = vadd.f32 %v9249_v1, %v4631_v4  ;;  %v4633_v54 = vpop.f32.mrb[7].mxu1 }
 0x85e   : > { %v9252_v7 = vadd.f32 %v9249_v1, %v4633_v54 }
 0x85f   : > { %v4650_v9 = vmax.f32 %v9250_v6, 0.0  }
 0x860   : > { %v4651_v10 = vmax.f32 %v9252_v7, 0.0  }
 0x861 LB: >> { %s12610_s18 = sld [smem:[#allocation45_spill]]  ;;  %s12611_s11 = sld [smem:[#allocation44_spill]]  ;;  %v9098_v11 = vpack.c.bf16 %v10524_v61, %v10532_v36  ;;  %v9100_v12 = vpack.c.bf16 %v10528_v37, %v10536_v33  ;;  %v9102_v40 = vpack.c.bf16 %v10508_v10, %v10516_v34  ;;  %v9104_v53 = vpack.c.bf16 %v10512_v9, %v10520_v2  ;;  %s10540_s28 = sphi %s12071_s28, %s4657_s28   ;;  %v10536_v33 = vphi %v4644_v33, %v12621_v33   ;;  %v10532_v36 = vphi %v4645_v36, %v12620_v36   ;;  %v10528_v37 = vphi %v4646_v37, %v12619_v37   ;;  %v10524_v61 = vphi %v4647_v61, %v12618_v61   ;;  %v10520_v2 = vphi %v4648_v2, %v12617_v2   ;;  %v10516_v34 = vphi %v4649_v34, %v12616_v34   ;;  %v10512_v9 = vphi %v4650_v9, %v12615_v9   ;;  %v10508_v10 = vphi %v4651_v10, %v12614_v10  }
 0x862   : >> { %s12105_s0 = sshll.u32 %s10540_s28, 5  ;;  %v10698_v13 = vmov 0.0   ;;  %s12612_s1 = sld [smem:[#allocation47_spill]]  ;;  %v10699_v17 = vmov 0  }
 0x863   : >> { %9099 = vmatprep.subr.bf16.mxu0 %v9098_v11  ;;  %4773 = vmatprep.mubr.f32.mxu0 %v10698_v13  ;;  %s4657_s28 = sadd.s32 1, %s10540_s28  }
 0x864   : >> { %9101 = vmatpush1.bf16.msra.mxu0 %v9100_v12  ;;  %9867 = vset.pattern.permute.xlu0 %v10699_v17  ;;  %p4654_p3 = scmp.ge.s32.totalorder %s4657_s28, 10  }
 0x865   : >> { %9103 = vmatprep.subr.bf16.mxu0 %v9102_v40  ;;  %9868 = vset.pattern.permute.xlu1 %v10699_v17  ;;  %s12626_s28 = sld [smem:[#allocation50_spill]] (%p4654_p3)  ;;  %vm5072_vm7 = vcmask (%p4654_p3), 130048  }
 0x866   : >> { %4912 = vmatprep.mubr.f32.mxu1 %v10698_v13 }
 0x867   : >> { %s4672_s23 = scalar_lea.vmem %s12610_s18, %s12105_s0  ;;  %s4667_s2 = scalar_lea.vmem %s12611_s11, %s12105_s0 }
 0x868   : >> { %v4673_v14 = vld [vmem:[%s4672_s23] sm:$0xff]  ;;  %v4675_v16 = vld [vmem:[%s4672_s23 + $0x10] sm:$0xff]  ;;  %v4674_v18 = vld [vmem:[%s4672_s23 + $0x8] sm:$0xff]  ;;  %9105 = vmatpush1.bf16.msra.mxu0 %v9104_v53  ;;  %s4811_s18 = scalar_lea.vmem %s12612_s1, %s12105_s0  ;;  %s12622_s1 = sld [smem:[#allocation49_spill]] (%p4654_p3) }
 0x869   : >> { %4679 = vperm.xlu0 %9867, %v4673_v14   ;;  %4689 = vperm.xlu1 %9868, %v4675_v16   ;;  %v4668_v19 = vld [vmem:[%s4667_s2] sm:$0xff]  ;;  %v4676_v21 = vld [vmem:[%s4672_s23 + $0x18] sm:$0xff]  ;;  %v4669_v22 = vld [vmem:[%s4667_s2 + $0x8] sm:$0xff]  ;;  %s12613_s23 = sld [smem:[#allocation46_spill]]  ;;  %s12623_s11 = sld [smem:[#allocation51_spill]] (%p4654_p3) }
 0x86a   : >> { %v4812_v38 = vld [vmem:[%s4811_s18] sm:$0xff]  ;;  %v4813_v8 = vld [vmem:[%s4811_s18 + $0x8] sm:$0xff]  ;;  %v4814_v56 = vld [vmem:[%s4811_s18 + $0x10] sm:$0xff] }
 0x86b   : >> { %8320 = vmatmul.mubr.msk.f32.vlgmr.msra.gmra.mrb[0].mxu0 %vm2560_vm0, %v4668_v19  ;;  %v4670_v15 = vld [vmem:[%s4667_s2 + $0x10] sm:$0xff]  ;;  %v4815_v25 = vld [vmem:[%s4811_s18 + $0x18] sm:$0xff]  ;;  %s12625_s18 = sld [smem:[#allocation53_spill]] (%p4654_p3) }
 0x86c   : >> { %4779 = vmatprep.mubr.f32.mxu0 %v10698_v13  ;;  %v4671_v59 = vld [vmem:[%s4667_s2 + $0x18] sm:$0xff] }
 0x86d   : >> { %4684 = vperm.xlu0 %9867, %v4674_v18   ;;  %4694 = vperm.xlu1 %9868, %v4676_v21  }
 0x86f   : >> { %8321 = vmatmul.mubr.msk.f32.gmra.mrb[2].mxu0 %vm2560_vm0, %v4669_v22  ;;  %s4806_s2 = scalar_lea.vmem %s12613_s23, %s12105_s0  ;;  %s12624_s0 = sld [smem:[#allocation48_spill]] (%p4654_p3) }
 0x870   : >> { %4785 = vmatprep.mubr.f32.mxu0 %v10698_v13  ;;  %v4807_v4 = vld [vmem:[%s4806_s2] sm:$0xff]  ;;  %v4808_v6 = vld [vmem:[%s4806_s2 + $0x8] sm:$0xff]  ;;  %v4809_v54 = vld [vmem:[%s4806_s2 + $0x10] sm:$0xff]  ;;  %s12627_s23 = sld [smem:[#allocation52_spill]] (%p4654_p3) }
 0x871   : >> { %4818 = vperm.xlu0 %9867, %v4812_v38   ;;  %4823 = vperm.xlu1 %9868, %v4813_v8   ;;  %v4810_v7 = vld [vmem:[%s4806_s2 + $0x18] sm:$0xff]  ;;  %s12196_s2 = smov (%p4654_p3), 0  }
 0x873   : >> { %8322 = vmatmul.mubr.msk.f32.gmra.mrb[4].mxu0 %vm2560_vm0, %v4670_v15 }
 0x874   : >> { %4791 = vmatprep.mubr.f32.mxu0 %v10698_v13 }
 0x875   : >> { %4828 = vperm.xlu0 %9867, %v4814_v56   ;;  %4833 = vperm.xlu1 %9868, %v4815_v25  }
 0x877   : >> { %8323 = vmatmul.mubr.msk.f32.gmra.mrb[6].mxu0 %vm2560_vm0, %v4671_v59 }
 0x878   : > { %5045 = vmatprep.mubr.f32.mxu0 (%p4654_p3), %v10697_v60 }
 0x879   : > { %9869 = vset.pattern.permute.xlu0 (%p4654_p3), %v10692_v41  ;;  %9870 = vset.pattern.permute.xlu1 (%p4654_p3), %v10692_v41 }
 0x8e8   : >> { %v4680_v3 = vpop.permute.xlu0 %4679  ;;  %v4690_v48 = vpop.permute.xlu1 %4689 }
 0x8ec   : >> { %v4685_v42 = vpop.permute.xlu0 %4684  ;;  %v4695_v47 = vpop.permute.xlu1 %4694 }
 0x8f0   : >> { %v4819_v11 = vpop.permute.xlu0 %4818  ;;  %v4824_v17 = vpop.permute.xlu1 %4823 }
 0x8f4   : >> { %v4829_v15 = vpop.permute.xlu0 %4828 }
 0x93e   : >> { %v4775_v31 = vpop.f32.mrb[0].mxu0 }
 0x93f   : >> { %v4777_v30 = vpop.f32.mrb[1].mxu0  ;;  %v4776_v39 = vadd.f32 %v4775_v31, %v4680_v3 }
 0x940   : >> { %v4778_v44 = vadd.f32 %v4777_v30, %v4680_v3 }
 0x941   : >> { %v4798_v24 = vmax.f32 %v4776_v39, 0.0 }
 0x942   : >> { %v4781_v58 = vpop.f32.mrb[2].mxu0  ;;  %v4799_v27 = vmax.f32 %v4778_v44, 0.0 }
 0x943   : >> { %v4782_v23 = vadd.f32 %v4781_v58, %v4685_v42  ;;  %v4783_v20 = vpop.f32.mrb[3].mxu0 }
 0x944   : >> { %v4784_v26 = vadd.f32 %v4783_v20, %v4685_v42 }
 0x945   : >> { %v4800_v57 = vmax.f32 %v4782_v23, 0.0 }
 0x946   : >> { %v4801_v32 = vmax.f32 %v4784_v26, 0.0  ;;  %v4787_v28 = vpop.f32.mrb[4].mxu0 }
 0x947   : >> { %v4789_v29 = vpop.f32.mrb[5].mxu0  ;;  %v9108_v5 = vpack.c.bf16 %v4800_v57, %v4798_v24  ;;  %v4788_v45 = vadd.f32 %v4787_v28, %v4690_v48 }
 0x948   : >> { %v9106_v51 = vpack.c.bf16 %v4801_v32, %v4799_v27  ;;  %v4790_v49 = vadd.f32 %v4789_v29, %v4690_v48 }
 0x949   : >> { %v4802_v46 = vmax.f32 %v4788_v45, 0.0  ;;  %v4954_v45 = vld [vmem:[%s12624_s0 + $0x8] sm:$0xff] (%p4654_p3) }
 0x94a   : >> { %v4793_v50 = vpop.f32.mrb[6].mxu0  ;;  %9107 = vmatprep.subr.bf16.mxu1 %v9106_v51  ;;  %v4803_v62 = vmax.f32 %v4790_v49, 0.0  ;;  %v4959_v51 = vld [vmem:[%s12623_s11] sm:$0xff] (%p4654_p3)  ;;  %v4964_v49 = vld [vmem:[%s12625_s18 + $0x8] sm:$0xff] (%p4654_p3) }
 0x94b   : >> { %v4794_v52 = vadd.f32 %v4793_v50, %v4695_v47  ;;  %v4795_v35 = vpop.f32.mrb[7].mxu0  ;;  %9109 = vmatpush1.bf16.msra.mxu1 %v9108_v5  ;;  %v4955_v5 = vld [vmem:[%s12622_s1] sm:$0xff] (%p4654_p3)  ;;  %5064 = vperm.xlu1 (%p4654_p3), %9870, %v4959_v51  }
 0x94c   : >> { %v4796_v43 = vadd.f32 %v4795_v35, %v4695_v47  ;;  %4967 = vperm.xlu0 (%p4654_p3), %9869, %v4955_v5   ;;  %v4960_v47 = vld [vmem:[%s12623_s11 + $0x8] sm:$0xff] (%p4654_p3) }
 0x94d   : >> { %v4804_v55 = vmax.f32 %v4794_v52, 0.0 }
 0x94e   : >> { %v4805_v63 = vmax.f32 %v4796_v43, 0.0 }
 0x94f   : >> { %v9112_v0 = vpack.c.bf16 %v4804_v55, %v4802_v46  ;;  %5069 = vperm.xlu1 (%p4654_p3), %9870, %v4960_v47  }
 0x950   : >> { %v9110_v1 = vpack.c.bf16 %v4805_v63, %v4803_v62 }
 0x952   : >> { %9111 = vmatprep.subr.bf16.mxu1 %v9110_v1 }
 0x953   : >> { %9113 = vmatpush1.bf16.msra.mxu1 %v9112_v0  ;;  %5163 = vperm.xlu1 (%p4654_p3), %9870, %v4964_v49  }
 0x956   : >> { %8324 = vmatmul.mubr.msk.f32.vlgmr.msra.gmra.mrb[0].mxu1 %vm2560_vm0, %v4807_v4 }
 0x957   : >> { %4918 = vmatprep.mubr.f32.mxu1 %v10698_v13 }
 0x95a   : >> { %8325 = vmatmul.mubr.msk.f32.gmra.mrb[2].mxu1 %vm2560_vm0, %v4808_v6 }
 0x95b   : >> { %4924 = vmatprep.mubr.f32.mxu1 %v10698_v13 }
 0x95e   : >> { %8326 = vmatmul.mubr.msk.f32.gmra.mrb[4].mxu1 %vm2560_vm0, %v4809_v54 }
 0x95f   : >> { %4930 = vmatprep.mubr.f32.mxu1 %v10698_v13 }
 0x962   : >> { %8327 = vmatmul.mubr.msk.f32.gmra.mrb[6].mxu1 %vm2560_vm0, %v4810_v7 }
 0x963   : > { %5143 = vmatprep.mubr.f32.mxu1 (%p4654_p3), %v10697_v60 }
 0x9cb   : > { %v4968_v50 = vpop.permute.xlu0 (%p4654_p3), %4967 }
 0xa29   : >> { %v4914_v12 = vpop.f32.mrb[0].mxu1 }
 0xa2a   : >> { %v4915_v40 = vadd.f32 %v4914_v12, %v4819_v11  ;;  %v4916_v53 = vpop.f32.mrb[1].mxu1 }
 0xa2b   : >> { %v4917_v14 = vadd.f32 %v4916_v53, %v4819_v11  ;;  %v4958_v53 = vld [vmem:[%s12626_s28 + $0x8] sm:$0xff] (%p4654_p3) }
 0xa2c   : >> { %v4937_v16 = vadd.f32 %v10536_v33, %v4915_v40  ;;  %v4957_v40 = vld [vmem:[%s12626_s28] sm:$0xff] (%p4654_p3) }
 0xa2d   : >> { %v4938_v18 = vadd.f32 %v10532_v36, %v4917_v14  ;;  %v4920_v19 = vpop.f32.mrb[2].mxu1  ;;  %v4834_v36 = vpop.permute.xlu1 %4833  ;;  %v4961_v14 = vld [vmem:[%s12627_s23] sm:$0xff] (%p4654_p3) }
 0xa2e   : >> { %v4945_v21 = vmax.f32 %v4937_v16, 0.0   ;;  %v4921_v38 = vadd.f32 %v4920_v19, %v4824_v17  ;;  %v4922_v22 = vpop.f32.mrb[3].mxu1  ;;  %v4962_v16 = vld [vmem:[%s12627_s23 + $0x8] sm:$0xff] (%p4654_p3) }
 0xa2f   : >> { %v4946_v8 = vmax.f32 %v4938_v18, 0.0   ;;  %v4923_v56 = vadd.f32 %v4922_v22, %v4824_v17 }
 0xa30   : >> { %v4939_v13 = vadd.f32 %v10528_v37, %v4921_v38 }
 0xa31   : >> { %v4940_v25 = vadd.f32 %v10524_v61, %v4923_v56  ;;  %v4926_v59 = vpop.f32.mrb[4].mxu1  ;;  %v5065_v17 = vpop.permute.xlu1 (%p4654_p3), %5064 }
 0xa32   : >> { %v4947_v3 = vmax.f32 %v4939_v13, 0.0   ;;  %v4927_v31 = vadd.f32 %v4926_v59, %v4829_v15  ;;  %v4928_v30 = vpop.f32.mrb[5].mxu1 }
 0xa33   : >> { %v4948_v39 = vmax.f32 %v4940_v25, 0.0   ;;  %v4929_v33 = vadd.f32 %v4928_v30, %v4829_v15 }
 0xa34   : >> { %v4941_v42 = vadd.f32 %v10520_v2, %v4927_v31  ;;  %v9116_v28 = vpack.c.bf16 (%p4654_p3), %v4947_v3, %v4945_v21 }
 0xa35   : >> { %v4942_v44 = vadd.f32 %v10516_v34, %v4929_v33  ;;  %v4932_v58 = vpop.f32.mrb[6].mxu1  ;;  %v12621_v33 = vmov %v4945_v21  ;;  %v9114_v32 = vpack.c.bf16 (%p4654_p3), %v4948_v39, %v4946_v8  ;;  %v5070_v18 = vpop.permute.xlu1 (%p4654_p3), %5069 }
 0xa36   : >> { %v4949_v23 = vmax.f32 %v4941_v42, 0.0   ;;  %v4933_v20 = vadd.f32 %v4932_v58, %v4834_v36  ;;  %v4934_v48 = vpop.f32.mrb[7].mxu1 }
 0xa37   : >> { %v4950_v26 = vmax.f32 %v4942_v44, 0.0   ;;  %v4935_v37 = vadd.f32 %v4934_v48, %v4834_v36  ;;  %v12620_v36 = vmov %v4946_v8  ;;  %4656 = sbr.rel (!%p4654_p3) target bundleno = 2145 (0x861), region = 599  ;;  %9115 = vmatprep.subr.bf16.mxu0 (%p4654_p3), %v9114_v32 }
 0xa38   : >> { %v4943_v24 = vadd.f32 %v10512_v9, %v4933_v20  ;;  %v12617_v2 = vmov %v4949_v23  ;;  %9117 = vmatpush1.bf16.msra.mxu0 (%p4654_p3), %v9116_v28 }
 0xa39   : >> { %v4944_v61 = vadd.f32 %v10508_v10, %v4935_v37  ;;  %v12616_v34 = vmov %v4950_v26  ;;  %v12619_v37 = vmov %v4947_v3  ;;  %v5164_v38 = vpop.permute.xlu1 (%p4654_p3), %5163 }
 0xa3a   : >> { %v4951_v57 = vmax.f32 %v4943_v24, 0.0   ;;  %v4956_v34 = vld [vmem:[%s12622_s1 + $0x8] sm:$0xff] (%p4654_p3)  ;;  %v9263_v15 = vadd.f32 (%p4654_p3), %v5164_v38, %v5070_v18 }
 0xa3b   : >> { %v4952_v27 = vmax.f32 %v4944_v61, 0.0   ;;  %v12618_v61 = vmov %v4948_v39  ;;  %4972 = vperm.xlu0 (%p4654_p3), %9869, %v4956_v34  }
 0xa3c   : >> { %v12615_v9 = vmov %v4951_v57  ;;  %v9120_v2 = vpack.c.bf16 (%p4654_p3), %v4951_v57, %v4949_v23 }
 0xa3d   : >> { %v12614_v10 = vmov %v4952_v27  ;;  %v9118_v29 = vpack.c.bf16 (%p4654_p3), %v4952_v27, %v4950_v26  ;;  %v4953_v9 = vld [vmem:[%s12624_s0] sm:$0xff] (%p4654_p3) }
 0xa3e   : > { %v4963_v10 = vld [vmem:[%s12625_s18] sm:$0xff] }
 0xa3f   : > { %9119 = vmatprep.subr.bf16.mxu0 %v9118_v29  ;;  %5158 = vperm.xlu0 %9869, %v4963_v10  }
 0xa40   : > { %9121 = vmatpush1.bf16.msra.mxu0 %v9120_v2 }
 0xa43   : > { %8328 = vmatmul.mubr.msk.f32.vlgmr.msra.gmra.mrb[0].mxu0 %vm2560_vm0, %v4953_v9 }
 0xa44   : > { %5051 = vmatprep.mubr.f32.mxu0 %v10697_v60 }
 0xa47   : > { %8329 = vmatmul.mubr.msk.f32.gmra.mrb[2].mxu0 %vm2560_vm0, %v4954_v45 }
 0xaba   : > { %v4973_v46 = vpop.permute.xlu0 %4972 }
 0xabe   : > { %v5159_v19 = vpop.permute.xlu0 %5158 }
 0xabf   : > { %v9259_v21 = vadd.f32 %v5159_v19, %v5065_v17 }
 0xb16   : > { %v5047_v52 = vpop.f32.mrb[0].mxu0 }
 0xb17   : > { %v5049_v35 = vpop.f32.mrb[1].mxu0  ;;  %v5048_v43 = vadd.f32 %v5047_v52, %v4968_v50 }
 0xb18   : > { %v5050_v55 = vadd.f32 %v5049_v35, %v4968_v50 }
 0xb19   : > { %v5058_v4 = vmax.f32 %v5048_v43, 0.0 }
 0xb1a   : > { %v5053_v62 = vpop.f32.mrb[2].mxu0  ;;  %v5059_v54 = vmax.f32 %v5050_v55, 0.0 }
 0xb1b   : > { %v5054_v63 = vadd.f32 %v5053_v62, %v4973_v46  ;;  %v5055_v0 = vpop.f32.mrb[3].mxu0 }
 0xb1c   : > { %v5056_v1 = vadd.f32 %v5055_v0, %v4973_v46 }
 0xb1d   : > { %v5060_v6 = vmax.f32 %v5054_v63, 0.0 }
 0xb1e   : > { %v5061_v7 = vmax.f32 %v5056_v1, 0.0 }
 0xb1f   : > { %v9124_v11 = vpack.c.bf16 %v5060_v6, %v5058_v4 }
 0xb20   : > { %v9122_v12 = vpack.c.bf16 %v5061_v7, %v5059_v54 }
 0xb22   : > { %9123 = vmatprep.subr.bf16.mxu1 %v9122_v12 }
 0xb23   : > { %9125 = vmatpush1.bf16.msra.mxu1 %v9124_v11 }
 0xb24   : > { %9127 = vmatprep.subr.bf16.mxu1 %v9114_v32 }
 0xb26   : > { %8330 = vmatmul.mubr.msk.f32.vlgmr.msra.gmra.mrb[0].mxu1 %vm5072_vm7, %v4957_v40 }
 0xb27   : > { %9129 = vmatpush1.bf16.msra.mxu1 %v9116_v28  ;;  %5149 = vmatprep.mubr.f32.mxu1 %v10697_v60 }
 0xb28   : > { %9131 = vmatprep.subr.bf16.mxu1 %v9118_v29 }
 0xb2a   : > { %8331 = vmatmul.mubr.msk.f32.gmra.mrb[2].mxu1 %vm5072_vm7, %v4958_v53 }
 0xb2b   : > { %9133 = vmatpush1.bf16.msra.mxu1 %v9120_v2  ;;  %5236 = vmatprep.mubr.f32.mxu1 %v10697_v60 }
 0xb2e   : > { %8332 = vmatmul.mubr.msk.f32.vlgmr.msra.gmra.mrb[0].mxu1 %vm2560_vm0, %v4961_v14 }
 0xb2f   : > { %5242 = vmatprep.mubr.f32.mxu1 %v10697_v60 }
 0xb32   : > { %8333 = vmatmul.mubr.msk.f32.gmra.mrb[2].mxu1 %vm2560_vm0, %v4962_v16 }
 0xc01   : > { %v5238_v22 = vpop.f32.mrb[0].mxu1 }
 0xc02   : > { %v9260_v8 = vadd.f32 %v9259_v21, %v5238_v22  ;;  %v5240_v56 = vpop.f32.mrb[1].mxu1 }
 0xc03   : > { %v9262_v13 = vadd.f32 %v9259_v21, %v5240_v56 }
 0xc04   : > { %v5253_v25 = vmax.f32 %v9260_v8, 0.0  }
 0xc05   : > { %v5254_v59 = vmax.f32 %v9262_v13, 0.0   ;;  %v5244_v3 = vpop.f32.mrb[2].mxu1 }
 0xc06   : > { %v9264_v31 = vadd.f32 %v9263_v15, %v5244_v3  ;;  %v5246_v30 = vpop.f32.mrb[3].mxu1 }
 0xc07   : > { %v9266_v39 = vadd.f32 %v9263_v15, %v5246_v30 }
 0xc08   : > { %v5255_v33 = vmax.f32 %v9264_v31, 0.0  }
 0xc09   : > { %v5256_v42 = vmax.f32 %v9266_v39, 0.0  }
 0xc0a LB: >> { %s12628_s0 = sld [smem:[#allocation54_spill]]  ;;  %s12629_s1 = sld [smem:[#allocation55_spill]]  ;;  %v9134_v36 = vpack.c.bf16 %v10544_v42, %v10552_v59  ;;  %v9136_v44 = vpack.c.bf16 %v10548_v33, %v10556_v25  ;;  %v10700_v58 = vmov 0.0   ;;  %v10701_v23 = vmov 0   ;;  %s10560_s2 = sphi %s12196_s2, %s5262_s2   ;;  %v10556_v25 = vphi %v5253_v25, %v12635_v25   ;;  %v10552_v59 = vphi %v5254_v59, %v12634_v59   ;;  %v10548_v33 = vphi %v5255_v33, %v12633_v33   ;;  %v10544_v42 = vphi %v5256_v42, %v12632_v42  }
 0xc0b   : >> { %s12212_s3 = sshll.u32 %s10560_s2, 4  ;;  %5354 = vmatprep.mubr.f32.mxu0 %v10700_v58  ;;  %s12630_s5 = sld [smem:[#allocation57_spill]]  ;;  %9871 = vset.pattern.permute.xlu0 %v10701_v23 }
 0xc0c   : >> { %9135 = vmatprep.subr.bf16.mxu0 %v9134_v36  ;;  %5457 = vmatprep.mubr.f32.mxu1 %v10700_v58  ;;  %s5262_s2 = sadd.s32 1, %s10560_s2  }
 0xc0d   : >> { %9137 = vmatpush1.bf16.msra.mxu0 %v9136_v44  ;;  %9872 = vset.pattern.permute.xlu1 %v10701_v23  ;;  %p5259_p2 = scmp.ge.s32.totalorder %s5262_s2, 10  }
 0xc0e   : > { %s12641_s2 = sld [smem:[#allocation62_spill]] (%p5259_p2)  ;;  %vm5570_vm8 = vcmask (%p5259_p2), 64512  }
 0xc10   : >> { %s5268_s4 = scalar_lea.vmem %s12628_s0, %s12212_s3  ;;  %s5271_s6 = scalar_lea.vmem %s12629_s1, %s12212_s3 }
 0xc11   : >> { %v5272_v20 = vld [vmem:[%s5271_s6] sm:$0xff]  ;;  %v5273_v26 = vld [vmem:[%s5271_s6 + $0x8] sm:$0xff]  ;;  %s5374_s0 = scalar_lea.vmem %s12630_s5, %s12212_s3  ;;  %s12631_s1 = sld [smem:[#allocation56_spill]] }
 0xc12   : >> { %v5269_v48 = vld [vmem:[%s5268_s4] sm:$0xff]  ;;  %5276 = vperm.xlu0 %9871, %v5272_v20   ;;  %v5270_v37 = vld [vmem:[%s5268_s4 + $0x8] sm:$0xff]  ;;  %s12637_s6 = sld [smem:[#allocation63_spill]] (%p5259_p2)  ;;  %s12638_s4 = sld [smem:[#allocation61_spill]] (%p5259_p2) }
 0xc13   : >> { %8335 = vmatmul.mubr.msk.f32.vlgmr.msra.gmra.mrb[0].mxu0 %vm5072_vm7, %v5269_v48  ;;  %v5375_v24 = vld [vmem:[%s5374_s0] sm:$0xff]  ;;  %v5376_v61 = vld [vmem:[%s5374_s0 + $0x8] sm:$0xff]  ;;  %s12639_s0 = sld [smem:[#allocation58_spill]] (%p5259_p2) }
 0xc14   : >> { %5360 = vmatprep.mubr.f32.mxu0 %v10700_v58  ;;  %5379 = vperm.xlu1 %9872, %v5375_v24  }
 0xc16   : >> { %5281 = vperm.xlu0 %9871, %v5273_v26  }
 0xc17   : >> { %8336 = vmatmul.mubr.msk.f32.gmra.mrb[2].mxu0 %vm5072_vm7, %v5270_v37  ;;  %s5371_s5 = scalar_lea.vmem %s12631_s1, %s12212_s3  ;;  %s12636_s3 = sld [smem:[#allocation59_spill]] (%p5259_p2) }
 0xc18   : >> { %5384 = vperm.xlu1 %9872, %v5376_v61   ;;  %v5372_v35 = vld [vmem:[%s5371_s5] sm:$0xff]  ;;  %v5373_v43 = vld [vmem:[%s5371_s5 + $0x8] sm:$0xff]  ;;  %5556 = vmatprep.mubr.f32.mxu0 (%p5259_p2), %v10697_v60  ;;  %s12640_s1 = sld [smem:[#allocation60_spill]] (%p5259_p2)  ;;  %s12253_s5 = smov (%p5259_p2), 0  }
 0xc19   : > { %v5483_v22 = vld [vmem:[%s12637_s6] sm:$0xff] (%p5259_p2) }
 0xc1a   : > { %9873 = vset.pattern.permute.xlu0 (%p5259_p2), %v10692_v41  ;;  %v5481_v8 = vld [vmem:[%s12638_s4] sm:$0xff] (%p5259_p2) }
 0xc1b   : > { %v5478_v56 = vld [vmem:[%s12639_s0] sm:$0xff] (%p5259_p2) }
 0xc1c   : > { %9874 = vset.pattern.permute.xlu1 (%p5259_p2), %v10692_v41 }
 0xc1d   : > { %v5479_v38 = vld [vmem:[%s12636_s3] sm:$0xff] (%p5259_p2)  ;;  %5647 = vperm.xlu1 (%p5259_p2), %9874, %v5483_v22  }
 0xc1e   : > { %5486 = vperm.xlu0 (%p5259_p2), %9873, %v5479_v38   ;;  %v5480_v39 = vld [vmem:[%s12640_s1] sm:$0xff] (%p5259_p2) }
 0xc22   : > { %5567 = vperm.xlu0 (%p5259_p2), %9873, %v5481_v8  }
 0xc91   : >> { %v5277_v57 = vpop.permute.xlu0 %5276 }
 0xc93   : >> { %v5380_v46 = vpop.permute.xlu1 %5379 }
 0xc95   : >> { %v5282_v29 = vpop.permute.xlu0 %5281 }
 0xc97   : >> { %v5385_v4 = vpop.permute.xlu1 %5384 }
 0xc9d   : > { %v5487_v13 = vpop.permute.xlu0 (%p5259_p2), %5486 }
 0xca1   : > { %v5568_v36 = vpop.permute.xlu0 (%p5259_p2), %5567 }
 0xce6   : >> { %v5356_v27 = vpop.f32.mrb[0].mxu0 }
 0xce7   : >> { %v5358_v32 = vpop.f32.mrb[1].mxu0  ;;  %v5357_v28 = vadd.f32 %v5356_v27, %v5277_v57 }
 0xce8   : >> { %v5359_v5 = vadd.f32 %v5358_v32, %v5277_v57 }
 0xce9   : >> { %v5367_v10 = vmax.f32 %v5357_v28, 0.0 }
 0xcea   : >> { %v5362_v51 = vpop.f32.mrb[2].mxu0  ;;  %v5368_v47 = vmax.f32 %v5359_v5, 0.0 }
 0xceb   : >> { %v5363_v2 = vadd.f32 %v5362_v51, %v5282_v29  ;;  %v5364_v34 = vpop.f32.mrb[3].mxu0 }
 0xcec   : >> { %v5365_v9 = vadd.f32 %v5364_v34, %v5282_v29 }
 0xced   : >> { %v5369_v45 = vmax.f32 %v5363_v2, 0.0 }
 0xcee   : >> { %v5370_v49 = vmax.f32 %v5365_v9, 0.0 }
 0xcef   : >> { %v9140_v50 = vpack.c.bf16 %v5369_v45, %v5367_v10 }
 0xcf0   : >> { %v9138_v52 = vpack.c.bf16 %v5370_v49, %v5368_v47 }
 0xcf2   : >> { %9139 = vmatprep.subr.bf16.mxu1 %v9138_v52 }
 0xcf3   : >> { %9141 = vmatpush1.bf16.msra.mxu1 %v9140_v50 }
 0xcf6   : >> { %8337 = vmatmul.mubr.msk.f32.vlgmr.msra.gmra.mrb[0].mxu1 %vm5072_vm7, %v5372_v35 }
 0xcf7   : >> { %5463 = vmatprep.mubr.f32.mxu1 %v10700_v58 }
 0xcfa   : >> { %8338 = vmatmul.mubr.msk.f32.gmra.mrb[2].mxu1 %vm5072_vm7, %v5373_v43 }
 0xcfb   : > { %5638 = vmatprep.mubr.f32.mxu1 (%p5259_p2), %v10697_v60 }
 0xdc9   : >> { %v5459_v55 = vpop.f32.mrb[0].mxu1 }
 0xdca   : >> { %v5460_v62 = vadd.f32 %v5459_v55, %v5380_v46  ;;  %v5461_v63 = vpop.f32.mrb[1].mxu1 }
 0xdcb   : >> { %v5462_v0 = vadd.f32 %v5461_v63, %v5380_v46 }
 0xdcc   : >> { %v5470_v1 = vadd.f32 %v10556_v25, %v5460_v62 }
 0xdcd   : >> { %v5471_v6 = vadd.f32 %v10552_v59, %v5462_v0  ;;  %v5465_v54 = vpop.f32.mrb[2].mxu1 }
 0xdce   : >> { %v5474_v7 = vmax.f32 %v5470_v1, 0.0   ;;  %v5466_v11 = vadd.f32 %v5465_v54, %v5385_v4  ;;  %v5467_v12 = vpop.f32.mrb[3].mxu1 }
 0xdcf   : >> { %v5475_v40 = vmax.f32 %v5471_v6, 0.0   ;;  %v5468_v53 = vadd.f32 %v5467_v12, %v5385_v4  ;;  %5261 = sbr.rel (!%p5259_p2) target bundleno = 3082 (0xc0a), region = 610 }
 0xdd0   : >> { %v5472_v14 = vadd.f32 %v10548_v33, %v5466_v11  ;;  %v12635_v25 = vmov %v5474_v7 }
 0xdd1   : >> { %v5473_v16 = vadd.f32 %v10544_v42, %v5468_v53  ;;  %v12634_v59 = vmov %v5475_v40 }
 0xdd2   : >> { %v5476_v17 = vmax.f32 %v5472_v14, 0.0  }
 0xdd3   : >> { %v5477_v18 = vmax.f32 %v5473_v16, 0.0  }
 0xdd4   : >> { %v12633_v33 = vmov %v5476_v17  ;;  %v9144_v21 = vpack.c.bf16 (%p5259_p2), %v5476_v17, %v5474_v7 }
 0xdd5   : >> { %v12632_v42 = vmov %v5477_v18  ;;  %v9142_v19 = vpack.c.bf16 (%p5259_p2), %v5477_v18, %v5475_v40  ;;  %v5482_v33 = vld [vmem:[%s12641_s2] sm:$0xff] (%p5259_p2) }
 0xdd6   : > { %v5648_v42 = vpop.permute.xlu1 %5647 }
 0xdd7   : > { %9143 = vmatprep.subr.bf16.mxu0 %v9142_v19  ;;  %v9271_v44 = vadd.f32 %v5648_v42, %v5568_v36 }
 0xdd8   : > { %9145 = vmatpush1.bf16.msra.mxu0 %v9144_v21 }
 0xddb   : > { %8339 = vmatmul.mubr.msk.f32.vlgmr.msra.gmra.mrb[0].mxu0 %vm5072_vm7, %v5478_v56 }
 0xeae   : > { %v5558_v15 = vpop.f32.mrb[0].mxu0 }
 0xeaf   : > { %v5559_v25 = vadd.f32 %v5558_v15, %v5487_v13  ;;  %v5560_v59 = vpop.f32.mrb[1].mxu0 }
 0xeb0   : > { %v5561_v3 = vadd.f32 %v5560_v59, %v5487_v13 }
 0xeb1   : > { %v5563_v30 = vmax.f32 %v5559_v25, 0.0 }
 0xeb2   : > { %v5564_v31 = vmax.f32 %v5561_v3, 0.0 }
 0xeb4   : > { %5574 = vmatprep.subr.mxu1 %v5564_v31 }
 0xeb5   : > { %5575 = vmatpush1.msra.mxu1 %v5563_v30 }
 0xeb6   : > { %8340 = vmatmul.mubr.msk.f32.vlgmr.msra.gmra.mrb[0].mxu1 %vm5570_vm8, %v5480_v39  ;;  %9147 = vmatprep.subr.bf16.mxu1 %v9142_v19 }
 0xeb7   : > { %9149 = vmatpush1.bf16.msra.mxu1 %v9144_v21  ;;  %5717 = vmatprep.mubr.f32.mxu1 %v10697_v60 }
 0xebe   : > { %8341 = vmatmul.mubr.msk.f32.vlgmr.msra.gmra.mrb[0].mxu1 %vm5072_vm7, %v5482_v33 }
 0xf91   : > { %v5719_v58 = vpop.f32.mrb[0].mxu1 }
 0xf92   : > { %v9272_v23 = vadd.f32 %v9271_v44, %v5719_v58  ;;  %v5721_v20 = vpop.f32.mrb[1].mxu1 }
 0xf93   : > { %v9274_v48 = vadd.f32 %v9271_v44, %v5721_v20 }
 0xf94   : > { %v5726_v26 = vmax.f32 %v9272_v23, 0.0  }
 0xf95   : > { %v5727_v37 = vmax.f32 %v9274_v48, 0.0  }
 0xf96   : > { %v10566_v61 = vmov %v5726_v26  }
 0xf97   : > { %v10562_v24 = vmov %v5727_v37  }
 0xf98 LB: >> { %s12642_s3 = sld [smem:[#allocation64_spill]]  ;;  %s12643_s6 = sld [smem:[#allocation65_spill]]  ;;  %v10702_v57 = vmov 0.0   ;;  %v10703_v27 = vmov 0   ;;  %5749 = vmatprep.subr.mxu0 %v10564_v24  ;;  %s10572_s5 = sphi %s12253_s5, %s5733_s5   ;;  %v10568_v61 = vphi %v10566_v61, %v10567_v61   ;;  %v10564_v24 = vphi %v10562_v24, %v10563_v24  }
 0xf99   : >> { %s12644_s4 = sld [smem:[#allocation67_spill]]  ;;  %5813 = vmatprep.mubr.f32.mxu0 %v10702_v57  ;;  %9875 = vset.pattern.permute.xlu0 %v10703_v27  ;;  %s8342_s0 = sshll.u32 %s10572_s5, 3 }
 0xf9a   : >> { %5898 = vmatprep.mubr.f32.mxu1 %v10702_v57  ;;  %s12645_s1 = sld [smem:[#allocation66_spill]]  ;;  %5750 = vmatpush1.msra.mxu0 %v10568_v61  ;;  %s5733_s5 = sadd.s32 1, %s10572_s5  }
 0xf9b   : >> { %p5730_p5 = scmp.ge.s32.totalorder %s5733_s5, 10  }
 0xf9c   : > { %6160 = vst.msk [vmem:[#allocation3] sm:$0xff] (%p5730_p5), %vm2880_vm5, %v10697_v60  ;;  %s12651_s5 = sld [smem:[#allocation70_spill]] (%p5730_p5)  ;;  %9877 = vset.pattern.permute.xlu1 (%p5730_p5), %v10692_v41  ;;  %v10704_v22 = vmov (%p5730_p5), 0.0|0.0   ;;  %vm10705_vm9 = vmmov (%p5730_p5), 0   ;;  %vm6162_vm10 = vcmask (%p5730_p5), 516096  }
 0xf9e   : >> { %s5737_s2 = scalar_lea.vmem %s12642_s3, %s8342_s0  ;;  %s5739_s8 = scalar_lea.vmem %s12643_s6, %s8342_s0 }
 0xf9f   : >> { %v5738_v32 = vld [vmem:[%s5737_s2] sm:$0xff]  ;;  %s5824_s9 = scalar_lea.vmem %s12644_s4, %s8342_s0  ;;  %s12649_s3 = sld [smem:[#allocation72_spill]] (%p5730_p5) }
 0xfa0   : >> { %v5740_v28 = vld [vmem:[%s5739_s8] sm:$0xff]  ;;  %8343 = vmatmul.mubr.msk.f32.vlgmr.msra.gmra.mrb[0].mxu0 %vm5570_vm8, %v5738_v32  ;;  %s5822_s11 = scalar_lea.vmem %s12645_s1, %s8342_s0  ;;  %s12647_s8 = sld [smem:[#allocation69_spill]] (%p5730_p5) }
 0xfa1   : >> { %5743 = vperm.xlu0 %9875, %v5740_v28   ;;  %v5825_v29 = vld [vmem:[%s5824_s9] sm:$0xff]  ;;  %s12646_s9 = sld [smem:[#allocation68_spill]] (%p5730_p5)  ;;  %5987 = vmatprep.mubr.f32.mxu0 (%p5730_p5), %v10697_v60  ;;  %s12650_s6 = sld [smem:[#allocation73_spill]] (%p5730_p5) }
 0xfa2   : >> { %v5823_v47 = vld [vmem:[%s5822_s11] sm:$0xff]  ;;  %s12648_s11 = sld [smem:[#allocation71_spill]] (%p5730_p5)  ;;  %s12652_s4 = sld [smem:[#allocation74_spill]] (%p5730_p5) }
 0xfa3   : > { %v5911_v17 = vld [vmem:[%s12651_s5] sm:$0xff] (%p5730_p5)  ;;  %s12653_s0 = sld [smem:[#allocation76_spill]] (%p5730_p5)  ;;  %s12654_s1 = smov (%p5730_p5), 64  }
 0xfa4   : > { %s12655_s2 = sld [smem:[#allocation75_spill]] (%p5730_p5) }
 0xfa5   : >> { %5828 = vperm.xlu0 %9875, %v5825_v29   ;;  %v5913_v6 = vld [vmem:[%s12649_s3] sm:$0xff] (%p5730_p5) }
 0xfa6   : > { %v5910_v1 = vld [vmem:[%s12647_s8] sm:$0xff] (%p5730_p5)  ;;  %s12657_s8 = sld [smem:[#allocation77_spill]] (%p5730_p5) }
 0xfa7   : > { %v5909_v0 = vld [vmem:[%s12646_s9] sm:$0xff] (%p5730_p5)  ;;  %s12656_s9 = sld [smem:[#allocation78_spill]] (%p5730_p5) }
 0xfa8   : > { %v5912_v4 = vld [vmem:[%s12648_s11] sm:$0xff] (%p5730_p5)  ;;  %v6180_v21 = vld [vmem:[%s12652_s4 + $0x8] sm:$0xff] (%p5730_p5)  ;;  %v6181_v38 = vld [vmem:[%s12652_s4 + $0x10] sm:$0xff] (%p5730_p5)  ;;  %s12327_s11 = smov (%p5730_p5), 0  }
 0xfa9   : > { %9876 = vset.pattern.permute.xlu0 (%p5730_p5), %v10692_v41  ;;  %v5914_v54 = vld [vmem:[%s12650_s6] sm:$0xff] (%p5730_p5)  ;;  %v6182_v56 = vld [vmem:[%s12652_s4 + $0x18] sm:$0xff] (%p5730_p5)  ;;  %v6184_v42 = vld [vmem:[%s12652_s4 + $0x28] sm:$0xff] (%p5730_p5) }
 0xfaa   : > { %5917 = vperm.xlu0 (%p5730_p5), %9876, %v5910_v1   ;;  %6077 = vperm.xlu1 (%p5730_p5), %9877, %v5914_v54   ;;  %v6179_v19 = vld [vmem:[%s12652_s4] sm:$0xff] (%p5730_p5)  ;;  %v9154_v13 = vpack.c.bf16 (%p5730_p5), %v6182_v56, %v6181_v38  ;;  %v6185_v23 = vld [vmem:[%s12652_s4 + $0x30] sm:$0xff] (%p5730_p5)  ;;  %v6186_v20 = vld [vmem:[%s12652_s4 + $0x38] sm:$0xff] (%p5730_p5) }
 0xfab   : > { %v9151_v8 = vpack.c.bf16 (%p5730_p5), %v6180_v21, %v6179_v19  ;;  %v6183_v33 = vld [vmem:[%s12652_s4 + $0x20] sm:$0xff] (%p5730_p5)  ;;  %v9160_v26 = vpack.c.bf16 (%p5730_p5), %v6186_v20, %v6185_v23  ;;  %v6189_v57 = vld [vmem:[%s12653_s0 + $0x8] sm:$0xff] (%p5730_p5) }
 0xfac   : > { %v9157_v44 = vpack.c.bf16 (%p5730_p5), %v6184_v42, %v6183_v33 }
 0xfae   : > { %5998 = vperm.xlu0 (%p5730_p5), %9876, %v5912_v4   ;;  %v6199_v4 = vld [vmem:[%s12656_s9 + $0x30] sm:$0xff] (%p5730_p5) }
0x1020   : >> { %v5744_v5 = vpop.permute.xlu0 %5743 }
0x1024   : >> { %v5829_v49 = vpop.permute.xlu0 %5828 }
0x1029   : > { %v5918_v7 = vpop.permute.xlu0 (%p5730_p5), %5917  ;;  %v6078_v59 = vpop.permute.xlu1 (%p5730_p5), %6077 }
0x102d   : > { %v5999_v15 = vpop.permute.xlu0 (%p5730_p5), %5998 }
0x1073   : >> { %v5815_v51 = vpop.f32.mrb[0].mxu0 }
0x1074   : >> { %v5816_v2 = vadd.f32 %v5815_v51, %v5744_v5  ;;  %v5817_v34 = vpop.f32.mrb[1].mxu0 }
0x1075   : >> { %v5818_v9 = vadd.f32 %v5817_v34, %v5744_v5  ;;  %v6191_v34 = vld [vmem:[%s12653_s0 + $0x18] sm:$0xff] (%p5730_p5) }
0x1076   : >> { %v5820_v45 = vmax.f32 %v5816_v2, 0.0  ;;  %v6190_v2 = vld [vmem:[%s12653_s0 + $0x10] sm:$0xff] (%p5730_p5) }
0x1077   : >> { %v5821_v10 = vmax.f32 %v5818_v9, 0.0  ;;  %v9166_v9 = vpack.c.bf16 (%p5730_p5), %v6191_v34, %v6190_v2 }
0x1079   : >> { %5834 = vmatprep.subr.mxu1 %v5821_v10  ;;  %v8348_v10 = vld [vmem:[%s12655_s2] ss:$0 sm:$0xff] (%p5730_p5) }
0x107a   : >> { %5835 = vmatpush1.msra.mxu1 %v5820_v45  ;;  %v6193_v45 = vld [vmem:[%s12656_s9] sm:$0xff] (%p5730_p5) }
0x107b   : >> { %8344 = vmatmul.mubr.msk.f32.vlgmr.msra.gmra.mrb[0].mxu1 %vm5570_vm8, %v5823_v47  ;;  %v6194_v47 = vld [vmem:[%s12656_s9 + $0x8] sm:$0xff] (%p5730_p5) }
0x107c   : > { %6147 = vmatprep.mubr.f32.mxu1 (%p5730_p5), %v10697_v60 }
0x114e   : >> { %v5900_v50 = vpop.f32.mrb[0].mxu1 }
0x114f   : >> { %v5901_v52 = vadd.f32 %v5900_v50, %v5829_v49  ;;  %v5902_v35 = vpop.f32.mrb[1].mxu1 }
0x1150   : >> { %v5903_v43 = vadd.f32 %v5902_v35, %v5829_v49  ;;  %5732 = sbr.rel (!%p5730_p5) target bundleno = 3992 (0xf98), region = 621  ;;  %v9169_v35 = vpack.c.bf16 (%p5730_p5), %v6194_v47, %v6193_v45 }
0x1151   : >> { %v5905_v46 = vadd.f32 %v10568_v61, %v5901_v52 }
0x1152   : >> { %v5906_v55 = vadd.f32 %v10564_v24, %v5903_v43 }
0x1153   : >> { %v5907_v62 = vmax.f32 %v5905_v46, 0.0   ;;  %v6195_v46 = vld [vmem:[%s12656_s9 + $0x10] sm:$0xff] (%p5730_p5) }
0x1154   : >> { %v5908_v63 = vmax.f32 %v5906_v55, 0.0   ;;  %v6196_v55 = vld [vmem:[%s12656_s9 + $0x18] sm:$0xff] (%p5730_p5) }
0x1155   : >> { %v10567_v61 = vmov %v5907_v62  }
0x1156   : >> { %v10563_v24 = vmov %v5908_v63   ;;  %5923 = vmatprep.subr.mxu0 (%p5730_p5), %v5908_v63  ;;  %6083 = vmatprep.subr.mxu1 (%p5730_p5), %v5908_v63  ;;  %v6188_v61 = vld [vmem:[%s12653_s0] sm:$0xff] (%p5730_p5) }
0x1157   : > { %5924 = vmatpush1.msra.mxu0 %v5907_v62  ;;  %6084 = vmatpush1.msra.mxu1 %v5907_v62  ;;  %v9163_v27 = vpack.c.bf16 %v6189_v57, %v6188_v61  ;;  %v9172_v62 = vpack.c.bf16 %v6196_v55, %v6195_v46  ;;  %v6197_v63 = vld [vmem:[%s12656_s9 + $0x20] sm:$0xff] }
0x1158   : > { %8345 = vmatmul.mubr.msk.f32.vlgmr.msra.gmra.mrb[0].mxu0 %vm5570_vm8, %v5909_v0  ;;  %8347 = vmatmul.mubr.msk.f32.vlgmr.msra.gmra.mrb[0].mxu1 %vm5570_vm8, %v5913_v6  ;;  %v6198_v0 = vld [vmem:[%s12656_s9 + $0x28] sm:$0xff]  ;;  %v6200_v6 = vld [vmem:[%s12656_s9 + $0x38] sm:$0xff] }
0x1159   : > { %6068 = vmatprep.mubr.f32.mxu0 %v10697_v60  ;;  %9162 = vmatprep.subr.bf16.mxu1 %v10704_v22  ;;  %v9175_v1 = vpack.c.bf16 %v6198_v0, %v6197_v63  ;;  %v9178_v54 = vpack.c.bf16 %v6200_v6, %v6199_v4 }
0x115a   : > { %8791 = vmatprep.mubr.msk.f32.mxu1 %vm10705_vm9, %v10697_v60  ;;  %9164 = vmatpush3.bf16.msra.mxu1 %v9163_v27 }
0x115b   : > { %9165 = vmatprep.subr.bf16.mxu1 %v10704_v22 }
0x115e   : > { %9167 = vmatpush3.bf16.msra.mxu1 %v9166_v9 }
0x115f   : > { %9168 = vmatprep.subr.bf16.mxu1 %v10704_v22 }
0x122b   : > { %v5989_v11 = vpop.f32.mrb[0].mxu0  ;;  %v6149_v41 = vpop.f32.mrb[0].mxu1 }
0x122c   : > { %v5990_v12 = vadd.f32 %v5989_v11, %v5918_v7  ;;  %v5991_v40 = vpop.f32.mrb[1].mxu0  ;;  %v6151_v18 = vpop.f32.mrb[1].mxu1  ;;  %v8352_v11 = vld [vmem:[#allocation4] ss:$0 sm:$0xff] }
0x122d   : > { %v5992_v53 = vadd.f32 %v5991_v40, %v5918_v7  ;;  %v8350_v7 = vld [vmem:[%s12657_s8] ss:$0 sm:$0xff] }
0x122e   : > { %v5994_v16 = vmax.f32 %v5990_v12, 0.0  ;;  %v9283_v12 = vadd.f32 %v8352_v11, %v8350_v7 }
0x122f   : > { %v5995_v14 = vmax.f32 %v5992_v53, 0.0 }
0x1231   : > { %6004 = vmatprep.subr.mxu0 %v5995_v14 }
0x1232   : > { %6005 = vmatpush1.msra.mxu0 %v5994_v16 }
0x1233   : > { %8346 = vmatmul.mubr.msk.f32.vlgmr.msra.gmra.mrb[2].mxu0 %vm5570_vm8, %v5911_v17  ;;  %9150 = vmatprep.subr.bf16.mxu0 %v10704_v22 }
0x1234   : > { %9152 = vmatpush3.bf16.msra.mxu0 %v9151_v8  ;;  %8780 = vmatprep.mubr.msk.f32.mxu0 %vm10705_vm9, %v10697_v60 }
0x1235   : > { %9153 = vmatprep.subr.bf16.mxu0 %v10704_v22 }
0x1238   : > { %9155 = vmatpush3.bf16.msra.mxu0 %v9154_v13 }
0x1239   : > { %9156 = vmatprep.subr.bf16.mxu0 %v10704_v22 }
0x123c   : > { %9158 = vmatpush3.bf16.msra.mxu0 %v9157_v44 }
0x123d   : > { %9159 = vmatprep.subr.bf16.mxu0 %v10704_v22 }
0x1240   : > { %9161 = vmatpush3.bf16.msra.mxu0 %v9160_v26 }
0x1306   : > { %v6070_v25 = vpop.f32.mrb[2].mxu0 }
0x1307   : > { %v6071_v3 = vadd.f32 %v6070_v25, %v5999_v15  ;;  %v6072_v31 = vpop.f32.mrb[3].mxu0 }
0x1308   : > { %v6073_v30 = vadd.f32 %v6072_v31, %v5999_v15 }
0x1309   : > { %v9278_v39 = vadd.f32 %v6078_v59, %v6071_v3 }
0x130a   : > { %v9281_v36 = vadd.f32 %v6078_v59, %v6073_v30 }
0x130b   : > { %v9279_v58 = vadd.f32 %v9278_v39, %v6149_v41 }
0x130c   : > { %v9282_v48 = vadd.f32 %v9281_v36, %v6151_v18 }
0x130d   : > { %v6156_v37 = vmax.f32 %v9279_v58, 0.0 }
0x130e   : > { %v6157_v24 = vmax.f32 %v9282_v48, 0.0 }
0x130f   : > { %6158 = vst [vmem:[#allocation2] sm:$0xff] %v6156_v37 }
0x1310   : > { %6159 = vst [vmem:[#allocation2 + $0x8] sm:$0xff] %v6157_v24 }
0x1316   : > { %v6164_v32 = vld [vmem:[#allocation2] ss:$0 sm:$0xff] }
0x1317   : > { %6166 = vrot.lane.b32.xlu1 %v6164_v32, %s12654_s1  ;;  %v6172_v28 = vld [vmem:[#allocation2 + $0x8] ss:$0 sm:$0xff]  ;;  %6163 = vst.msk [vmem:[#allocation3] sm:$0x1] %vm6162_vm10, %v6164_v32 }
0x1318   : > { %6174 = vrot.lane.b32.xlu0 %v6172_v28, %s12654_s1  ;;  %6171 = vst.msk [vmem:[#allocation3 + $0x2] sm:$0x1] %vm6162_vm10, %v6172_v28 }
0x1389   : > { %v6167_v29 = vpop.permute.xlu1 %6166 }
0x138a   : > { %6169 = vst.msk [vmem:[#allocation3 + $0x1] sm:$0x1] %vm6162_vm10, %v6167_v29  ;;  %v6175_v5 = vpop.permute.xlu0 %6174 }
0x138b   : > { %6177 = vst.msk [vmem:[#allocation3 + $0x3] sm:$0x1] %vm6162_vm10, %v6175_v5 }
0x1392   : > { %v6178_v51 = vld [vmem:[#allocation3] sm:$0xff] }
0x1393   : > { %8781 = vmatmul.mubr.msk.f32.vlgmr.msra.gmra.mrb[4].mxu0 %vm2880_vm5, %v6178_v51 }
0x1466   : > { %v6277_v49 = vpop.f32.mrb[4].mxu0 }
0x1467   : > { %v6278_v50 = vadd.f32 %v8348_v10, %v6277_v49  ;;  %v8782_v52 = vpop.f32.mrb[5].mxu0 }
0x1469   : > { %v6281_v43 = vmax.f32 %v6278_v50, 0.0 }
0x146b   : > { %8792 = vmatmul.mubr.msk.f32.vlgmr.msra.gmra.mrb[2].mxu1 %vm2560_vm0, %v6281_v43 }
0x146c   : > { %9170 = vmatpush3.bf16.msra.mxu1 %v9169_v35  ;;  %8810 = vmatprep.mubr.msk.f32.mxu1 %vm10705_vm9, %v10697_v60 }
0x146d   : > { %9171 = vmatprep.subr.bf16.mxu1 %v10704_v22 }
0x1470   : > { %9173 = vmatpush3.bf16.msra.mxu1 %v9172_v62 }
0x1471   : > { %9174 = vmatprep.subr.bf16.mxu1 %v10704_v22 }
0x1474   : > { %9176 = vmatpush3.bf16.msra.mxu1 %v9175_v1 }
0x1475   : > { %9177 = vmatprep.subr.bf16.mxu1 %v10704_v22 }
0x1478   : > { %9179 = vmatpush3.bf16.msra.mxu1 %v9178_v54 }
0x147b   : > { %8811 = vmatmul.mubr.msk.f32.vlgmr.msra.gmra.mrb[2].mxu1 %vm2880_vm5, %v6178_v51 }
0x154e   : > { %v6433_v40 = vpop.f32.mrb[2].mxu1 }
0x154f   : > { %v9284_v53 = vadd.f32 %v9283_v12, %v6433_v40  ;;  %v8812_v14 = vpop.f32.mrb[3].mxu1 }
0x1551   : > { %v6438_v16 = vmax.f32 %v9284_v53, 0.0  }
0x1553   : > { %v10574_v17 = vmov %v6438_v16  }
0x1554 LB: >> { %s12658_s3 = sld [smem:[#allocation79_spill]]  ;;  %s12659_s6 = sld [smem:[#allocation81_spill]]  ;;  %v10706_v41 = vmov 0.0|0.0   ;;  %vm10707_vm11 = vmmov 0   ;;  %v10708_v18 = vmov 0.0   ;;  %s10580_s11 = sphi %s12327_s11, %s6444_s11   ;;  %v10576_v17 = vphi %v10574_v17, %v10575_v17  }
0x1555   : >> { %9180 = vmatprep.subr.bf16.mxu0 %v10706_v41  ;;  %8821 = vmatprep.mubr.msk.f32.mxu0 %vm10707_vm11, %v10708_v18  ;;  %s8354_s5 = sshll.u32 %s10580_s11, 5  ;;  %s12660_s8 = sld [smem:[#allocation80_spill]] }
0x1556   : >> { %9186 = vmatprep.subr.bf16.mxu1 %v10706_v41  ;;  %8832 = vmatprep.mubr.msk.f32.mxu1 %vm10707_vm11, %v10708_v18  ;;  %s12661_s0 = sld [smem:[#allocation82_spill]] }
0x155a   : >> { %s6447_s1 = scalar_lea.vmem %s12658_s3, %s8354_s5  ;;  %s6534_s2 = scalar_lea.vmem %s12659_s6, %s8354_s5 }
0x155b   : >> { %v6448_v19 = vld [vmem:[%s6447_s1] sm:$0xff]  ;;  %v6449_v21 = vld [vmem:[%s6447_s1 + $0x8] sm:$0xff]  ;;  %v6450_v38 = vld [vmem:[%s6447_s1 + $0x10] sm:$0xff]  ;;  %s6452_s3 = scalar_lea.vmem %s12660_s8, %s10580_s11 }
0x155c   : >> { %v9181_v8 = vpack.c.bf16 %v6449_v21, %v6448_v19  ;;  %v6451_v56 = vld [vmem:[%s6447_s1 + $0x18] sm:$0xff]  ;;  %v6535_v13 = vld [vmem:[%s6534_s2] sm:$0xff]  ;;  %v6536_v15 = vld [vmem:[%s6534_s2 + $0x8] sm:$0xff]  ;;  %s6539_s6 = scalar_lea.vmem %s12661_s0, %s10580_s11  ;;  %s6444_s11 = sadd.s32 1, %s10580_s11  }
0x155d   : >> { %v9187_v25 = vpack.c.bf16 %v6536_v15, %v6535_v13  ;;  %v9184_v59 = vpack.c.bf16 %v6451_v56, %v6450_v38  ;;  %v6537_v3 = vld [vmem:[%s6534_s2 + $0x10] sm:$0xff]  ;;  %v6538_v31 = vld [vmem:[%s6534_s2 + $0x18] sm:$0xff]  ;;  %v8355_v39 = vld [vmem:[%s6452_s3] ss:$0 sm:$0xff]  ;;  %p6441_p13 = scmp.ge.s32.totalorder %s6444_s11, 10  }
0x155e   : >> { %9182 = vmatpush3.bf16.msra.mxu0 %v9181_v8  ;;  %v9190_v30 = vpack.c.bf16 %v6538_v31, %v6537_v3  ;;  %v8357_v58 = vld [vmem:[%s6539_s6] ss:$0 sm:$0xff]  ;;  %s12662_s5 = sld [smem:[#allocation83_spill]] (%p6441_p13)  ;;  %s12663_s1 = sld [smem:[#allocation84_spill]] (%p6441_p13)  ;;  %v8359_v2 = vld [vmem:[#allocation6] ss:$0 sm:$0xff] (%p6441_p13) }
0x155f   : >> { %9183 = vmatprep.subr.bf16.mxu0 %v10706_v41  ;;  %9188 = vmatpush3.bf16.msra.mxu1 %v9187_v25  ;;  %s12664_s0 = sld [smem:[#allocation86_spill]] (%p6441_p13)  ;;  %v8361_v46 = vld [vmem:[#allocation8] ss:$0 sm:$0xff] (%p6441_p13)  ;;  %v8363_v55 = vld [vmem:[#allocation9] ss:$0 sm:$0xff] (%p6441_p13)  ;;  %s12368_s11 = smov (%p6441_p13), 0  }
0x1560   : >> { %9189 = vmatprep.subr.bf16.mxu1 %v10706_v41  ;;  %v9287_v62 = vadd.f32 (%p6441_p13), %v8363_v55, %v8361_v46 }
0x1562   : >> { %9185 = vmatpush3.bf16.msra.mxu0 %v9184_v59 }
0x1563   : >> { %9191 = vmatpush3.bf16.msra.mxu1 %v9190_v30  ;;  %9192 = vmatprep.subr.bf16.mxu0 (%p6441_p13), %v10704_v22 }
0x1564   : > { %v6622_v24 = vld [vmem:[%s12662_s5] sm:$0xff] (%p6441_p13)  ;;  %v6623_v61 = vld [vmem:[%s12662_s5 + $0x8] sm:$0xff] (%p6441_p13)  ;;  %v6624_v57 = vld [vmem:[%s12662_s5 + $0x10] sm:$0xff] (%p6441_p13)  ;;  %9198 = vmatprep.subr.bf16.mxu1 (%p6441_p13), %v10704_v22 }
0x1565   : >> { %8822 = vmatmul.mubr.msk.f32.vlgmr.msra.gmra.mrb[0].mxu0 %vm2560_vm0, %v10576_v17  ;;  %v9193_v27 = vpack.c.bf16 (%p6441_p13), %v6623_v61, %v6622_v24  ;;  %v6625_v32 = vld [vmem:[%s12662_s5 + $0x18] sm:$0xff] (%p6441_p13)  ;;  %v6627_v29 = vld [vmem:[%s12663_s1] sm:$0xff] (%p6441_p13)  ;;  %v6628_v5 = vld [vmem:[%s12663_s1 + $0x8] sm:$0xff] (%p6441_p13) }
0x1566   : > { %8843 = vmatprep.mubr.msk.f32.mxu0 (%p6441_p13), %vm10705_vm9, %v10697_v60  ;;  %v9196_v28 = vpack.c.bf16 (%p6441_p13), %v6625_v32, %v6624_v57  ;;  %v9199_v51 = vpack.c.bf16 (%p6441_p13), %v6628_v5, %v6627_v29  ;;  %v6630_v34 = vld [vmem:[%s12664_s0] sm:$0xff] (%p6441_p13)  ;;  %v6631_v9 = vld [vmem:[%s12664_s0 + $0x8] sm:$0xff] (%p6441_p13)  ;;  %v6632_v52 = vld [vmem:[%s12664_s0 + $0x10] sm:$0xff] (%p6441_p13) }
0x1567   : > { %9194 = vmatpush3.bf16.msra.mxu0 (%p6441_p13), %v9193_v27  ;;  %v9202_v49 = vpack.c.bf16 (%p6441_p13), %v6631_v9, %v6630_v34  ;;  %v6633_v35 = vld [vmem:[%s12664_s0 + $0x18] sm:$0xff] (%p6441_p13) }
0x1568   : > { %9195 = vmatprep.subr.bf16.mxu0 (%p6441_p13), %v10704_v22  ;;  %v9205_v43 = vpack.c.bf16 (%p6441_p13), %v6633_v35, %v6632_v52 }
0x156b   : > { %9197 = vmatpush3.bf16.msra.mxu0 (%p6441_p13), %v9196_v28 }
0x1638   : >> { %v6529_v33 = vpop.f32.mrb[0].mxu0 }
0x1639   : >> { %v6530_v42 = vadd.f32 %v8355_v39, %v6529_v33  ;;  %v8823_v36 = vpop.f32.mrb[1].mxu0 }
0x163b   : >> { %v6533_v44 = vmax.f32 %v6530_v42, 0.0 }
0x163d   : >> { %8833 = vmatmul.mubr.msk.f32.vlgmr.msra.gmra.mrb[0].mxu1 %vm2560_vm0, %v6533_v44 }
0x163e   : > { %8850 = vmatprep.mubr.msk.f32.mxu1 (%p6441_p13), %vm10705_vm9, %v10697_v60  ;;  %9200 = vmatpush3.bf16.msra.mxu1 (%p6441_p13), %v9199_v51 }
0x163f   : > { %9201 = vmatprep.subr.bf16.mxu1 (%p6441_p13), %v10704_v22 }
0x1710   : >> { %v6616_v23 = vpop.f32.mrb[0].mxu1 }
0x1711   : >> { %v6617_v20 = vadd.f32 %v8357_v58, %v6616_v23  ;;  %v8834_v48 = vpop.f32.mrb[1].mxu1  ;;  %6443 = sbr.rel (!%p6441_p13) target bundleno = 5460 (0x1554), region = 632 }
0x1713   : >> { %v6620_v26 = vadd.f32 %v10576_v17, %v6617_v20 }
0x1715   : >> { %v6621_v37 = vmax.f32 %v6620_v26, 0.0  }
0x1717   : >> { %v10575_v17 = vmov %v6621_v37   ;;  %8844 = vmatmul.mubr.msk.f32.vlgmr.msra.gmra.mrb[0].mxu0 (%p6441_p13), %vm2560_vm0, %v6621_v37 }
0x17ea   : > { %v6710_v10 = vpop.f32.mrb[0].mxu0 }
0x17eb   : > { %v6711_v45 = vadd.f32 %v8359_v2, %v6710_v10  ;;  %v8845_v47 = vpop.f32.mrb[1].mxu0 }
0x17ed   : > { %v6714_v50 = vmax.f32 %v6711_v45, 0.0 }
0x17ef   : > { %8851 = vmatmul.mubr.msk.f32.vlgmr.msra.gmra.mrb[0].mxu1 %vm5072_vm7, %v6714_v50 }
0x17f0   : > { %9203 = vmatpush3.bf16.msra.mxu1 %v9202_v49  ;;  %8861 = vmatprep.mubr.msk.f32.mxu1 %vm10705_vm9, %v10697_v60 }
0x17f1   : > { %9204 = vmatprep.subr.bf16.mxu1 %v10704_v22 }
0x17f4   : > { %9206 = vmatpush3.bf16.msra.mxu1 %v9205_v43 }
0x17f7   : > { %8862 = vmatmul.mubr.msk.f32.vlgmr.msra.gmra.mrb[0].mxu1 %vm2560_vm0, %v6621_v37 }
0x18ca   : > { %v6866_v63 = vpop.f32.mrb[0].mxu1 }
0x18cb   : > { %v9288_v0 = vadd.f32 %v9287_v62, %v6866_v63  ;;  %v8863_v1 = vpop.f32.mrb[1].mxu1 }
0x18cd   : > { %v6871_v4 = vmax.f32 %v9288_v0, 0.0  }
0x18cf   : > { %v10582_v6 = vmov %v6871_v4  }
0x18d0 LB: >> { %s12665_s2 = sld [smem:[#allocation87_spill]]  ;;  %s12666_s8 = sld [smem:[#allocation89_spill]]  ;;  %v10709_v54 = vmov 0.0|0.0   ;;  %vm10710_vm12 = vmmov 0   ;;  %v10711_v7 = vmov 0.0   ;;  %s10588_s11 = sphi %s12368_s11, %s6877_s11   ;;  %v10584_v6 = vphi %v10582_v6, %v10583_v6  }
0x18d1   : >> { %9207 = vmatprep.subr.bf16.mxu0 %v10709_v54  ;;  %s12667_s3 = sld [smem:[#allocation88_spill]]  ;;  %8868 = vmatprep.mubr.msk.f32.mxu0 %vm10710_vm12, %v10711_v7  ;;  %s8365_s6 = sshll.u32 %s10588_s11, 4 }
0x18d2   : >> { %9210 = vmatprep.subr.bf16.mxu1 %v10709_v54  ;;  %8875 = vmatprep.mubr.msk.f32.mxu1 %vm10710_vm12, %v10711_v7  ;;  %s12668_s1 = sld [smem:[#allocation90_spill]] }
0x18d6   : >> { %s6880_s0 = scalar_lea.vmem %s12665_s2, %s8365_s6  ;;  %s6965_s4 = scalar_lea.vmem %s12666_s8, %s8365_s6 }
0x18d7   : >> { %v6881_v11 = vld [vmem:[%s6880_s0] sm:$0xff]  ;;  %v6882_v12 = vld [vmem:[%s6880_s0 + $0x8] sm:$0xff]  ;;  %s6883_s5 = scalar_lea.vmem %s12667_s3, %s10588_s11 }
0x18d8   : >> { %v9208_v40 = vpack.c.bf16 %v6882_v12, %v6881_v11  ;;  %v6966_v53 = vld [vmem:[%s6965_s4] sm:$0xff]  ;;  %v6967_v14 = vld [vmem:[%s6965_s4 + $0x8] sm:$0xff]  ;;  %s6968_s0 = scalar_lea.vmem %s12668_s1, %s10588_s11  ;;  %s6877_s11 = sadd.s32 1, %s10588_s11  }
0x18d9   : >> { %v9211_v16 = vpack.c.bf16 %v6967_v14, %v6966_v53  ;;  %v8366_v17 = vld [vmem:[%s6883_s5] ss:$0 sm:$0xff]  ;;  %p6874_p0 = scmp.ge.s32.totalorder %s6877_s11, 10  }
0x18da   : >> { %9209 = vmatpush3.bf16.msra.mxu0 %v9208_v40  ;;  %v8368_v38 = vld [vmem:[%s6968_s0] ss:$0 sm:$0xff]  ;;  %s12669_s4 = sld [smem:[#allocation91_spill]] (%p6874_p0)  ;;  %s12670_s5 = sld [smem:[#allocation92_spill]] (%p6874_p0)  ;;  %v8370_v39 = vld [vmem:[#allocation11] ss:$0 sm:$0xff] (%p6874_p0) }
0x18db   : >> { %9212 = vmatpush3.bf16.msra.mxu1 %v9211_v16  ;;  %s12671_s2 = sld [smem:[#allocation93_spill]] (%p6874_p0)  ;;  %9213 = vmatprep.subr.bf16.mxu0 (%p6874_p0), %v10704_v22  ;;  %v8372_v48 = vld [vmem:[#allocation12] ss:$0 sm:$0xff] (%p6874_p0)  ;;  %v8374_v26 = vld [vmem:[#allocation14] ss:$0 sm:$0xff] (%p6874_p0)  ;;  %s12402_s1 = smov (%p6874_p0), 0  }
0x18dc   : > { %8885 = vmatprep.subr.mxu1 (%p6874_p0), %v10697_v60  ;;  %v9291_v37 = vadd.f32 (%p6874_p0), %v8374_v26, %v8372_v48 }
0x18dd   : >> { %8869 = vmatmul.mubr.msk.f32.vlgmr.msra.gmra.mrb[0].mxu0 %vm5072_vm7, %v10584_v6 }
0x18de   : > { %8882 = vmatprep.mubr.msk.f32.mxu0 (%p6874_p0), %vm10705_vm9, %v10697_v60 }
0x18e0   : > { %v7051_v59 = vld [vmem:[%s12669_s4] sm:$0xff] (%p6874_p0)  ;;  %v7052_v3 = vld [vmem:[%s12669_s4 + $0x8] sm:$0xff] (%p6874_p0) }
0x18e1   : > { %v9214_v31 = vpack.c.bf16 (%p6874_p0), %v7052_v3, %v7051_v59  ;;  %v7054_v30 = vld [vmem:[%s12670_s5] sm:$0xff] (%p6874_p0)  ;;  %v7057_v42 = vld [vmem:[%s12671_s2 + $0x8] sm:$0xff] (%p6874_p0) }
0x18e2   : > { %v7056_v33 = vld [vmem:[%s12671_s2] sm:$0xff] (%p6874_p0) }
0x18e3   : > { %9215 = vmatpush3.bf16.msra.mxu0 (%p6874_p0), %v9214_v31  ;;  %v9217_v23 = vpack.c.bf16 (%p6874_p0), %v7057_v42, %v7056_v33 }
0x19b0   : >> { %v6960_v41 = vpop.f32.mrb[0].mxu0 }
0x19b1   : >> { %v6961_v18 = vadd.f32 %v8366_v17, %v6960_v41  ;;  %v8870_v19 = vpop.f32.mrb[1].mxu0 }
0x19b3   : >> { %v6964_v21 = vmax.f32 %v6961_v18, 0.0 }
0x19b5   : >> { %8876 = vmatmul.mubr.msk.f32.vlgmr.msra.gmra.mrb[0].mxu1 %vm5072_vm7, %v6964_v21 }
0x19b6   : > { %8887 = vmatprep.mubr.msk.f32.mxu1 (%p6874_p0), %vm10705_vm9, %v10697_v60  ;;  %8886 = vmatpush3.msra.mxu1 (%p6874_p0), %v7054_v30 }
0x19b7   : > { %9216 = vmatprep.subr.bf16.mxu1 (%p6874_p0), %v10704_v22 }
0x1a88   : >> { %v7045_v8 = vpop.f32.mrb[0].mxu1 }
0x1a89   : >> { %v7046_v56 = vadd.f32 %v8368_v38, %v7045_v8  ;;  %v8877_v13 = vpop.f32.mrb[1].mxu1  ;;  %6876 = sbr.rel (!%p6874_p0) target bundleno = 6352 (0x18d0), region = 643 }
0x1a8b   : >> { %v7049_v15 = vadd.f32 %v10584_v6, %v7046_v56 }
0x1a8d   : >> { %v7050_v25 = vmax.f32 %v7049_v15, 0.0  }
0x1a8f   : >> { %v10583_v6 = vmov %v7050_v25   ;;  %8883 = vmatmul.mubr.msk.f32.vlgmr.msra.gmra.mrb[0].mxu0 (%p6874_p0), %vm5072_vm7, %v7050_v25 }
0x1b62   : > { %v7134_v36 = vpop.f32.mrb[0].mxu0 }
0x1b63   : > { %v7135_v44 = vadd.f32 %v8370_v39, %v7134_v36  ;;  %v8884_v58 = vpop.f32.mrb[1].mxu0 }
0x1b65   : > { %v7138_v20 = vmax.f32 %v7135_v44, 0.0 }
0x1b67   : > { %8888 = vmatmul.mubr.msk.f32.vlgmr.msra.gmra.mrb[0].mxu1 %vm5570_vm8, %v7138_v20 }
0x1b68   : > { %9218 = vmatpush3.bf16.msra.mxu1 %v9217_v23  ;;  %8894 = vmatprep.mubr.msk.f32.mxu1 %vm10705_vm9, %v10697_v60 }
0x1b6f   : > { %8895 = vmatmul.mubr.msk.f32.vlgmr.msra.gmra.mrb[0].mxu1 %vm5072_vm7, %v7050_v25 }
0x1c42   : > { %v7290_v22 = vpop.f32.mrb[0].mxu1 }
0x1c43   : > { %v9292_v24 = vadd.f32 %v9291_v37, %v7290_v22  ;;  %v8896_v61 = vpop.f32.mrb[1].mxu1 }
0x1c45   : > { %v7295_v57 = vmax.f32 %v9292_v24, 0.0  }
0x1c47   : > { %v10590_v27 = vmov %v7295_v57  }
0x1c48 LB: >> { %s12672_s11 = sld [smem:[#allocation94_spill]]  ;;  %s12673_s8 = sld [smem:[#allocation96_spill]]  ;;  %v10712_v32 = vmov 0.0   ;;  %vm10713_vm13 = vmmov 0   ;;  %s10596_s1 = sphi %s12402_s1, %s7301_s1   ;;  %v10592_v27 = vphi %v10590_v27, %v10591_v27  }
0x1c49   : >> { %s12674_s3 = sld [smem:[#allocation95_spill]]  ;;  %8897 = vmatprep.subr.mxu0 %v10712_v32  ;;  %8899 = vmatprep.mubr.msk.f32.mxu0 %vm10713_vm13, %v10712_v32  ;;  %s8376_s6 = sshll.u32 %s10596_s1, 3 }
0x1c4a   : >> { %8902 = vmatprep.subr.mxu1 %v10712_v32  ;;  %s12675_s0 = sld [smem:[#allocation97_spill]]  ;;  %8904 = vmatprep.mubr.msk.f32.mxu1 %vm10713_vm13, %v10712_v32 }
0x1c4e   : >> { %s7304_s5 = scalar_lea.vmem %s12672_s11, %s8376_s6  ;;  %s7388_s2 = scalar_lea.vmem %s12673_s8, %s8376_s6 }
0x1c4f   : >> { %v7305_v28 = vld [vmem:[%s7304_s5] sm:$0xff]  ;;  %s7306_s4 = scalar_lea.vmem %s12674_s3, %s10596_s1 }
0x1c50   : >> { %8898 = vmatpush3.msra.mxu0 %v7305_v28  ;;  %v7389_v29 = vld [vmem:[%s7388_s2] sm:$0xff]  ;;  %s7390_s9 = scalar_lea.vmem %s12675_s0, %s10596_s1  ;;  %s7301_s1 = sadd.s32 1, %s10596_s1  }
0x1c51   : >> { %8900 = vmatmul.mubr.msk.f32.vlgmr.msra.gmra.mrb[0].mxu0 %vm5570_vm8, %v10592_v27  ;;  %8903 = vmatpush3.msra.mxu1 %v7389_v29  ;;  %v8377_v5 = vld [vmem:[%s7306_s4] ss:$0 sm:$0xff]  ;;  %p7298_p1 = scmp.ge.s32.totalorder %s7301_s1, 10  }
0x1c52   : >> { %v8379_v10 = vld [vmem:[%s7390_s9] ss:$0 sm:$0xff]  ;;  %8907 = vmatprep.subr.mxu0 (%p7298_p1), %v10697_v60  ;;  %v7473_v35 = vld [vmem:[#allocation15] sm:$0xff] (%p7298_p1)  ;;  %8909 = vmatprep.mubr.msk.f32.mxu0 (%p7298_p1), %vm10705_vm9, %v10697_v60  ;;  %v8381_v46 = vld [vmem:[#allocation17] ss:$0 sm:$0xff] (%p7298_p1)  ;;  %vm7716_vm14 = vcmask (%p7298_p1), 19456  }
0x1c53   : > { %8908 = vmatpush3.msra.mxu0 (%p7298_p1), %v7473_v35  ;;  %8912 = vmatprep.subr.mxu1 (%p7298_p1), %v10697_v60  ;;  %v7475_v43 = vld [vmem:[#allocation18] sm:$0xff] (%p7298_p1)  ;;  %v7477_v1 = vld [vmem:[#allocation21] sm:$0xff] (%p7298_p1)  ;;  %v8383_v4 = vld [vmem:[#allocation20] ss:$0 sm:$0xff] (%p7298_p1) }
0x1c54   : > { %v8385_v6 = vld [vmem:[#allocation23] ss:$0 sm:$0xff] (%p7298_p1) }
0x1c55   : > { %v9295_v54 = vadd.f32 (%p7298_p1), %v8385_v6, %v8383_v4 }
0x1d24   : >> { %v7383_v51 = vpop.f32.mrb[0].mxu0 }
0x1d25   : >> { %v7384_v2 = vadd.f32 %v8377_v5, %v7383_v51  ;;  %v8901_v34 = vpop.f32.mrb[1].mxu0 }
0x1d27   : >> { %v7387_v9 = vmax.f32 %v7384_v2, 0.0 }
0x1d29   : >> { %8905 = vmatmul.mubr.msk.f32.vlgmr.msra.gmra.mrb[0].mxu1 %vm5570_vm8, %v7387_v9 }
0x1d2a   : > { %8914 = vmatprep.mubr.msk.f32.mxu1 (%p7298_p1), %vm10705_vm9, %v10697_v60  ;;  %8913 = vmatpush3.msra.mxu1 (%p7298_p1), %v7475_v43 }
0x1d2b   : > { %8917 = vmatprep.subr.mxu1 (%p7298_p1), %v10697_v60 }
0x1dfc   : >> { %v7467_v45 = vpop.f32.mrb[0].mxu1 }
0x1dfd   : >> { %v7468_v47 = vadd.f32 %v8379_v10, %v7467_v45  ;;  %v8906_v49 = vpop.f32.mrb[1].mxu1  ;;  %7300 = sbr.rel (!%p7298_p1) target bundleno = 7240 (0x1c48), region = 654 }
0x1dff   : >> { %v7471_v50 = vadd.f32 %v10592_v27, %v7468_v47 }
0x1e01   : >> { %v7472_v52 = vmax.f32 %v7471_v50, 0.0  }
0x1e03   : >> { %v10591_v27 = vmov %v7472_v52   ;;  %8910 = vmatmul.mubr.msk.f32.vlgmr.msra.gmra.mrb[0].mxu0 (%p7298_p1), %vm5570_vm8, %v7472_v52 }
0x1ed6   : > { %v7554_v55 = vpop.f32.mrb[0].mxu0 }
0x1ed7   : > { %v7555_v62 = vadd.f32 %v8381_v46, %v7554_v55  ;;  %v8911_v63 = vpop.f32.mrb[1].mxu0 }
0x1ed9   : > { %v7558_v0 = vmax.f32 %v7555_v62, 0.0 }
0x1edb   : > { %8915 = vmatmul.mubr.msk.f32.vlgmr.msra.gmra.mrb[0].mxu1 %vm5570_vm8, %v7558_v0 }
0x1edc   : > { %8918 = vmatpush3.msra.mxu1 %v7477_v1  ;;  %8919 = vmatprep.mubr.msk.f32.mxu1 %vm10705_vm9, %v10697_v60 }
0x1ee3   : > { %8920 = vmatmul.mubr.msk.f32.vlgmr.msra.gmra.mrb[0].mxu1 %vm5570_vm8, %v7472_v52 }
0x1fb6   : > { %v7710_v7 = vpop.f32.mrb[0].mxu1 }
0x1fb7   : > { %v9296_v11 = vadd.f32 %v9295_v54, %v7710_v7  ;;  %v8921_v12 = vpop.f32.mrb[1].mxu1 }
0x1fb9   : > { %v7715_v40 = vmax.f32 %v9296_v11, 0.0 }
0x1fbb   : > { %7717 = vst.msk [vmem:[%s11353_s10] sm:$0xf] %vm7716_vm14, %v7715_v40 }
0x1fbc PF: > { %s180_s7 = sadd.s32 1, %s10436_s7  }
0x1fbd   : > { %p177_p4 = scmp.ge.s32.totalorder %s180_s7, 4  }
0x1fbf   :  { %179 = sbr.rel (!%p177_p4) target bundleno = 170 (0xaa), region = 665 }
0x1fc6   :  { %7737 = vsyncpa [#allocation5], 1 }
0x1fc7   :  { %7739 = vsyncpa [#allocation5 + $0x1], 1 }
0x1fc8   :  { %7740 = vsyncpa [#allocation7], 1 }
0x1fc9   :  { %7741 = vsyncpa [#allocation10], 1 }
0x1fca   :  { %7742 = vsyncpa [#allocation13], 1 }
0x1fcb   :  { %7743 = vsyncpa [#allocation16], 1 }
0x1fcc   :  { %7744 = vsyncpa [#allocation19], 1 }
0x1fcd   :  { %7745 = vsyncpa [#allocation22], 1 }

</bundles_post_ra>
